<compile_context>
chip_gen: v6e
topology: v6e:2x2x1
jax: 0.10.0
libtpu: 0.0.40
codegen_flags: <defaults>
</compile_context>

<pallas_src>
import functools

import jax
import jax.numpy as jnp
import numpy as np
from jax.experimental import pallas as pl
from jax.experimental.pallas import tpu as pltpu

BN_EPS = 1e-5
KSIZE = 3


# ----------------------------- Pallas kernel --------------------------------
def _batchnorm(acc, gamma, beta):
    """Training-mode BatchNorm2d: single-pass batch stats over rows, f32 math.

    Biased variance, no running-stat update (matches nn.BatchNorm2d training
    forward; eval-mode running statistics are intentionally not modeled).
    """
    m = acc.shape[0]
    col_sum = jnp.sum(acc, axis=0, keepdims=True)
    col_sq = jnp.sum(acc * acc, axis=0, keepdims=True)
    mean = col_sum * (1.0 / m)
    var = jnp.maximum(col_sq * (1.0 / m) - mean * mean, 0.0)
    return (acc - mean) * jax.lax.rsqrt(var + BN_EPS) * gamma + beta


def _make_reblock_kernel(N, Ho, Wo, Cin, C, stride, Wm):
    """Fused conv1+bn1+relu+conv2+bn2+add+relu; whole block VMEM-resident.

    Each conv = one big-K bf16 GEMM.  The 9 shifted tap windows are assembled
    along K in a bf16 im2col scratch with lane-offset stores (VMEM-local, no
    HBM im2col, no zero rows in K).
    """
    M = N * Ho * Wo
    s = stride
    K1 = KSIZE * KSIZE * Cin     # conv1 contraction (real data only)
    K2 = KSIZE * KSIZE * C       # conv2 contraction (real data only)

    def kernel(ph_ref, w1_ref, g1_ref, b1_ref, w2_ref, g2_ref, b2_ref,
               sc_ref, o_ref, mid_ref, lhs_ref):
        # ---------------- conv1: pack 9 taps along K, one GEMM --------------
        for kh in range(KSIZE):
            for kw in range(KSIZE):
                t = kh * KSIZE + kw
                p = (kh % s) * s + (kw % s)            # phase plane of tap
                r0, c0 = kh // s, kw // s              # unit-stride offsets
                win = ph_ref[p, :, r0:r0 + Ho, c0:c0 + Wo, :]  # [N,Ho,Wo,Cin] bf16
                lhs_ref[:, t * Cin:(t + 1) * Cin] = win.reshape(M, Cin)
        acc1 = jnp.dot(lhs_ref[:, :K1], w1_ref[...],
                       preferred_element_type=jnp.float32)       # [M, C] f32
        out1 = jnp.maximum(_batchnorm(acc1, g1_ref[...], b1_ref[...]), 0.0)

        # Halo-padded bf16 intermediate stays in VMEM (zero border == pad=1).
        # Only the 1-pixel halo conv2 actually reads is zeroed; the single
        # f32->bf16 cast of the intermediate happens at this store.
        zrow = jnp.zeros((N, 1, Wm, C), jnp.bfloat16)
        mid_ref[:, 0:1, :, :] = zrow
        mid_ref[:, Ho + 1:Ho + 2, :, :] = zrow
        zcol = jnp.zeros((N, Ho, 1, C), jnp.bfloat16)
        mid_ref[:, 1:1 + Ho, 0:1, :] = zcol
        mid_ref[:, 1:1 + Ho, Wo + 1:Wo + 2, :] = zcol
        mid_ref[:, 1:1 + Ho, 1:1 + Wo, :] = (
            out1.reshape(N, Ho, Wo, C).astype(jnp.bfloat16))

        # ---------------- conv2 (stride 1): pack 9 taps along K, one GEMM ---
        for kh in range(KSIZE):
            for kw in range(KSIZE):
                t = kh * KSIZE + kw
                win = mid_ref[:, kh:kh + Ho, kw:kw + Wo, :]       # [N,Ho,Wo,C] bf16
                lhs_ref[:, t * C:(t + 1) * C] = win.reshape(M, C)
        acc2 = jnp.dot(lhs_ref[:, :K2], w2_ref[...],
                       preferred_element_type=jnp.float32)        # [M, C] f32
        out2 = _batchnorm(acc2, g2_ref[...], b2_ref[...])
        # Residual add + ReLU on the real C channels only (no zero-pad lanes).
        o_ref[...] = jnp.maximum(out2 + sc_ref[...], 0.0)

    return kernel


# ------------------------------ host-side glue ------------------------------
def _full_block_spec(shape):
    nd = len(shape)
    return pl.BlockSpec(shape, lambda i, _nd=nd: (0,) * _nd)


def _round_up(x, m):
    return (x + m - 1) // m * m


def _phase_decompose(x_nhwc, stride, Ho, Wo):
    """Pad + space-to-depth so a stride-s 3x3 conv becomes unit-stride shifted
    slices inside the kernel.  Touches x once (no 9x im2col blow-up in HBM)."""
    N, H, W, C = x_nhwc.shape
    s = stride
    Hp = Ho + (KSIZE - 1) // s
    Wp = Wo + (KSIZE - 1) // s
    xp = jnp.pad(x_nhwc, ((0, 0), (1, 1), (1, 1), (0, 0)))
    xp = jnp.pad(xp, ((0, 0), (0, s * Hp - xp.shape[1]),
                      (0, s * Wp - xp.shape[2]), (0, 0)))
    ph = xp.reshape(N, Hp, s, Wp, s, C).transpose(2, 4, 0, 1, 3, 5)
    return ph.reshape(s * s, N, Hp, Wp, C)


def _conv_weight_gemm(w_oihw, dtype=jnp.bfloat16):
    """PyTorch (Cout,Cin,3,3) -> [9*Cin, Cout] GEMM RHS, rows ordered (kh,kw,cin)."""
    cout, cin, kh, kw = w_oihw.shape
    w = jnp.transpose(w_oihw, (2, 3, 1, 0)).reshape(kh * kw * cin, cout)
    return w.astype(dtype)


def _bn_vec(v):
    return v.reshape(1, -1).astype(jnp.float32)


def reblock_forward(x_nhwc, conv1_w, conv2_w, bn1_g, bn1_b, bn2_g, bn2_b,
                    stride, in_planes, planes):
    N, H, W, Cin = x_nhwc.shape
    Ho = (H + 2 - KSIZE) // stride + 1
    Wo = (W + 2 - KSIZE) // stride + 1
    M = N * Ho * Wo
    Wm = _round_up(Wo + 2, 8)            # sublane-aligned halo-buffer width

    # Single host-side bf16 cast of the activation (halves the phase DMA).
    phases = _phase_decompose(x_nhwc.astype(jnp.bfloat16), stride, Ho, Wo)
    w1 = _conv_weight_gemm(conv1_w)      # [9*Cin,    planes] bf16, real K only
    w2 = _conv_weight_gemm(conv2_w)      # [9*planes, planes] bf16, real K only
    g1, b1 = _bn_vec(bn1_g), _bn_vec(bn1_b)
    g2, b2 = _bn_vec(bn2_g), _bn_vec(bn2_b)

    # Option-A shortcut (or identity), real `planes` channels only (f32 so the
    # residual add carries no extra rounding).
    # TODO(synk): option-A hard-codes the ::2 subsample (stride==2 variant).
    if stride != 1 or in_planes != planes:
        sc = shortcut_option_a(x_nhwc, planes)
    else:
        sc = x_nhwc
    sc_flat = sc.reshape(M, planes).astype(jnp.float32)

    # TODO(synk): grid=(1,) — everything fits in VMEM at these shapes.  For
    # production M, tile the row axis ("parallel" so v7x's 2nd TensorCore is
    # used), switch BN to two-pass partial sums, size tiles for v7x's 64 MiB
    # VMEM (vmem_limit_bytes), and pack the store as [N*Ho, Wo*planes] for a
    # fully lane-dense output.
    kernel = _make_reblock_kernel(N, Ho, Wo, Cin, planes, stride, Wm)
    args = (phases, w1, g1, b1, w2, g2, b2, sc_flat)
    lhs_k = KSIZE * KSIZE * max(Cin, planes)
    out = pl.pallas_call(
        kernel,
        out_shape=jax.ShapeDtypeStruct((M, planes), jnp.float32),
        grid=(1,),
        in_specs=[_full_block_spec(a.shape) for a in args],
        out_specs=_full_block_spec((M, planes)),
        scratch_shapes=[
            pltpu.VMEM((N, Ho + 2, Wm, planes), jnp.bfloat16),   # halo mid
            pltpu.VMEM((M, lhs_k), jnp.bfloat16),                # im2col LHS
        ],
        compiler_params=pltpu.CompilerParams(
            dimension_semantics=("arbitrary",)),
    )(*args)
    return out.reshape(N, Ho, Wo, planes)


def build_conv_weights(origin_weight, P_weight, new_param,
                       conv_index, conv_shape, layer_index):
    """Mirror of reBlock.__init__ weight construction (loop over 40 comps)."""
    def build(li):
        lo, hi = conv_index[li]
        w = origin_weight[lo:hi].reshape(conv_shape[li])
        contrib = jnp.einsum("i,ik->k", new_param,
                             P_weight[:, lo:hi]).reshape(conv_shape[li])
        return w + contrib
    return build(layer_index[0]), build(layer_index[1])


# --------------------------- pure-JAX reference ------------------------------
def im2col(x_nhwc, ksize=3, stride=1, pad=1):
    N, H, W, C = x_nhwc.shape
    xp = jnp.pad(x_nhwc, ((0, 0), (pad, pad), (pad, pad), (0, 0)))
    Ho = (H + 2 * pad - ksize) // stride + 1
    Wo = (W + 2 * pad - ksize) // stride + 1
    cols = []
    for kh in range(ksize):
        for kw in range(ksize):
            cols.append(xp[:, kh:kh + stride * Ho:stride,
                           kw:kw + stride * Wo:stride, :])
    patches = jnp.stack(cols, axis=3)
    return patches.reshape(N * Ho * Wo, ksize * ksize * C), Ho, Wo


def shortcut_option_a(x_nhwc, planes):
    sc = x_nhwc[:, ::2, ::2, :]
    pad_c = planes // 4
    return jnp.pad(sc, ((0, 0), (0, 0), (0, 0), (pad_c, pad_c)))


def _ref_fused(patches, w, g, b, sc=None):
    y = patches @ w
    mean = y.mean(axis=0, keepdims=True)
    var = jnp.square(y - mean).mean(axis=0, keepdims=True)
    out = (y - mean) / jnp.sqrt(var + BN_EPS) * g + b
    if sc is not None:
        out = out + sc
    return jnp.maximum(out, 0.0)


def reblock_forward_ref(x_nhwc, conv1_w, conv2_w, bn1_g, bn1_b, bn2_g, bn2_b,
                        stride, in_planes, planes):
    N, H, W, Cin = x_nhwc.shape
    p1, Ho, Wo = im2col(x_nhwc, stride=stride, pad=1)
    out1 = _ref_fused(p1, _conv_weight_gemm(conv1_w, jnp.float32),
                      bn1_g.reshape(1, -1), bn1_b.reshape(1, -1))
    p2, _, _ = im2col(out1.reshape(N, Ho, Wo, planes), stride=1, pad=1)
    if stride != 1 or in_planes != planes:
        sc = shortcut_option_a(x_nhwc, planes)
    else:
        sc = x_nhwc
    out = _ref_fused(p2, _conv_weight_gemm(conv2_w, jnp.float32),
                     bn2_g.reshape(1, -1), bn2_b.reshape(1, -1),
                     sc=sc.reshape(N * Ho * Wo, planes))
    return out.reshape(N, Ho, Wo, planes)


# --------------------------------- main --------------------------------------
if __name__ == "__main__":
    key = jax.random.PRNGKey(0)
    keys = jax.random.split(key, 8)

    # Small synthetic shapes consistent with the module.
    N, H, W = 2, 16, 16
    in_planes, planes, stride = 16, 32, 2          # stride!=1 -> option-A shortcut
    low_dimension = 40

    n1 = planes * in_planes * 3 * 3                # conv1 weight element count
    n2 = planes * planes * 3 * 3                   # conv2 weight element count
    conv_index = [(0, n1), (n1, n1 + n2)]
    conv_shape = [(planes, in_planes, 3, 3), (planes, planes, 3, 3)]
    layer_index = [0, 1]

    origin_weight = jax.random.normal(keys[0], (n1 + n2,), jnp.float32) * 0.05
    P_weight = jax.random.normal(keys[1], (low_dimension, n1 + n2), jnp.float32) * 0.05
    new_param = jax.random.normal(keys[2], (low_dimension,), jnp.float32) * 0.05
    bn1_g = 1.0 + 0.1 * jax.random.normal(keys[3], (planes,), jnp.float32)
    bn1_b = 0.1 * jax.random.normal(keys[4], (planes,), jnp.float32)
    bn2_g = 1.0 + 0.1 * jax.random.normal(keys[5], (planes,), jnp.float32)
    bn2_b = 0.1 * jax.random.normal(keys[6], (planes,), jnp.float32)

    conv1_w, conv2_w = build_conv_weights(
        origin_weight, P_weight, new_param, conv_index, conv_shape, layer_index)

    # Input (PyTorch-style NCHW) -> NHWC for the kernel path.
    x_nchw = jax.random.normal(keys[7], (N, in_planes, H, W), jnp.float32)
    x_nhwc = jnp.transpose(x_nchw, (0, 2, 3, 1))

    fwd = functools.partial(reblock_forward, stride=stride,
                            in_planes=in_planes, planes=planes)
    out = jax.jit(fwd)(x_nhwc, conv1_w, conv2_w, bn1_g, bn1_b, bn2_g, bn2_b)
    out = jax.block_until_ready(out)

    # Sanity check against a pure-JAX f32 reference of the same math.
    # Tolerance sized for bf16 MXU operands (f32 accumulation / BN math).
    ref = reblock_forward_ref(x_nhwc, conv1_w, conv2_w, bn1_g, bn1_b,
                              bn2_g, bn2_b, stride, in_planes, planes)
    np.testing.assert_allclose(np.asarray(out), np.asarray(ref),
                               rtol=3e-2, atol=3e-2)

    print("KERNEL_OK")
</pallas_src>

<mosaic_0001>
module attributes {stable_mosaic.version = 11 : i64} {
  func.func @kernel(%arg0: i32, %arg1: memref<4x2x9x9x16xbf16, #tpu.memory_space<vmem>>, %arg2: memref<144x32xbf16, #tpu.memory_space<vmem>>, %arg3: memref<1x32xf32, #tpu.memory_space<vmem>>, %arg4: memref<1x32xf32, #tpu.memory_space<vmem>>, %arg5: memref<288x32xbf16, #tpu.memory_space<vmem>>, %arg6: memref<1x32xf32, #tpu.memory_space<vmem>>, %arg7: memref<1x32xf32, #tpu.memory_space<vmem>>, %arg8: memref<128x32xf32, #tpu.memory_space<vmem>>, %arg9: memref<128x32xf32, #tpu.memory_space<vmem>>, %arg10: memref<2x10x16x32xbf16, #tpu.memory_space<vmem>>, %arg11: memref<128x288xbf16, #tpu.memory_space<vmem>>) attributes {dimension_semantics = [#tpu.dimension_semantics<arbitrary>], iteration_bounds = array<i64: 1>, scalar_prefetch = 0 : i64, scratch_operands = 2 : i64, tpu.core_type = #tpu.core_type<tc>, window_params = [{pipeline_mode = #tpu.pipeline_mode<synchronous>, transform_indices = @transform_0, window_bounds = array<i64: 4, 2, 9, 9, 16>}, {pipeline_mode = #tpu.pipeline_mode<synchronous>, transform_indices = @transform_1, window_bounds = array<i64: 144, 32>}, {pipeline_mode = #tpu.pipeline_mode<synchronous>, transform_indices = @transform_2, window_bounds = array<i64: 1, 32>}, {pipeline_mode = #tpu.pipeline_mode<synchronous>, transform_indices = @transform_3, window_bounds = array<i64: 1, 32>}, {pipeline_mode = #tpu.pipeline_mode<synchronous>, transform_indices = @transform_4, window_bounds = array<i64: 288, 32>}, {pipeline_mode = #tpu.pipeline_mode<synchronous>, transform_indices = @transform_5, window_bounds = array<i64: 1, 32>}, {pipeline_mode = #tpu.pipeline_mode<synchronous>, transform_indices = @transform_6, window_bounds = array<i64: 1, 32>}, {pipeline_mode = #tpu.pipeline_mode<synchronous>, transform_indices = @transform_7, window_bounds = array<i64: 128, 32>}, {pipeline_mode = #tpu.pipeline_mode<synchronous>, transform_indices = @transform_8, window_bounds = array<i64: 128, 32>}]} {
    %c0 = arith.constant 0 : index
    %c0_0 = arith.constant 0 : index
    %c0_1 = arith.constant 0 : index
    %c0_2 = arith.constant 0 : index
    %c0_3 = arith.constant 0 : index
    %0 = vector.load %arg1[%c0, %c0_0, %c0_1, %c0_2, %c0_3] : memref<4x2x9x9x16xbf16, #tpu.memory_space<vmem>>, vector<1x2x8x8x16xbf16>
    %1 = vector.shape_cast %0 : vector<1x2x8x8x16xbf16> to vector<2x8x8x16xbf16>
    %2 = vector.shape_cast %1 : vector<2x8x8x16xbf16> to vector<128x16xbf16>
    %c0_4 = arith.constant 0 : index
    %c0_5 = arith.constant 0 : index
    %3 = vector.load %arg11[%c0_4, %c0_5] : memref<128x288xbf16, #tpu.memory_space<vmem>>, vector<128x16xbf16>
    tpu.vector_store %arg11[%c0_4, %c0_5], %2 {strides = array<i32>} : memref<128x288xbf16, #tpu.memory_space<vmem>>, vector<128x16xbf16>,
    %c1 = arith.constant 1 : index
    %c0_6 = arith.constant 0 : index
    %c0_7 = arith.constant 0 : index
    %c0_8 = arith.constant 0 : index
    %c0_9 = arith.constant 0 : index
    %4 = vector.load %arg1[%c1, %c0_6, %c0_7, %c0_8, %c0_9] : memref<4x2x9x9x16xbf16, #tpu.memory_space<vmem>>, vector<1x2x8x8x16xbf16>
    %5 = vector.shape_cast %4 : vector<1x2x8x8x16xbf16> to vector<2x8x8x16xbf16>
    %6 = vector.shape_cast %5 : vector<2x8x8x16xbf16> to vector<128x16xbf16>
    %c0_10 = arith.constant 0 : index
    %c16 = arith.constant 16 : index
    %7 = vector.load %arg11[%c0_10, %c16] : memref<128x288xbf16, #tpu.memory_space<vmem>>, vector<128x16xbf16>
    tpu.vector_store %arg11[%c0_10, %c16], %6 {strides = array<i32>} : memref<128x288xbf16, #tpu.memory_space<vmem>>, vector<128x16xbf16>,
    %c0_11 = arith.constant 0 : index
    %c0_12 = arith.constant 0 : index
    %c0_13 = arith.constant 0 : index
    %c1_14 = arith.constant 1 : index
    %c0_15 = arith.constant 0 : index
    %8 = vector.load %arg1[%c0_11, %c0_12, %c0_13, %c1_14, %c0_15] : memref<4x2x9x9x16xbf16, #tpu.memory_space<vmem>>, vector<1x2x8x8x16xbf16>
    %9 = vector.shape_cast %8 : vector<1x2x8x8x16xbf16> to vector<2x8x8x16xbf16>
    %10 = vector.shape_cast %9 : vector<2x8x8x16xbf16> to vector<128x16xbf16>
    %c0_16 = arith.constant 0 : index
    %c32 = arith.constant 32 : index
    %11 = vector.load %arg11[%c0_16, %c32] : memref<128x288xbf16, #tpu.memory_space<vmem>>, vector<128x16xbf16>
    tpu.vector_store %arg11[%c0_16, %c32], %10 {strides = array<i32>} : memref<128x288xbf16, #tpu.memory_space<vmem>>, vector<128x16xbf16>,
    %c2 = arith.constant 2 : index
    %c0_17 = arith.constant 0 : index
    %c0_18 = arith.constant 0 : index
    %c0_19 = arith.constant 0 : index
    %c0_20 = arith.constant 0 : index
    %12 = vector.load %arg1[%c2, %c0_17, %c0_18, %c0_19, %c0_20] : memref<4x2x9x9x16xbf16, #tpu.memory_space<vmem>>, vector<1x2x8x8x16xbf16>
    %13 = vector.shape_cast %12 : vector<1x2x8x8x16xbf16> to vector<2x8x8x16xbf16>
    %14 = vector.shape_cast %13 : vector<2x8x8x16xbf16> to vector<128x16xbf16>
    %c0_21 = arith.constant 0 : index
    %c48 = arith.constant 48 : index
    %15 = vector.load %arg11[%c0_21, %c48] : memref<128x288xbf16, #tpu.memory_space<vmem>>, vector<128x16xbf16>
    tpu.vector_store %arg11[%c0_21, %c48], %14 {strides = array<i32>} : memref<128x288xbf16, #tpu.memory_space<vmem>>, vector<128x16xbf16>,
    %c3 = arith.constant 3 : index
    %c0_22 = arith.constant 0 : index
    %c0_23 = arith.constant 0 : index
    %c0_24 = arith.constant 0 : index
    %c0_25 = arith.constant 0 : index
    %16 = vector.load %arg1[%c3, %c0_22, %c0_23, %c0_24, %c0_25] : memref<4x2x9x9x16xbf16, #tpu.memory_space<vmem>>, vector<1x2x8x8x16xbf16>
    %17 = vector.shape_cast %16 : vector<1x2x8x8x16xbf16> to vector<2x8x8x16xbf16>
    %18 = vector.shape_cast %17 : vector<2x8x8x16xbf16> to vector<128x16xbf16>
    %c0_26 = arith.constant 0 : index
    %c64 = arith.constant 64 : index
    %19 = vector.load %arg11[%c0_26, %c64] : memref<128x288xbf16, #tpu.memory_space<vmem>>, vector<128x16xbf16>
    tpu.vector_store %arg11[%c0_26, %c64], %18 {strides = array<i32>} : memref<128x288xbf16, #tpu.memory_space<vmem>>, vector<128x16xbf16>,
    %c2_27 = arith.constant 2 : index
    %c0_28 = arith.constant 0 : index
    %c0_29 = arith.constant 0 : index
    %c1_30 = arith.constant 1 : index
    %c0_31 = arith.constant 0 : index
    %20 = vector.load %arg1[%c2_27, %c0_28, %c0_29, %c1_30, %c0_31] : memref<4x2x9x9x16xbf16, #tpu.memory_space<vmem>>, vector<1x2x8x8x16xbf16>
    %21 = vector.shape_cast %20 : vector<1x2x8x8x16xbf16> to vector<2x8x8x16xbf16>
    %22 = vector.shape_cast %21 : vector<2x8x8x16xbf16> to vector<128x16xbf16>
    %c0_32 = arith.constant 0 : index
    %c80 = arith.constant 80 : index
    %23 = vector.load %arg11[%c0_32, %c80] : memref<128x288xbf16, #tpu.memory_space<vmem>>, vector<128x16xbf16>
    tpu.vector_store %arg11[%c0_32, %c80], %22 {strides = array<i32>} : memref<128x288xbf16, #tpu.memory_space<vmem>>, vector<128x16xbf16>,
    %c0_33 = arith.constant 0 : index
    %c0_34 = arith.constant 0 : index
    %c1_35 = arith.constant 1 : index
    %c0_36 = arith.constant 0 : index
    %c0_37 = arith.constant 0 : index
    %24 = vector.load %arg1[%c0_33, %c0_34, %c1_35, %c0_36, %c0_37] : memref<4x2x9x9x16xbf16, #tpu.memory_space<vmem>>, vector<1x2x8x8x16xbf16>
    %25 = vector.shape_cast %24 : vector<1x2x8x8x16xbf16> to vector<2x8x8x16xbf16>
    %26 = vector.shape_cast %25 : vector<2x8x8x16xbf16> to vector<128x16xbf16>
    %c0_38 = arith.constant 0 : index
    %c96 = arith.constant 96 : index
    %27 = vector.load %arg11[%c0_38, %c96] : memref<128x288xbf16, #tpu.memory_space<vmem>>, vector<128x16xbf16>
    tpu.vector_store %arg11[%c0_38, %c96], %26 {strides = array<i32>} : memref<128x288xbf16, #tpu.memory_space<vmem>>, vector<128x16xbf16>,
    %c1_39 = arith.constant 1 : index
    %c0_40 = arith.constant 0 : index
    %c1_41 = arith.constant 1 : index
    %c0_42 = arith.constant 0 : index
    %c0_43 = arith.constant 0 : index
    %28 = vector.load %arg1[%c1_39, %c0_40, %c1_41, %c0_42, %c0_43] : memref<4x2x9x9x16xbf16, #tpu.memory_space<vmem>>, vector<1x2x8x8x16xbf16>
    %29 = vector.shape_cast %28 : vector<1x2x8x8x16xbf16> to vector<2x8x8x16xbf16>
    %30 = vector.shape_cast %29 : vector<2x8x8x16xbf16> to vector<128x16xbf16>
    %c0_44 = arith.constant 0 : index
    %c112 = arith.constant 112 : index
    %31 = vector.load %arg11[%c0_44, %c112] : memref<128x288xbf16, #tpu.memory_space<vmem>>, vector<128x16xbf16>
    tpu.vector_store %arg11[%c0_44, %c112], %30 {strides = array<i32>} : memref<128x288xbf16, #tpu.memory_space<vmem>>, vector<128x16xbf16>,
    %c0_45 = arith.constant 0 : index
    %c0_46 = arith.constant 0 : index
    %c1_47 = arith.constant 1 : index
    %c1_48 = arith.constant 1 : index
    %c0_49 = arith.constant 0 : index
    %32 = vector.load %arg1[%c0_45, %c0_46, %c1_47, %c1_48, %c0_49] : memref<4x2x9x9x16xbf16, #tpu.memory_space<vmem>>, vector<1x2x8x8x16xbf16>
    %33 = vector.shape_cast %32 : vector<1x2x8x8x16xbf16> to vector<2x8x8x16xbf16>
    %34 = vector.shape_cast %33 : vector<2x8x8x16xbf16> to vector<128x16xbf16>
    %c0_50 = arith.constant 0 : index
    %c128 = arith.constant 128 : index
    %35 = vector.load %arg11[%c0_50, %c128] : memref<128x288xbf16, #tpu.memory_space<vmem>>, vector<128x16xbf16>
    tpu.vector_store %arg11[%c0_50, %c128], %34 {strides = array<i32>} : memref<128x288xbf16, #tpu.memory_space<vmem>>, vector<128x16xbf16>,
    %c0_51 = arith.constant 0 : index
    %c0_52 = arith.constant 0 : index
    %36 = vector.load %arg11[%c0_51, %c0_52] : memref<128x288xbf16, #tpu.memory_space<vmem>>, vector<128x144xbf16>
    %c0_53 = arith.constant 0 : index
    %c0_54 = arith.constant 0 : index
    %37 = vector.load %arg2[%c0_53, %c0_54] : memref<144x32xbf16, #tpu.memory_space<vmem>>, vector<144x32xbf16>
    %cst = arith.constant dense<0.000000e+00> : vector<128x32xf32>
    %38 = tpu.matmul %36, %37, %cst {dimension_numbers = #tpu.dot_dimension_numbers<[1], [0], [0], [1], [0, 0, 1, 1], [], []>} : vector<128x144xbf16>, vector<144x32xbf16>, vector<128x32xf32> -> vector<128x32xf32>
    %c0_55 = arith.constant 0 : index
    %c0_56 = arith.constant 0 : index
    %39 = vector.load %arg3[%c0_55, %c0_56] : memref<1x32xf32, #tpu.memory_space<vmem>>, vector<1x32xf32>
    %c0_57 = arith.constant 0 : index
    %c0_58 = arith.constant 0 : index
    %40 = vector.load %arg4[%c0_57, %c0_58] : memref<1x32xf32, #tpu.memory_space<vmem>>, vector<1x32xf32>
    %cst_59 = arith.constant dense<0.000000e+00> : vector<32xf32>
    %41 = vector.multi_reduction <add>, %38, %cst_59 [0] : vector<128x32xf32> to vector<32xf32>
    %42 = vector.shape_cast %41 : vector<32xf32> to vector<1x32xf32>
    %43 = arith.mulf %38, %38 : vector<128x32xf32>
    %cst_60 = arith.constant dense<0.000000e+00> : vector<32xf32>
    %44 = vector.multi_reduction <add>, %43, %cst_60 [0] : vector<128x32xf32> to vector<32xf32>
    %45 = vector.shape_cast %44 : vector<32xf32> to vector<1x32xf32>
    %cst_61 = arith.constant 7.812500e-03 : f32
    %46 = vector.broadcast %cst_61 : f32 to vector<1x32xf32>
    %47 = arith.mulf %42, %46 : vector<1x32xf32>
    %cst_62 = arith.constant 7.812500e-03 : f32
    %48 = vector.broadcast %cst_62 : f32 to vector<1x32xf32>
    %49 = arith.mulf %45, %48 : vector<1x32xf32>
    %50 = arith.mulf %47, %47 : vector<1x32xf32>
    %51 = arith.subf %49, %50 : vector<1x32xf32>
    %cst_63 = arith.constant 0.000000e+00 : f32
    %52 = vector.broadcast %cst_63 : f32 to vector<1x32xf32>
    %53 = arith.maximumf %51, %52 : vector<1x32xf32>
    %54 = vector.broadcast %47 : vector<1x32xf32> to vector<128x32xf32>
    %55 = arith.subf %38, %54 : vector<128x32xf32>
    %cst_64 = arith.constant 9.99999974E-6 : f32
    %56 = vector.broadcast %cst_64 : f32 to vector<1x32xf32>
    %57 = arith.addf %53, %56 : vector<1x32xf32>
    %58 = math.rsqrt %57 : vector<1x32xf32>
    %59 = vector.broadcast %58 : vector<1x32xf32> to vector<128x32xf32>
    %60 = arith.mulf %55, %59 : vector<128x32xf32>
    %61 = vector.broadcast %39 : vector<1x32xf32> to vector<128x32xf32>
    %62 = arith.mulf %60, %61 : vector<128x32xf32>
    %63 = vector.broadcast %40 : vector<1x32xf32> to vector<128x32xf32>
    %64 = arith.addf %62, %63 : vector<128x32xf32>
    %cst_65 = arith.constant 0.000000e+00 : f32
    %65 = vector.broadcast %cst_65 : f32 to vector<128x32xf32>
    %66 = arith.maximumf %64, %65 : vector<128x32xf32>
    %cst_66 = arith.constant 0.000000e+00 : bf16
    %67 = vector.broadcast %cst_66 : bf16 to vector<2x1x16x32xbf16>
    %c0_67 = arith.constant 0 : index
    %c0_68 = arith.constant 0 : index
    %c0_69 = arith.constant 0 : index
    %c0_70 = arith.constant 0 : index
    %68 = vector.load %arg10[%c0_67, %c0_68, %c0_69, %c0_70] : memref<2x10x16x32xbf16, #tpu.memory_space<vmem>>, vector<2x1x16x32xbf16>
    tpu.vector_store %arg10[%c0_67, %c0_68, %c0_69, %c0_70], %67 {strides = array<i32>} : memref<2x10x16x32xbf16, #tpu.memory_space<vmem>>, vector<2x1x16x32xbf16>,
    %c0_71 = arith.constant 0 : index
    %c9 = arith.constant 9 : index
    %c0_72 = arith.constant 0 : index
    %c0_73 = arith.constant 0 : index
    %69 = vector.load %arg10[%c0_71, %c9, %c0_72, %c0_73] : memref<2x10x16x32xbf16, #tpu.memory_space<vmem>>, vector<2x1x16x32xbf16>
    tpu.vector_store %arg10[%c0_71, %c9, %c0_72, %c0_73], %67 {strides = array<i32>} : memref<2x10x16x32xbf16, #tpu.memory_space<vmem>>, vector<2x1x16x32xbf16>,
    %cst_74 = arith.constant 0.000000e+00 : bf16
    %70 = vector.broadcast %cst_74 : bf16 to vector<2x8x1x32xbf16>
    %c0_75 = arith.constant 0 : index
    %c1_76 = arith.constant 1 : index
    %c0_77 = arith.constant 0 : index
    %c0_78 = arith.constant 0 : index
    %71 = vector.load %arg10[%c0_75, %c1_76, %c0_77, %c0_78] : memref<2x10x16x32xbf16, #tpu.memory_space<vmem>>, vector<2x8x1x32xbf16>
    tpu.vector_store %arg10[%c0_75, %c1_76, %c0_77, %c0_78], %70 {strides = array<i32>} : memref<2x10x16x32xbf16, #tpu.memory_space<vmem>>, vector<2x8x1x32xbf16>,
    %c0_79 = arith.constant 0 : index
    %c1_80 = arith.constant 1 : index
    %c9_81 = arith.constant 9 : index
    %c0_82 = arith.constant 0 : index
    %72 = vector.load %arg10[%c0_79, %c1_80, %c9_81, %c0_82] : memref<2x10x16x32xbf16, #tpu.memory_space<vmem>>, vector<2x8x1x32xbf16>
    tpu.vector_store %arg10[%c0_79, %c1_80, %c9_81, %c0_82], %70 {strides = array<i32>} : memref<2x10x16x32xbf16, #tpu.memory_space<vmem>>, vector<2x8x1x32xbf16>,
    %73 = vector.shape_cast %66 : vector<128x32xf32> to vector<2x8x8x32xf32>
    %74 = arith.truncf %73 : vector<2x8x8x32xf32> to vector<2x8x8x32xbf16>
    %c0_83 = arith.constant 0 : index
    %c1_84 = arith.constant 1 : index
    %c1_85 = arith.constant 1 : index
    %c0_86 = arith.constant 0 : index
    %75 = vector.load %arg10[%c0_83, %c1_84, %c1_85, %c0_86] : memref<2x10x16x32xbf16, #tpu.memory_space<vmem>>, vector<2x8x8x32xbf16>
    tpu.vector_store %arg10[%c0_83, %c1_84, %c1_85, %c0_86], %74 {strides = array<i32>} : memref<2x10x16x32xbf16, #tpu.memory_space<vmem>>, vector<2x8x8x32xbf16>,
    %c0_87 = arith.constant 0 : index
    %c0_88 = arith.constant 0 : index
    %c0_89 = arith.constant 0 : index
    %c0_90 = arith.constant 0 : index
    %76 = vector.load %arg10[%c0_87, %c0_88, %c0_89, %c0_90] : memref<2x10x16x32xbf16, #tpu.memory_space<vmem>>, vector<2x8x8x32xbf16>
    %77 = vector.shape_cast %76 : vector<2x8x8x32xbf16> to vector<128x32xbf16>
    %c0_91 = arith.constant 0 : index
    %c0_92 = arith.constant 0 : index
    %78 = vector.load %arg11[%c0_91, %c0_92] : memref<128x288xbf16, #tpu.memory_space<vmem>>, vector<128x32xbf16>
    tpu.vector_store %arg11[%c0_91, %c0_92], %77 {strides = array<i32>} : memref<128x288xbf16, #tpu.memory_space<vmem>>, vector<128x32xbf16>,
    %c0_93 = arith.constant 0 : index
    %c0_94 = arith.constant 0 : index
    %c1_95 = arith.constant 1 : index
    %c0_96 = arith.constant 0 : index
    %79 = vector.load %arg10[%c0_93, %c0_94, %c1_95, %c0_96] : memref<2x10x16x32xbf16, #tpu.memory_space<vmem>>, vector<2x8x8x32xbf16>
    %80 = vector.shape_cast %79 : vector<2x8x8x32xbf16> to vector<128x32xbf16>
    %c0_97 = arith.constant 0 : index
    %c32_98 = arith.constant 32 : index
    %81 = vector.load %arg11[%c0_97, %c32_98] : memref<128x288xbf16, #tpu.memory_space<vmem>>, vector<128x32xbf16>
    tpu.vector_store %arg11[%c0_97, %c32_98], %80 {strides = array<i32>} : memref<128x288xbf16, #tpu.memory_space<vmem>>, vector<128x32xbf16>,
    %c0_99 = arith.constant 0 : index
    %c0_100 = arith.constant 0 : index
    %c2_101 = arith.constant 2 : index
    %c0_102 = arith.constant 0 : index
    %82 = vector.load %arg10[%c0_99, %c0_100, %c2_101, %c0_102] : memref<2x10x16x32xbf16, #tpu.memory_space<vmem>>, vector<2x8x8x32xbf16>
    %83 = vector.shape_cast %82 : vector<2x8x8x32xbf16> to vector<128x32xbf16>
    %c0_103 = arith.constant 0 : index
    %c64_104 = arith.constant 64 : index
    %84 = vector.load %arg11[%c0_103, %c64_104] : memref<128x288xbf16, #tpu.memory_space<vmem>>, vector<128x32xbf16>
    tpu.vector_store %arg11[%c0_103, %c64_104], %83 {strides = array<i32>} : memref<128x288xbf16, #tpu.memory_space<vmem>>, vector<128x32xbf16>,
    %c0_105 = arith.constant 0 : index
    %c1_106 = arith.constant 1 : index
    %c0_107 = arith.constant 0 : index
    %c0_108 = arith.constant 0 : index
    %85 = vector.load %arg10[%c0_105, %c1_106, %c0_107, %c0_108] : memref<2x10x16x32xbf16, #tpu.memory_space<vmem>>, vector<2x8x8x32xbf16>
    %86 = vector.shape_cast %85 : vector<2x8x8x32xbf16> to vector<128x32xbf16>
    %c0_109 = arith.constant 0 : index
    %c96_110 = arith.constant 96 : index
    %87 = vector.load %arg11[%c0_109, %c96_110] : memref<128x288xbf16, #tpu.memory_space<vmem>>, vector<128x32xbf16>
    tpu.vector_store %arg11[%c0_109, %c96_110], %86 {strides = array<i32>} : memref<128x288xbf16, #tpu.memory_space<vmem>>, vector<128x32xbf16>,
    %c0_111 = arith.constant 0 : index
    %c1_112 = arith.constant 1 : index
    %c1_113 = arith.constant 1 : index
    %c0_114 = arith.constant 0 : index
    %88 = vector.load %arg10[%c0_111, %c1_112, %c1_113, %c0_114] : memref<2x10x16x32xbf16, #tpu.memory_space<vmem>>, vector<2x8x8x32xbf16>
    %89 = vector.shape_cast %88 : vector<2x8x8x32xbf16> to vector<128x32xbf16>
    %c0_115 = arith.constant 0 : index
    %c128_116 = arith.constant 128 : index
    %90 = vector.load %arg11[%c0_115, %c128_116] : memref<128x288xbf16, #tpu.memory_space<vmem>>, vector<128x32xbf16>
    tpu.vector_store %arg11[%c0_115, %c128_116], %89 {strides = array<i32>} : memref<128x288xbf16, #tpu.memory_space<vmem>>, vector<128x32xbf16>,
    %c0_117 = arith.constant 0 : index
    %c1_118 = arith.constant 1 : index
    %c2_119 = arith.constant 2 : index
    %c0_120 = arith.constant 0 : index
    %91 = vector.load %arg10[%c0_117, %c1_118, %c2_119, %c0_120] : memref<2x10x16x32xbf16, #tpu.memory_space<vmem>>, vector<2x8x8x32xbf16>
    %92 = vector.shape_cast %91 : vector<2x8x8x32xbf16> to vector<128x32xbf16>
    %c0_121 = arith.constant 0 : index
    %c160 = arith.constant 160 : index
    %93 = vector.load %arg11[%c0_121, %c160] : memref<128x288xbf16, #tpu.memory_space<vmem>>, vector<128x32xbf16>
    tpu.vector_store %arg11[%c0_121, %c160], %92 {strides = array<i32>} : memref<128x288xbf16, #tpu.memory_space<vmem>>, vector<128x32xbf16>,
    %c0_122 = arith.constant 0 : index
    %c2_123 = arith.constant 2 : index
    %c0_124 = arith.constant 0 : index
    %c0_125 = arith.constant 0 : index
    %94 = vector.load %arg10[%c0_122, %c2_123, %c0_124, %c0_125] : memref<2x10x16x32xbf16, #tpu.memory_space<vmem>>, vector<2x8x8x32xbf16>
    %95 = vector.shape_cast %94 : vector<2x8x8x32xbf16> to vector<128x32xbf16>
    %c0_126 = arith.constant 0 : index
    %c192 = arith.constant 192 : index
    %96 = vector.load %arg11[%c0_126, %c192] : memref<128x288xbf16, #tpu.memory_space<vmem>>, vector<128x32xbf16>
    tpu.vector_store %arg11[%c0_126, %c192], %95 {strides = array<i32>} : memref<128x288xbf16, #tpu.memory_space<vmem>>, vector<128x32xbf16>,
    %c0_127 = arith.constant 0 : index
    %c2_128 = arith.constant 2 : index
    %c1_129 = arith.constant 1 : index
    %c0_130 = arith.constant 0 : index
    %97 = vector.load %arg10[%c0_127, %c2_128, %c1_129, %c0_130] : memref<2x10x16x32xbf16, #tpu.memory_space<vmem>>, vector<2x8x8x32xbf16>
    %98 = vector.shape_cast %97 : vector<2x8x8x32xbf16> to vector<128x32xbf16>
    %c0_131 = arith.constant 0 : index
    %c224 = arith.constant 224 : index
    %99 = vector.load %arg11[%c0_131, %c224] : memref<128x288xbf16, #tpu.memory_space<vmem>>, vector<128x32xbf16>
    tpu.vector_store %arg11[%c0_131, %c224], %98 {strides = array<i32>} : memref<128x288xbf16, #tpu.memory_space<vmem>>, vector<128x32xbf16>,
    %c0_132 = arith.constant 0 : index
    %c2_133 = arith.constant 2 : index
    %c2_134 = arith.constant 2 : index
    %c0_135 = arith.constant 0 : index
    %100 = vector.load %arg10[%c0_132, %c2_133, %c2_134, %c0_135] : memref<2x10x16x32xbf16, #tpu.memory_space<vmem>>, vector<2x8x8x32xbf16>
    %101 = vector.shape_cast %100 : vector<2x8x8x32xbf16> to vector<128x32xbf16>
    %c0_136 = arith.constant 0 : index
    %c256 = arith.constant 256 : index
    %102 = vector.load %arg11[%c0_136, %c256] : memref<128x288xbf16, #tpu.memory_space<vmem>>, vector<128x32xbf16>
    tpu.vector_store %arg11[%c0_136, %c256], %101 {strides = array<i32>} : memref<128x288xbf16, #tpu.memory_space<vmem>>, vector<128x32xbf16>,
    %c0_137 = arith.constant 0 : index
    %c0_138 = arith.constant 0 : index
    %103 = vector.load %arg11[%c0_137, %c0_138] : memref<128x288xbf16, #tpu.memory_space<vmem>>, vector<128x288xbf16>
    %c0_139 = arith.constant 0 : index
    %c0_140 = arith.constant 0 : index
    %104 = vector.load %arg5[%c0_139, %c0_140] : memref<288x32xbf16, #tpu.memory_space<vmem>>, vector<288x32xbf16>
    %cst_141 = arith.constant dense<0.000000e+00> : vector<128x32xf32>
    %105 = tpu.matmul %103, %104, %cst_141 {dimension_numbers = #tpu.dot_dimension_numbers<[1], [0], [0], [1], [0, 0, 1, 1], [], []>} : vector<128x288xbf16>, vector<288x32xbf16>, vector<128x32xf32> -> vector<128x32xf32>
    %c0_142 = arith.constant 0 : index
    %c0_143 = arith.constant 0 : index
    %106 = vector.load %arg6[%c0_142, %c0_143] : memref<1x32xf32, #tpu.memory_space<vmem>>, vector<1x32xf32>
    %c0_144 = arith.constant 0 : index
    %c0_145 = arith.constant 0 : index
    %107 = vector.load %arg7[%c0_144, %c0_145] : memref<1x32xf32, #tpu.memory_space<vmem>>, vector<1x32xf32>
    %cst_146 = arith.constant dense<0.000000e+00> : vector<32xf32>
    %108 = vector.multi_reduction <add>, %105, %cst_146 [0] : vector<128x32xf32> to vector<32xf32>
    %109 = vector.shape_cast %108 : vector<32xf32> to vector<1x32xf32>
    %110 = arith.mulf %105, %105 : vector<128x32xf32>
    %cst_147 = arith.constant dense<0.000000e+00> : vector<32xf32>
    %111 = vector.multi_reduction <add>, %110, %cst_147 [0] : vector<128x32xf32> to vector<32xf32>
    %112 = vector.shape_cast %111 : vector<32xf32> to vector<1x32xf32>
    %cst_148 = arith.constant 7.812500e-03 : f32
    %113 = vector.broadcast %cst_148 : f32 to vector<1x32xf32>
    %114 = arith.mulf %109, %113 : vector<1x32xf32>
    %cst_149 = arith.constant 7.812500e-03 : f32
    %115 = vector.broadcast %cst_149 : f32 to vector<1x32xf32>
    %116 = arith.mulf %112, %115 : vector<1x32xf32>
    %117 = arith.mulf %114, %114 : vector<1x32xf32>
    %118 = arith.subf %116, %117 : vector<1x32xf32>
    %cst_150 = arith.constant 0.000000e+00 : f32
    %119 = vector.broadcast %cst_150 : f32 to vector<1x32xf32>
    %120 = arith.maximumf %118, %119 : vector<1x32xf32>
    %121 = vector.broadcast %114 : vector<1x32xf32> to vector<128x32xf32>
    %122 = arith.subf %105, %121 : vector<128x32xf32>
    %cst_151 = arith.constant 9.99999974E-6 : f32
    %123 = vector.broadcast %cst_151 : f32 to vector<1x32xf32>
    %124 = arith.addf %120, %123 : vector<1x32xf32>
    %125 = math.rsqrt %124 : vector<1x32xf32>
    %126 = vector.broadcast %125 : vector<1x32xf32> to vector<128x32xf32>
    %127 = arith.mulf %122, %126 : vector<128x32xf32>
    %128 = vector.broadcast %106 : vector<1x32xf32> to vector<128x32xf32>
    %129 = arith.mulf %127, %128 : vector<128x32xf32>
    %130 = vector.broadcast %107 : vector<1x32xf32> to vector<128x32xf32>
    %131 = arith.addf %129, %130 : vector<128x32xf32>
    %c0_152 = arith.constant 0 : index
    %c0_153 = arith.constant 0 : index
    %132 = vector.load %arg8[%c0_152, %c0_153] : memref<128x32xf32, #tpu.memory_space<vmem>>, vector<128x32xf32>
    %133 = arith.addf %131, %132 : vector<128x32xf32>
    %cst_154 = arith.constant 0.000000e+00 : f32
    %134 = vector.broadcast %cst_154 : f32 to vector<128x32xf32>
    %135 = arith.maximumf %133, %134 : vector<128x32xf32>
    %c0_155 = arith.constant 0 : index
    %c0_156 = arith.constant 0 : index
    %136 = vector.load %arg9[%c0_155, %c0_156] : memref<128x32xf32, #tpu.memory_space<vmem>>, vector<128x32xf32>
    tpu.vector_store %arg9[%c0_155, %c0_156], %135 {strides = array<i32>} : memref<128x32xf32, #tpu.memory_space<vmem>>, vector<128x32xf32>,
    return
  }
  func.func @transform_0(%arg0: i32) -> (i32, i32, i32, i32, i32) {
    %c0_i32 = arith.constant 0 : i32
    %c0_i32_0 = arith.constant 0 : i32
    %c0_i32_1 = arith.constant 0 : i32
    %c0_i32_2 = arith.constant 0 : i32
    %c0_i32_3 = arith.constant 0 : i32
    %c0_i32_4 = arith.constant 0 : i32
    return %c0_i32, %c0_i32_0, %c0_i32_1, %c0_i32_2, %c0_i32_3 : i32, i32, i32, i32, i32
  }
  func.func @transform_1(%arg0: i32) -> (i32, i32) {
    %c0_i32 = arith.constant 0 : i32
    %c0_i32_0 = arith.constant 0 : i32
    %c0_i32_1 = arith.constant 0 : i32
    return %c0_i32, %c0_i32_0 : i32, i32
  }
  func.func @transform_2(%arg0: i32) -> (i32, i32) {
    %c0_i32 = arith.constant 0 : i32
    %c0_i32_0 = arith.constant 0 : i32
    %c0_i32_1 = arith.constant 0 : i32
    return %c0_i32, %c0_i32_0 : i32, i32
  }
  func.func @transform_3(%arg0: i32) -> (i32, i32) {
    %c0_i32 = arith.constant 0 : i32
    %c0_i32_0 = arith.constant 0 : i32
    %c0_i32_1 = arith.constant 0 : i32
    return %c0_i32, %c0_i32_0 : i32, i32
  }
  func.func @transform_4(%arg0: i32) -> (i32, i32) {
    %c0_i32 = arith.constant 0 : i32
    %c0_i32_0 = arith.constant 0 : i32
    %c0_i32_1 = arith.constant 0 : i32
    return %c0_i32, %c0_i32_0 : i32, i32
  }
  func.func @transform_5(%arg0: i32) -> (i32, i32) {
    %c0_i32 = arith.constant 0 : i32
    %c0_i32_0 = arith.constant 0 : i32
    %c0_i32_1 = arith.constant 0 : i32
    return %c0_i32, %c0_i32_0 : i32, i32
  }
  func.func @transform_6(%arg0: i32) -> (i32, i32) {
    %c0_i32 = arith.constant 0 : i32
    %c0_i32_0 = arith.constant 0 : i32
    %c0_i32_1 = arith.constant 0 : i32
    return %c0_i32, %c0_i32_0 : i32, i32
  }
  func.func @transform_7(%arg0: i32) -> (i32, i32) {
    %c0_i32 = arith.constant 0 : i32
    %c0_i32_0 = arith.constant 0 : i32
    %c0_i32_1 = arith.constant 0 : i32
    return %c0_i32, %c0_i32_0 : i32, i32
  }
  func.func @transform_8(%arg0: i32) -> (i32, i32) {
    %c0_i32 = arith.constant 0 : i32
    %c0_i32_0 = arith.constant 0 : i32
    %c0_i32_1 = arith.constant 0 : i32
    return %c0_i32, %c0_i32_0 : i32, i32
  }
}

</mosaic_0001>

<bundles_post_ra>
// kernel: reblock_forward.1
= control target key start
LH: loop header
LB: loop body
LE: loop exit
PB: predicated region body
PF: predicated region fallthrough
CT: control target
= control target key end

     0   :  { %s5392_s9 = smov 48   ;;  %s5393_s10 = smov 16   ;;  %vm194_vm0 = vsmask.f32 3328  ;;  %vm195_vm1 = vsmask.f32 7440  ;;  %s8345_s0 = inlined_call_operand.vmem [shape: bf16[4,2,9,9,16], index: 0, kind: input, shape index: {}]   ;;  %s8346_s1 = inlined_call_operand.vmem [shape: bf16[144,32], index: 1, kind: input, shape index: {}]   ;;  %s8347_s2 = inlined_call_operand.vmem [shape: f32[1,32], index: 2, kind: input, shape index: {}]   ;;  %s8348_s3 = inlined_call_operand.vmem [shape: f32[1,32], index: 3, kind: input, shape index: {}]   ;;  %s8349_s4 = inlined_call_operand.vmem [shape: bf16[288,32], index: 4, kind: input, shape index: {}]   ;;  %s8350_s5 = inlined_call_operand.vmem [shape: f32[1,32], index: 5, kind: input, shape index: {}]   ;;  %s8351_s6 = inlined_call_operand.vmem [shape: f32[1,32], index: 6, kind: input, shape index: {}]   ;;  %s8352_s7 = inlined_call_operand.vmem [shape: f32[128,32], index: 7, kind: input, shape index: {}]   ;;  %s8353_s8 = inlined_call_operand.hbm [shape: f32[128,32], index: 8, kind: output, shape index: {}]  }
   0x1   :  { %v4884_v0 = vld [vmem:[%s8345_s0 + $0x128] sm:$0xf]  ;;  %v4867_v1 = vld [vmem:[%s8345_s0 + $0x90] sm:$0xf]  ;;  %v162_v2 = vld [vmem:[%s8345_s0] sm:$0xf] }
   0x2   :  { %521 = vrot.lane.b32.xlu1 %v4884_v0, %s5392_s9  ;;  %97 = vrot.lane.b32.xlu0 %v4867_v1, %s5393_s10  ;;  %v163_v3 = vld [vmem:[%s8345_s0 + $0x4] sm:$0x1]  ;;  %v198_v4 = vshrl.u32 %v162_v2, 16  ;;  %v201_v5 = vshll.u32 %v162_v2, 16  ;;  %v4868_v7 = vld [vmem:[%s8345_s0 + $0x98] sm:$0xf]  ;;  %vm5480_vm2 = vmor %vm194_vm0, %vm195_vm1 }
   0x3   :  { %v207_v6 = vshll.u32 %v163_v3, 16  ;;  %v164_v8 = vld [vmem:[%s8345_s0 + $0x8] sm:$0xf]  ;;  %v165_v11 = vld [vmem:[%s8345_s0 + $0xc] sm:$0x1]  ;;  %s5394_s13 = smov 32  }
   0x4   :  { %v200_v9 = vrot.slane %v198_v4, 4  ;;  %v203_v10 = vrot.slane %v201_v5, 5  ;;  %v212_v12 = vshrl.u32 %v164_v8, 16  ;;  %v215_v13 = vshll.u32 %v164_v8, 16  ;;  %v4883_v18 = vld [vmem:[%s8345_s0 + $0x120] sm:$0xf] }
   0x5   :  { %v221_v14 = vshll.u32 %v165_v11, 16  ;;  %v209_v16 = vrot.slane %v207_v6, 5  ;;  %v4917_v19 = vld [vmem:[%s8345_s0 + $0x128] sm:$0xf]  ;;  %v4918_v22 = vld [vmem:[%s8345_s0 + $0x12c] sm:$0x1] }
   0x6   :  { %99 = vrot.lane.b32.xlu0 %v4868_v7, %s5393_s10  ;;  %v204_v15 = vor.u32 %v203_v10, %v200_v9  ;;  %v214_v17 = vrot.slane %v212_v12, 4  ;;  %v217_v21 = vrot.slane %v215_v13, 5  ;;  %v729_v23 = vshrl.u32 %v4917_v19, 16  ;;  %v4915_v27 = vld [vmem:[%s8345_s0 + $0x120] sm:$0xf]  ;;  %v5299_v41 = vld [vmem:[%s8346_s1 + $0x38] sm:$0xff]  }
   0x7   :  { %v732_v24 = vshll.u32 %v4917_v19, 16  ;;  %v223_v26 = vrot.slane %v221_v14, 5  ;;  %v4916_v28 = vld [vmem:[%s8345_s0 + $0x124] sm:$0x1]  ;;  %v715_v32 = vshrl.u32 %v4915_v27, 16  ;;  %v718_v35 = vshll.u32 %v4915_v27, 16 }
   0x8   :  { %v205_v25 = vrot.slane %v204_v15, 4  ;;  %v218_v29 = vor.u32 %v217_v21, %v214_v17  ;;  %v731_v30 = vrot.slane %v729_v23, 4  ;;  %v4899_v34 = vld [vmem:[%s8345_s0 + $0x1b0] sm:$0xf]  ;;  %v724_v36 = vshll.u32 %v4916_v28, 16  ;;  %s5395_s16 = smov 64  }
   0x9   :  { %v734_v31 = vrot.slane %v732_v24, 5  ;;  %v738_v39 = vshll.u32 %v4918_v22, 16  ;;  %v717_v40 = vrot.slane %v715_v32, 4  ;;  %v720_v42 = vrot.slane %v718_v35, 5  ;;  %v166_v46 = vld [vmem:[%s8345_s0 + $0x10] sm:$0xf] }
   0xa   :  { %519 = vrot.lane.b32.xlu0 %v4883_v18, %s5392_s9  ;;  %v210_v33 = vsel %vm5480_vm2, %v205_v25, %v209_v16  ;;  %v219_v37 = vrot.slane %v218_v29, 4  ;;  %v726_v45 = vrot.slane %v724_v36, 5  ;;  %v5396_v47 = vmov 0   ;;  %v4900_v48 = vld [vmem:[%s8345_s0 + $0x1b8] sm:$0xf]  ;;  %v5300_v55 = vld [vmem:[%s8346_s1 + $0x30] sm:$0xff]  }
   0xb   :  { %421 = vrot.lane.b32.xlu1 %v210_v33, %s5394_s13  ;;  %v735_v38 = vor.u32 %v734_v31, %v731_v30  ;;  %v721_v44 = vor.u32 %v720_v42, %v717_v40  ;;  %1672 = vmatprep.subr.bf16.mxu0 %v5396_v47  ;;  %v740_v50 = vrot.slane %v738_v39, 5  ;;  %v168_v52 = vld [vmem:[%s8345_s0 + $0x18] sm:$0xf]  ;;  %v226_v53 = vshrl.u32 %v166_v46, 16  ;;  %s5397_s25 = smov 80   ;;  %v5301_v63 = vld [vmem:[%s8346_s1 + $0x28] sm:$0xff]  }
   0xc   :  { %v224_v43 = vsel %vm5480_vm2, %v219_v37, %v223_v26  ;;  %1673 = vmatpush1.bf16.msra.mxu0 %v5299_v41  ;;  %v229_v54 = vshll.u32 %v166_v46, 16  ;;  %v240_v57 = vshrl.u32 %v168_v52, 16  ;;  %v243_v58 = vshll.u32 %v168_v52, 16  ;;  %v4947_v60 = vld [vmem:[%s8345_s0 + $0x8] sm:$0xf]  ;;  %s5398_s15 = smov 96  }
   0xd   :  { %v736_v49 = vrot.slane %v735_v38, 4  ;;  %v722_v51 = vrot.slane %v721_v44, 4  ;;  %1674 = vmatprep.subr.bf16.mxu0 %v5396_v47  ;;  %v228_v61 = vrot.slane %v226_v53, 4  ;;  %v167_v0 = vld [vmem:[%s8345_s0 + $0x14] sm:$0x1]  ;;  %v5302_v8 = vld [vmem:[%s8346_s1 + $0x20] sm:$0xff]  }
   0xe   :  { %617 = vrot.lane.b32.xlu0 %v4899_v34, %s5395_s16  ;;  %v231_v62 = vrot.slane %v229_v54, 5  ;;  %v4948_v1 = vld [vmem:[%s8345_s0 + $0x10] sm:$0xf]  ;;  %v242_v2 = vrot.slane %v240_v57, 4  ;;  %v245_v3 = vrot.slane %v243_v58, 5  ;;  %v235_v7 = vshll.u32 %v167_v0, 16 }
   0xf   :  { %423 = vrot.lane.b32.xlu1 %v224_v43, %s5394_s13  ;;  %v727_v56 = vsel %vm5480_vm2, %v722_v51, %v726_v45  ;;  %v741_v59 = vsel %vm5480_vm2, %v736_v49, %v740_v50  ;;  %v4963_v4 = vld [vmem:[%s8345_s0 + $0x98] sm:$0xf]  ;;  %v169_v5 = vld [vmem:[%s8345_s0 + $0x1c] sm:$0x1]  ;;  %v4919_v9 = vld [vmem:[%s8345_s0 + $0x130] sm:$0xf] }
  0x10   :  { %1675 = vmatpush1.bf16.msra.mxu0 %v5300_v55  ;;  %v232_v6 = vor.u32 %v231_v62, %v228_v61  ;;  %v4964_v10 = vld [vmem:[%s8345_s0 + $0xa0] sm:$0xf]  ;;  %s5399_s28 = smov 112   ;;  %v246_v12 = vor.u32 %v245_v3, %v242_v2  ;;  %v249_v13 = vshll.u32 %v169_v5, 16  ;;  %v4921_v14 = vld [vmem:[%s8345_s0 + $0x138] sm:$0xf] }
  0x11   :  { %1676 = vmatprep.subr.bf16.mxu0 %v5396_v47  ;;  %v4869_v11 = vld [vmem:[%s8345_s0 + $0xa0] sm:$0xf]  ;;  %v237_v16 = vrot.slane %v235_v7, 5  ;;  %v743_v17 = vshrl.u32 %v4919_v9, 16  ;;  %v746_v18 = vshll.u32 %v4919_v9, 16  ;;  %v5303_v19 = vld [vmem:[%s8346_s1 + $0x18] sm:$0xff]  }
  0x12   :  { %938 = vrot.lane.b32.xlu0 %v727_v56, %s5397_s25  ;;  %v233_v15 = vrot.slane %v232_v6, 4  ;;  %v251_v21 = vrot.slane %v249_v13, 5  ;;  %v757_v22 = vshrl.u32 %v4921_v14, 16  ;;  %v760_v23 = vshll.u32 %v4921_v14, 16  ;;  %v4870_v24 = vld [vmem:[%s8345_s0 + $0xa8] sm:$0xf] }
  0x13   :  { %619 = vrot.lane.b32.xlu1 %v4900_v48, %s5395_s16  ;;  %v247_v25 = vrot.slane %v246_v12, 4  ;;  %v745_v27 = vrot.slane %v743_v17, 4  ;;  %v748_v28 = vrot.slane %v746_v18, 5  ;;  %v5304_v29 = vld [vmem:[%s8346_s1 + $0x10] sm:$0xff]   ;;  %v4922_v34 = vld [vmem:[%s8345_s0 + $0x13c] sm:$0x1] }
  0x14   :  { %1677 = vmatpush1.bf16.msra.mxu0 %v5301_v63  ;;  %v238_v26 = vsel %vm5480_vm2, %v233_v15, %v237_v16  ;;  %v4920_v30 = vld [vmem:[%s8345_s0 + $0x134] sm:$0x1]  ;;  %v4885_v31 = vld [vmem:[%s8345_s0 + $0x130] sm:$0xf]  ;;  %v759_v32 = vrot.slane %v757_v22, 4  ;;  %v762_v35 = vrot.slane %v760_v23, 5 }
  0x15   :  { %1678 = vmatprep.subr.bf16.mxu0 %v5396_v47  ;;  %v252_v33 = vsel %vm5480_vm2, %v247_v25, %v251_v21  ;;  %v749_v36 = vor.u32 %v748_v28, %v745_v27  ;;  %v752_v37 = vshll.u32 %v4920_v30, 16  ;;  %v5305_v38 = vld [vmem:[%s8346_s1 + $0x8] sm:$0xff]   ;;  %v4886_v39 = vld [vmem:[%s8345_s0 + $0x138] sm:$0xf]  ;;  %v766_v40 = vshll.u32 %v4922_v34, 16  ;;  %v5306_v45 = vld [vmem:[%s8346_s1] sm:$0xff]  }
  0x16   :  { %1036 = vrot.lane.b32.xlu0 %v4947_v60, %s5398_s15  ;;  %v4901_v41 = vld [vmem:[%s8345_s0 + $0x1c0] sm:$0xf]  ;;  %v763_v42 = vor.u32 %v762_v35, %v759_v32  ;;  %vm1961_vm3 = vcmask 257024   ;;  %v4902_v48 = vld [vmem:[%s8345_s0 + $0x1c8] sm:$0xf]  ;;  %vm47_vm4 = vcmask 125952  }
  0x17   :  { %940 = vrot.lane.b32.xlu1 %v741_v59, %s5397_s25  ;;  %v750_v43 = vrot.slane %v749_v36, 4  ;;  %v754_v44 = vrot.slane %v752_v37, 5  ;;  %v170_v46 = vld [vmem:[%s8345_s0 + $0x20] sm:$0xf]  ;;  %1962 = vst.msk [vmem:[#allocation2] sm:$0xf] %vm1961_vm3, %v5396_v47 }
  0x18   :  { %1679 = vmatpush1.bf16.msra.mxu0 %v5302_v8  ;;  %1963 = vst.msk [vmem:[#allocation2 + $0x4] sm:$0xf] %vm1961_vm3, %v5396_v47  ;;  %1964 = vst.msk [vmem:[#allocation2 + $0x50] sm:$0xf] %vm1961_vm3, %v5396_v47  ;;  %v768_v49 = vrot.slane %v766_v40, 5  ;;  %v764_v50 = vrot.slane %v763_v42, 4 }
  0x19   :  { %1680 = vmatprep.subr.bf16.mxu0 %v5396_v47  ;;  %1965 = vst.msk [vmem:[#allocation2 + $0x54] sm:$0xf] %vm1961_vm3, %v5396_v47  ;;  %1967 = vst.msk [vmem:[#allocation2 + $0x48] sm:$0xf] %vm1961_vm3, %v5396_v47  ;;  %v755_v51 = vsel %vm5480_vm2, %v750_v43, %v754_v44  ;;  %v172_v52 = vld [vmem:[%s8345_s0 + $0x28] sm:$0xf] }
  0x1a   :  { %1134 = vrot.lane.b32.xlu0 %v4963_v4, %s5399_s28  ;;  %1968 = vst.msk [vmem:[#allocation2 + $0x4c] sm:$0xf] %vm1961_vm3, %v5396_v47  ;;  %1969 = vst.msk [vmem:[#allocation2 + $0x98] sm:$0xf] %vm1961_vm3, %v5396_v47  ;;  %v254_v53 = vshrl.u32 %v170_v46, 16  ;;  %v257_v54 = vshll.u32 %v170_v46, 16  ;;  %v769_v58 = vsel %vm5480_vm2, %v764_v50, %v768_v49 }
  0x1b   :  { %1038 = vrot.lane.b32.xlu1 %v4948_v1, %s5398_s15  ;;  %1970 = vst.msk [vmem:[#allocation2 + $0x9c] sm:$0xf] %vm1961_vm3, %v5396_v47  ;;  %v5307_v55 = vld [vmem:[%s8346_s1 + $0x40] sm:$0xff]   ;;  %v268_v56 = vshrl.u32 %v172_v52, 16  ;;  %v271_v57 = vshll.u32 %v172_v52, 16  ;;  %vm145_vm5 = vcmask 257152  }
  0x1c   :  { %1681 = vmatpush1.bf16.msra.mxu0 %v5303_v19  ;;  %v4949_v59 = vld [vmem:[%s8345_s0 + $0x18] sm:$0xf]  ;;  %v256_v60 = vrot.slane %v254_v53, 4  ;;  %v259_v61 = vrot.slane %v257_v54, 5  ;;  %v171_v62 = vld [vmem:[%s8345_s0 + $0x24] sm:$0x1] }
  0x1d   :  { %1682 = vmatprep.subr.bf16.mxu0 %v5396_v47  ;;  %v4950_v63 = vld [vmem:[%s8345_s0 + $0x20] sm:$0xf]  ;;  %v4965_v0 = vld [vmem:[%s8345_s0 + $0xa8] sm:$0xf]  ;;  %v270_v1 = vrot.slane %v268_v56, 4  ;;  %v273_v2 = vrot.slane %v271_v57, 5 }
  0x1e   :  { %101 = vrot.lane.b32.xlu0 %v4869_v11, %s5393_s10  ;;  %v173_v3 = vld [vmem:[%s8345_s0 + $0x2c] sm:$0x1]  ;;  %v260_v4 = vor.u32 %v259_v61, %v256_v60  ;;  %v263_v5 = vshll.u32 %v171_v62, 16  ;;  %v32_v6 = vld [vmem:[%s8345_s0 + $0x8] sm:$0xf]  ;;  %vm469_vm6 = vcmask 388352  }
  0x1f   :  { %1136 = vrot.lane.b32.xlu1 %v4964_v10, %s5399_s28  ;;  %v4923_v7 = vld [vmem:[%s8345_s0 + $0x140] sm:$0xf]  ;;  %49 = vst.msk [vmem:[#allocation3 + $0xc] sm:$0xf] %vm47_vm4, %v32_v6  ;;  %v4966_v8 = vld [vmem:[%s8345_s0 + $0xb0] sm:$0xf]  ;;  %v274_v10 = vor.u32 %v273_v2, %v270_v1 }
  0x20   :  { %1683 = vmatpush1.bf16.msra.mxu0 %v5304_v29  ;;  %v4871_v9 = vld [vmem:[%s8345_s0 + $0xb0] sm:$0xf]  ;;  %v277_v11 = vshll.u32 %v173_v3, 16  ;;  %v4925_v12 = vld [vmem:[%s8345_s0 + $0x148] sm:$0xf]  ;;  %v261_v13 = vrot.slane %v260_v4, 4 }
  0x21   :  { %1684 = vmatprep.subr.bf16.mxu0 %v5396_v47  ;;  %v265_v14 = vrot.slane %v263_v5, 5  ;;  %v771_v15 = vshrl.u32 %v4923_v7, 16  ;;  %v774_v16 = vshll.u32 %v4923_v7, 16  ;;  %v785_v17 = vshrl.u32 %v4925_v12, 16  ;;  %v4872_v18 = vld [vmem:[%s8345_s0 + $0xb8] sm:$0xf] }
  0x22   :  { %425 = vrot.lane.b32.xlu0 %v238_v26, %s5394_s13  ;;  %v275_v19 = vrot.slane %v274_v10, 4  ;;  %v279_v21 = vrot.slane %v277_v11, 5  ;;  %v788_v22 = vshll.u32 %v4925_v12, 16  ;;  %v4926_v27 = vld [vmem:[%s8345_s0 + $0x14c] sm:$0x1]  ;;  %vm567_vm7 = vcmask 519552  }
  0x23   :  { %103 = vrot.lane.b32.xlu1 %v4870_v24, %s5393_s10  ;;  %v266_v23 = vsel %vm5480_vm2, %v261_v13, %v265_v14  ;;  %v4924_v24 = vld [vmem:[%s8345_s0 + $0x144] sm:$0x1]  ;;  %v773_v25 = vrot.slane %v771_v15, 4  ;;  %v776_v26 = vrot.slane %v774_v16, 5  ;;  %v787_v28 = vrot.slane %v785_v17, 4 }
  0x24   :  { %1685 = vmatpush1.bf16.msra.mxu0 %v5305_v38  ;;  %v790_v29 = vrot.slane %v788_v22, 5  ;;  %v780_v30 = vshll.u32 %v4924_v24, 16  ;;  %v4887_v32 = vld [vmem:[%s8345_s0 + $0x140] sm:$0xf]  ;;  %v4979_v34 = vld [vmem:[%s8345_s0 + $0x8] sm:$0xf] }
  0x25   :  { %1686 = vmatprep.subr.bf16.mxu0 %v5396_v47  ;;  %v4980_v35 = vld [vmem:[%s8345_s0 + $0xc] sm:$0x1]  ;;  %v1232_v36 = vshrl.u32 %v4979_v34, 16  ;;  %v1235_v37 = vshll.u32 %v4979_v34, 16  ;;  %v4888_v38 = vld [vmem:[%s8345_s0 + $0x148] sm:$0xf] }
  0x26   :  { %523 = vrot.lane.b32.xlu0 %v4885_v31, %s5392_s9  ;;  %v280_v31 = vsel %vm5480_vm2, %v275_v19, %v279_v21  ;;  %v794_v40 = vshll.u32 %v4926_v27, 16  ;;  %v791_v42 = vor.u32 %v790_v29, %v787_v28  ;;  %v782_v43 = vrot.slane %v780_v30, 5  ;;  %v34_v50 = vld [vmem:[%s8345_s0 + $0x18] sm:$0xf]  ;;  %v33_v52 = vld [vmem:[%s8345_s0 + $0x10] sm:$0xf] }
  0x27   :  { %427 = vrot.lane.b32.xlu1 %v252_v33, %s5394_s13  ;;  %v777_v33 = vor.u32 %v776_v26, %v773_v25  ;;  %v1234_v44 = vrot.slane %v1232_v36, 4  ;;  %51 = vst.msk [vmem:[#allocation3 + $0x24] sm:$0xf] %vm47_vm4, %v34_v50  ;;  %50 = vst.msk [vmem:[#allocation3 + $0x18] sm:$0xf] %vm47_vm4, %v33_v52  ;;  %vm665_vm8 = vcmask 650752  }
  0x28   :  { %1687 = vmatpush1.bf16.msra.mxu0 %v5306_v45  ;;  %v1237_v45 = vrot.slane %v1235_v37, 5  ;;  %v792_v53 = vrot.slane %v791_v42, 4  ;;  %v796_v54 = vrot.slane %v794_v40, 5  ;;  %v4904_v57 = vld [vmem:[%s8345_s0 + $0x1d8] sm:$0xf]  ;;  %vm986_vm9 = vcmask 781952  }
  0x29   :  { %1702 = vmatprep.subr.bf16.mxu0 %v5396_v47  ;;  %v31_v47 = vld [vmem:[%s8345_s0] sm:$0xf]  ;;  %v778_v46 = vrot.slane %v777_v33, 4  ;;  %v175_v1 = vld [vmem:[%s8345_s0 + $0x34] sm:$0x1]  ;;  %vm1084_vm10 = vcmask 913152  }
  0x2a   :  { %621 = vrot.lane.b32.xlu0 %v4901_v41, %s5395_s16  ;;  %48 = vst.msk [vmem:[#allocation3] sm:$0xf] %vm47_vm4, %v31_v47  ;;  %v1241_v41 = vshll.u32 %v4980_v35, 16  ;;  %v4951_v47 = vld [vmem:[%s8345_s0 + $0x28] sm:$0xf]  ;;  %v291_v15 = vshll.u32 %v175_v1, 16 }
  0x2b   :  { %525 = vrot.lane.b32.xlu1 %v4886_v39, %s5392_s9  ;;  %v4903_v39 = vld [vmem:[%s8345_s0 + $0x1d0] sm:$0xf]  ;;  %v4982_v5 = vld [vmem:[%s8345_s0 + $0x14] sm:$0x1]  ;;  %v177_v14 = vld [vmem:[%s8345_s0 + $0x3c] sm:$0x1] }
  0x2c   :  { %1703 = vmatpush2.bf16.msra.mxu0 %v5307_v55  ;;  %v1243_v49 = vrot.slane %v1241_v41, 5  ;;  %v176_v55 = vld [vmem:[%s8345_s0 + $0x38] sm:$0xf]  ;;  %v4981_v2 = vld [vmem:[%s8345_s0 + $0x10] sm:$0xf]  ;;  %v305_v24 = vshll.u32 %v177_v14, 16 }
  0x2d   :  { %v296_v62 = vshrl.u32 %v176_v55, 16  ;;  %v1246_v6 = vshrl.u32 %v4981_v2, 16  ;;  %v1249_v7 = vshll.u32 %v4981_v2, 16  ;;  %v4952_v13 = vld [vmem:[%s8345_s0 + $0x30] sm:$0xf]  ;;  %v293_v27 = vrot.slane %v291_v15, 5 }
  0x2e   :  { %942 = vrot.lane.b32.xlu0 %v755_v51, %s5397_s25  ;;  %v1238_v51 = vor.u32 %v1237_v45, %v1234_v44  ;;  %v4967_v16 = vld [vmem:[%s8345_s0 + $0xb8] sm:$0xf]  ;;  %v4968_v22 = vld [vmem:[%s8345_s0 + $0xc0] sm:$0xf]  ;;  %v36_v33 = vld [vmem:[%s8345_s0 + $0x28] sm:$0xf] }
  0x2f   :  { %623 = vrot.lane.b32.xlu1 %v4902_v48, %s5395_s16  ;;  %v174_v48 = vld [vmem:[%s8345_s0 + $0x30] sm:$0xf]  ;;  %v1248_v11 = vrot.slane %v1246_v6, 4  ;;  %v1251_v12 = vrot.slane %v1249_v7, 5  ;;  %v4873_v26 = vld [vmem:[%s8345_s0 + $0xc0] sm:$0xf] }
  0x30   :  { %v1239_v56 = vrot.slane %v1238_v51, 4  ;;  %v285_v60 = vshll.u32 %v174_v48, 16  ;;  %v4929_v28 = vld [vmem:[%s8345_s0 + $0x158] sm:$0xf]  ;;  %v35_v34 = vld [vmem:[%s8345_s0 + $0x20] sm:$0xf] }
  0x31   :  { %v1252_v19 = vor.u32 %v1251_v12, %v1248_v11  ;;  %53 = vst.msk [vmem:[#allocation3 + $0x3c] sm:$0xf] %vm47_vm4, %v36_v33  ;;  %52 = vst.msk [vmem:[#allocation3 + $0x30] sm:$0xf] %vm47_vm4, %v35_v34  ;;  %v307_v36 = vrot.slane %v305_v24, 5  ;;  %v813_v37 = vshrl.u32 %v4929_v28, 16 }
  0x32   :  { %1040 = vrot.lane.b32.xlu0 %v4949_v59, %s5398_s15  ;;  %v282_v59 = vshrl.u32 %v174_v48, 16  ;;  %v1244_v61 = vsel %vm5480_vm2, %v1239_v56, %v1243_v49  ;;  %v287_v4 = vrot.slane %v285_v60, 5  ;;  %v4928_v41 = vld [vmem:[%s8345_s0 + $0x154] sm:$0x1]  ;;  %v4983_v44 = vld [vmem:[%s8345_s0 + $0x18] sm:$0xf] }
  0x33   :  { %944 = vrot.lane.b32.xlu1 %v769_v58, %s5397_s25  ;;  %v783_v58 = vsel %vm5480_vm2, %v778_v46, %v782_v43  ;;  %1471 = vst.msk [vmem:[#allocation3 + $0x4] sm:$0xf] %vm47_vm4, %v1244_v61  ;;  %v1253_v25 = vrot.slane %v1252_v19, 4  ;;  %v4984_v45 = vld [vmem:[%s8345_s0 + $0x1c] sm:$0x1]  ;;  %v815_v49 = vrot.slane %v813_v37, 4 }
  0x34   :  { %v284_v3 = vrot.slane %v282_v59, 4  ;;  %v4985_v46 = vld [vmem:[%s8345_s0 + $0x20] sm:$0xf]  ;;  %v4986_v51 = vld [vmem:[%s8345_s0 + $0x24] sm:$0x1]  ;;  %v1260_v52 = vshrl.u32 %v4983_v44, 16 }
  0x35   :  { %v1269_v56 = vshll.u32 %v4984_v45, 16  ;;  %v1277_v61 = vshll.u32 %v4985_v46, 16  ;;  %v4890_v1 = vld [vmem:[%s8345_s0 + $0x158] sm:$0xf]  ;;  %v4905_v2 = vld [vmem:[%s8345_s0 + $0x1e0] sm:$0xf] }
  0x36   :  { %1138 = vrot.lane.b32.xlu0 %v4965_v0, %s5399_s28  ;;  %v797_v0 = vsel %vm5480_vm2, %v792_v53, %v796_v54  ;;  %v288_v17 = vor.u32 %v287_v4, %v284_v3  ;;  %v4889_v53 = vld [vmem:[%s8345_s0 + $0x150] sm:$0xf]  ;;  %v808_v54 = vshll.u32 %v4928_v41, 16  ;;  %v1262_v60 = vrot.slane %v1260_v52, 4  ;;  %v178_v12 = vld [vmem:[%s8345_s0 + $0x48] sm:$0xf] }
  0x37   :  { %1042 = vrot.lane.b32.xlu1 %v4950_v63, %s5398_s15  ;;  %v299_v63 = vshll.u32 %v176_v55, 16  ;;  %v1263_v55 = vshll.u32 %v4983_v44, 16  ;;  %v1271_v6 = vrot.slane %v1269_v56, 5  ;;  %v4906_v15 = vld [vmem:[%s8345_s0 + $0x1e8] sm:$0xf] }
  0x38   :  { %v289_v30 = vrot.slane %v288_v17, 4 }
  0x39   :  { %v301_v10 = vrot.slane %v299_v63, 5 }
  0x3a   :  { %105 = vrot.lane.b32.xlu0 %v4871_v9, %s5393_s10  ;;  %v298_v9 = vrot.slane %v296_v62, 4  ;;  %v294_v40 = vsel %vm5480_vm2, %v289_v30, %v293_v27  ;;  %v1265_v62 = vrot.slane %v1263_v55, 5  ;;  %v4931_v30 = vld [vmem:[%s8345_s0 + $0x168] sm:$0xf] }
  0x3b   :  { %1140 = vrot.lane.b32.xlu1 %v4966_v8, %s5399_s28  ;;  %v1255_v8 = vshll.u32 %v4982_v5, 16  ;;  %v827_v41 = vshrl.u32 %v4931_v30, 16  ;;  %v830_v45 = vshll.u32 %v4931_v30, 16 }
  0x3c   :  { %v1266_v5 = vor.u32 %v1265_v62, %v1262_v60  ;;  %v4970_v60 = vld [vmem:[%s8345_s0 + $0xd0] sm:$0xf] }
  0x3d   :  { %v1257_v21 = vrot.slane %v1255_v8, 5  ;;  %v810_v8 = vrot.slane %v808_v54, 5 }
  0x3e   :  { %429 = vrot.lane.b32.xlu0 %v266_v23, %s5394_s13  ;;  %v302_v23 = vor.u32 %v301_v10, %v298_v9  ;;  %v180_v9 = vld [vmem:[%s8345_s0 + $0x50] sm:$0xf] }
  0x3f   :  { %107 = vrot.lane.b32.xlu1 %v4872_v18, %s5393_s10  ;;  %v4927_v18 = vld [vmem:[%s8345_s0 + $0x150] sm:$0xf]  ;;  %v327_v27 = vshll.u32 %v180_v9, 16 }
  0x40   :  { %v799_v29 = vshrl.u32 %v4927_v18, 16  ;;  %v303_v35 = vrot.slane %v302_v23, 4  ;;  %v313_v23 = vshll.u32 %v178_v12, 16 }
  0x42   :  { %527 = vrot.lane.b32.xlu0 %v4887_v32, %s5392_s9  ;;  %v1258_v32 = vsel %vm5480_vm2, %v1253_v25, %v1257_v21  ;;  %v801_v42 = vrot.slane %v799_v29, 4  ;;  %v308_v48 = vsel %vm5480_vm2, %v303_v35, %v307_v36  ;;  %v38_v25 = vld [vmem:[%s8345_s0 + $0x38] sm:$0xf]  ;;  %v315_v35 = vrot.slane %v313_v23, 5 }
  0x43   :  { %431 = vrot.lane.b32.xlu1 %v280_v31, %s5394_s13  ;;  %v802_v31 = vshll.u32 %v4927_v18, 16  ;;  %1472 = vst.msk [vmem:[#allocation3 + $0x10] sm:$0xf] %vm47_vm4, %v1258_v32  ;;  %v324_v18 = vshrl.u32 %v180_v9, 16  ;;  %55 = vst.msk [vmem:[#allocation3 + $0x54] sm:$0xf] %vm47_vm4, %v38_v25 }
  0x44   :  { %v4953_v29 = vld [vmem:[%s8345_s0 + $0x38] sm:$0xf]  ;;  %v181_v32 = vld [vmem:[%s8345_s0 + $0x54] sm:$0x1]  ;;  %v329_v36 = vrot.slane %v327_v27, 5 }
  0x45   :  { %v804_v43 = vrot.slane %v802_v31, 5  ;;  %v326_v33 = vrot.slane %v324_v18, 4  ;;  %v39_v27 = vld [vmem:[%s8345_s0 + $0x48] sm:$0xf] }
  0x46   :  { %625 = vrot.lane.b32.xlu0 %v4903_v39, %s5395_s16  ;;  %v4874_v39 = vld [vmem:[%s8345_s0 + $0xc8] sm:$0xf]  ;;  %56 = vst.msk [vmem:[#allocation3 + $0x60] sm:$0xf] %vm47_vm4, %v39_v27 }
  0x47   :  { %529 = vrot.lane.b32.xlu1 %v4888_v38, %s5392_s9  ;;  %v816_v38 = vshll.u32 %v4929_v28, 16  ;;  %v805_v59 = vor.u32 %v804_v43, %v801_v42  ;;  %v179_v28 = vld [vmem:[%s8345_s0 + $0x4c] sm:$0x1]  ;;  %v4989_v43 = vld [vmem:[%s8345_s0 + $0x30] sm:$0xf]  ;;  %v330_v56 = vor.u32 %v329_v36, %v326_v33 }
  0x48   :  { %v319_v37 = vshll.u32 %v179_v28, 16  ;;  %v4988_v42 = vld [vmem:[%s8345_s0 + $0x2c] sm:$0x1]  ;;  %v1305_v54 = vshll.u32 %v4989_v43, 16  ;;  %v4991_v28 = vld [vmem:[%s8345_s0 + $0x38] sm:$0xf] }
  0x49   :  { %v818_v50 = vrot.slane %v816_v38, 5  ;;  %v806_v7 = vrot.slane %v805_v59, 4  ;;  %v4933_v38 = vld [vmem:[%s8345_s0 + $0x170] sm:$0xf]  ;;  %v4994_v33 = vld [vmem:[%s8345_s0 + $0x44] sm:$0x1] }
  0x4a   :  { %946 = vrot.lane.b32.xlu0 %v783_v58, %s5397_s25  ;;  %v4930_v58 = vld [vmem:[%s8345_s0 + $0x15c] sm:$0x1]  ;;  %v844_v62 = vshll.u32 %v4933_v38, 16 }
  0x4b   :  { %627 = vrot.lane.b32.xlu1 %v4904_v57, %s5395_s16  ;;  %v1274_v57 = vshrl.u32 %v4985_v46, 16  ;;  %v819_v3 = vor.u32 %v818_v50, %v815_v49  ;;  %v822_v4 = vshll.u32 %v4930_v58, 16  ;;  %v811_v21 = vsel %vm5480_vm2, %v806_v7, %v810_v8  ;;  %v4990_v46 = vld [vmem:[%s8345_s0 + $0x34] sm:$0x1] }
  0x4c   :  { %v1297_v49 = vshll.u32 %v4988_v42, 16  ;;  %v1302_v50 = vshrl.u32 %v4989_v43, 16  ;;  %v1311_v55 = vshll.u32 %v4990_v46, 16  ;;  %v321_v7 = vrot.slane %v319_v37, 5 }
  0x4d   :  { %v1276_v63 = vrot.slane %v1274_v57, 4  ;;  %v824_v17 = vrot.slane %v822_v4, 5  ;;  %v333_v57 = vshll.u32 %v181_v32, 16  ;;  %v4993_v32 = vld [vmem:[%s8345_s0 + $0x40] sm:$0xf]  ;;  %v1319_v37 = vshll.u32 %v4991_v28, 16 }
  0x4e   :  { %1044 = vrot.lane.b32.xlu0 %v4951_v47, %s5398_s15  ;;  %v1283_v47 = vshll.u32 %v4986_v51, 16  ;;  %v4969_v51 = vld [vmem:[%s8345_s0 + $0xc8] sm:$0xf]  ;;  %v1304_v59 = vrot.slane %v1302_v50, 4  ;;  %v1299_v4 = vrot.slane %v1297_v49, 5  ;;  %v1313_v9 = vrot.slane %v1311_v55, 5 }
  0x4f   :  { %948 = vrot.lane.b32.xlu1 %v797_v0, %s5397_s25  ;;  %v1279_v0 = vrot.slane %v1277_v61, 5  ;;  %v4934_v61 = vld [vmem:[%s8345_s0 + $0x174] sm:$0x1] }
  0x50   :  { %v1285_v11 = vrot.slane %v1283_v47, 5  ;;  %v841_v47 = vshrl.u32 %v4933_v38, 16 }
  0x51   :  { %v1280_v10 = vor.u32 %v1279_v0, %v1276_v63  ;;  %v1307_v63 = vrot.slane %v1305_v54, 5  ;;  %v4932_v0 = vld [vmem:[%s8345_s0 + $0x16c] sm:$0x1] }
  0x52   :  { %1142 = vrot.lane.b32.xlu0 %v4967_v16, %s5399_s28  ;;  %v820_v16 = vrot.slane %v819_v3, 4  ;;  %v5923_v18 = vrot.slane %v841_v47, 4 }
  0x53   :  { %1046 = vrot.lane.b32.xlu1 %v4952_v13, %s5398_s15  ;;  %v1267_v13 = vrot.slane %v1266_v5, 4  ;;  %v1281_v14 = vrot.slane %v1280_v10, 4  ;;  %v4875_v5 = vld [vmem:[%s8345_s0 + $0xd8] sm:$0xf]  ;;  %v1308_v8 = vor.u32 %v1307_v63, %v1304_v59  ;;  %v5916_v10 = vrot.slane %v330_v56, 4 }
  0x54   :  { %v825_v31 = vsel %vm5480_vm2, %v820_v16, %v824_v17  ;;  %v4997_v56 = vld [vmem:[%s8345_s0 + $0x58] sm:$0xf] }
  0x55   :  { %v1272_v19 = vsel %vm5480_vm2, %v1267_v13, %v1271_v6  ;;  %v1286_v24 = vsel %vm5480_vm2, %v1281_v14, %v1285_v11  ;;  %v335_v11 = vrot.slane %v333_v57, 5  ;;  %v4876_v14 = vld [vmem:[%s8345_s0 + $0xe0] sm:$0xf]  ;;  %v1309_v16 = vrot.slane %v1308_v8, 4  ;;  %v4892_v57 = vld [vmem:[%s8345_s0 + $0x170] sm:$0xf] }
  0x56   :  { %109 = vrot.lane.b32.xlu0 %v4873_v26, %s5393_s10  ;;  %1473 = vst.msk [vmem:[#allocation3 + $0x1c] sm:$0xf] %vm47_vm4, %v1272_v19  ;;  %v37_v26 = vld [vmem:[%s8345_s0 + $0x30] sm:$0xf]  ;;  %1474 = vst.msk [vmem:[#allocation3 + $0x28] sm:$0xf] %vm47_vm4, %v1286_v24 }
  0x57   :  { %1144 = vrot.lane.b32.xlu1 %v4968_v22, %s5399_s28  ;;  %v310_v22 = vshrl.u32 %v178_v12, 16  ;;  %54 = vst.msk [vmem:[#allocation3 + $0x48] sm:$0xf] %vm47_vm4, %v37_v26  ;;  %v850_v12 = vshll.u32 %v4934_v61, 16  ;;  %v5925_v19 = vrot.slane %v844_v62, 5  ;;  %v1314_v26 = vsel %vm5480_vm2, %v1309_v16, %v1313_v9 }
  0x58   :  { %v40_v24 = vld [vmem:[%s8345_s0 + $0x50] sm:$0xf]  ;;  %v336_v30 = vsel %vm5480_vm2, %v5916_v10, %v335_v11  ;;  %1476 = vst.msk [vmem:[#allocation3 + $0x40] sm:$0xf] %vm47_vm4, %v1314_v26  ;;  %v1361_v61 = vshll.u32 %v4997_v56, 16 }
  0x59   :  { %v312_v34 = vrot.slane %v310_v22, 4  ;;  %v5930_v22 = vld [vmem:[%s8345_s0 + $0x58] sm:$0xf]  ;;  %57 = vst.msk [vmem:[#allocation3 + $0x6c] sm:$0xf] %vm47_vm4, %v40_v24 }
  0x5a   :  { %433 = vrot.lane.b32.xlu0 %v294_v40, %s5394_s13  ;;  %v4954_v40 = vld [vmem:[%s8345_s0 + $0x40] sm:$0xf]  ;;  %v338_v46 = vshrl.u32 %v5930_v22, 16  ;;  %v6007_v8 = vld [vmem:[%s8345_s0 + $0x5c] sm:$0x1] }
  0x5b   :  { %111 = vrot.lane.b32.xlu1 %v4874_v39, %s5393_s10  ;;  %v4987_v39 = vld [vmem:[%s8345_s0 + $0x28] sm:$0xf]  ;;  %v316_v52 = vor.u32 %v315_v35, %v312_v34  ;;  %v1316_v34 = vshrl.u32 %v4991_v28, 16 }
  0x5c   :  { %v1288_v44 = vshrl.u32 %v4987_v39, 16  ;;  %v4891_v35 = vld [vmem:[%s8345_s0 + $0x168] sm:$0xf] }
  0x5d   :  { %v317_v6 = vrot.slane %v316_v52, 4  ;;  %v1318_v43 = vrot.slane %v1316_v34, 4  ;;  %v347_v34 = vshll.u32 %v6007_v8, 16 }
  0x5e   :  { %531 = vrot.lane.b32.xlu0 %v4889_v53, %s5392_s9  ;;  %v1290_v53 = vrot.slane %v1288_v44, 4  ;;  %v1333_v44 = vshll.u32 %v4993_v32, 16 }
  0x5f   :  { %435 = vrot.lane.b32.xlu1 %v308_v48, %s5394_s13  ;;  %v1291_v48 = vshll.u32 %v4987_v39, 16  ;;  %v322_v25 = vsel %vm5480_vm2, %v317_v6, %v321_v7  ;;  %v1330_v39 = vshrl.u32 %v4993_v32, 16  ;;  %v4955_v32 = vld [vmem:[%s8345_s0 + $0x50] sm:$0xf] }
  0x60   :  { %v1335_v52 = vrot.slane %v1333_v44, 5 }
  0x61   :  { %v1293_v58 = vrot.slane %v1291_v48, 5  ;;  %v1321_v48 = vrot.slane %v1319_v37, 5  ;;  %v1332_v50 = vrot.slane %v1330_v39, 4  ;;  %v42_v39 = vld [vmem:[%s8345_s0 + $0x60] sm:$0xf] }
  0x62   :  { %629 = vrot.lane.b32.xlu0 %v4905_v2, %s5395_s16  ;;  %v832_v2 = vrot.slane %v830_v45, 5  ;;  %v1339_v45 = vshll.u32 %v4994_v33, 16  ;;  %59 = vst.msk [vmem:[#allocation3 + $0x84] sm:$0xf] %vm47_vm4, %v42_v39 }
  0x63   :  { %533 = vrot.lane.b32.xlu1 %v4890_v1, %s5392_s9  ;;  %v829_v1 = vrot.slane %v827_v41, 4  ;;  %v1294_v3 = vor.u32 %v1293_v58, %v1290_v53  ;;  %v4907_v58 = vld [vmem:[%s8345_s0 + $0x1f8] sm:$0xf]  ;;  %v1322_v59 = vor.u32 %v1321_v48, %v1318_v43  ;;  %v1336_v62 = vor.u32 %v1335_v52, %v1332_v50  ;;  %v185_v43 = vld [vmem:[%s8345_s0 + $0x64] sm:$0x1] }
  0x64   :  { %v1341_v53 = vrot.slane %v1339_v45, 5 }
  0x65   :  { %v1295_v13 = vrot.slane %v1294_v3, 4  ;;  %v1323_v3 = vrot.slane %v1322_v59, 4  ;;  %v1337_v9 = vrot.slane %v1336_v62, 4 }
  0x66   :  { %950 = vrot.lane.b32.xlu0 %v811_v21, %s5397_s25  ;;  %v833_v21 = vor.u32 %v832_v2, %v829_v1  ;;  %v847_v1 = vor.u32 %v5925_v19, %v5923_v18  ;;  %v184_v2 = vld [vmem:[%s8345_s0 + $0x60] sm:$0xf] }
  0x67   :  { %631 = vrot.lane.b32.xlu1 %v4906_v15, %s5395_s16  ;;  %v836_v15 = vshll.u32 %v4932_v0, 16  ;;  %v1300_v23 = vsel %vm5480_vm2, %v1295_v13, %v1299_v4  ;;  %v4996_v4 = vld [vmem:[%s8345_s0 + $0x54] sm:$0x1]  ;;  %v4908_v13 = vld [vmem:[%s8345_s0 + $0x200] sm:$0xf]  ;;  %v1342_v18 = vsel %vm5480_vm2, %v1337_v9, %v1341_v53  ;;  %v352_v28 = vshrl.u32 %v184_v2, 16 }
  0x68   :  { %1475 = vst.msk [vmem:[#allocation3 + $0x34] sm:$0xf] %vm47_vm4, %v1300_v23  ;;  %v5975_v42 = vrot.slane %v833_v21, 4  ;;  %v1353_v11 = vshll.u32 %v4996_v4, 16  ;;  %v848_v24 = vrot.slane %v847_v1, 4  ;;  %v355_v33 = vshll.u32 %v184_v2, 16 }
  0x69   :  { %v5969_v36 = vrot.slane %v836_v15, 5  ;;  %1478 = vst.msk [vmem:[#allocation3 + $0x58] sm:$0xf] %vm47_vm4, %v1342_v18  ;;  %v354_v44 = vrot.slane %v352_v28, 4 }
  0x6a   :  { %1048 = vrot.lane.b32.xlu0 %v4953_v29, %s5398_s15  ;;  %v4992_v29 = vld [vmem:[%s8345_s0 + $0x3c] sm:$0x1]  ;;  %v1355_v21 = vrot.slane %v1353_v11, 5  ;;  %v357_v45 = vrot.slane %v355_v33, 5 }
  0x6b   :  { %952 = vrot.lane.b32.xlu1 %v825_v31, %s5397_s25  ;;  %v5956_v31 = vrot.slane %v850_v12, 5  ;;  %v1325_v38 = vshll.u32 %v4992_v29, 16  ;;  %v1363_v12 = vrot.slane %v1361_v61, 5 }
  0x6d   :  { %v1327_v49 = vrot.slane %v1325_v38, 5  ;;  %v853_v38 = vsel %vm5480_vm2, %v848_v24, %v5956_v31  ;;  %v4956_v31 = vld [vmem:[%s8345_s0 + $0x58] sm:$0xf] }
  0x6e   :  { %1146 = vrot.lane.b32.xlu0 %v4969_v51, %s5399_s28  ;;  %v4995_v51 = vld [vmem:[%s8345_s0 + $0x50] sm:$0xf] }
  0x6f   :  { %1050 = vrot.lane.b32.xlu1 %v4954_v40, %s5398_s15  ;;  %v1344_v54 = vshrl.u32 %v4995_v51, 16  ;;  %v1347_v55 = vshll.u32 %v4995_v51, 16  ;;  %v1328_v15 = vsel %vm5480_vm2, %v1323_v3, %v1327_v49 }
  0x70   :  { %1477 = vst.msk [vmem:[#allocation3 + $0x4c] sm:$0xf] %vm47_vm4, %v1328_v15 }
  0x71   :  { %v1346_v63 = vrot.slane %v1344_v54, 4  ;;  %v1349_v0 = vrot.slane %v1347_v55, 5 }
  0x72   :  { %113 = vrot.lane.b32.xlu0 %v4875_v5, %s5393_s10  ;;  %v4998_v5 = vld [vmem:[%s8345_s0 + $0x5c] sm:$0x1] }
  0x73   :  { %1148 = vrot.lane.b32.xlu1 %v4970_v60, %s5399_s28  ;;  %v1358_v60 = vshrl.u32 %v4997_v56, 16  ;;  %v1350_v10 = vor.u32 %v1349_v0, %v1346_v63  ;;  %v1367_v16 = vshll.u32 %v4998_v5, 16 }
  0x74   :  { %v98_v17 = vpop.permute.xlu0 %97  ;;  %v5972_v40 = vpop.permute.xlu1 %521 }
  0x75   :  { %146 = vst.msk [vmem:[#allocation3] sm:$0xf] %vm145_vm5, %v98_v17  ;;  %v1360_v6 = vrot.slane %v1358_v60, 4  ;;  %v1351_v19 = vrot.slane %v1350_v10, 4  ;;  %v1369_v26 = vrot.slane %v1367_v16, 5 }
  0x76   :  { %437 = vrot.lane.b32.xlu0 %v322_v25, %s5394_s13  ;;  %v839_v25 = vsel %vm5480_vm2, %v5975_v42, %v5969_v36  ;;  %v4971_v42 = vld [vmem:[%s8345_s0 + $0xe0] sm:$0xf] }
  0x77   :  { %115 = vrot.lane.b32.xlu1 %v4876_v14, %s5393_s10  ;;  %v341_v14 = vshll.u32 %v5930_v22, 16  ;;  %v1364_v23 = vor.u32 %v1363_v12, %v1360_v6  ;;  %v1356_v29 = vsel %vm5480_vm2, %v1351_v19, %v1355_v21 }
  0x78   :  { %v100_v41 = vpop.permute.xlu0 %99  ;;  %1479 = vst.msk [vmem:[#allocation3 + $0x64] sm:$0xf] %vm47_vm4, %v1356_v29 }
  0x79   :  { %147 = vst.msk [vmem:[#allocation3 + $0xc] sm:$0xf] %vm145_vm5, %v100_v41  ;;  %v343_v36 = vrot.slane %v341_v14, 5 }
  0x7a   :  { %535 = vrot.lane.b32.xlu0 %v4891_v35, %s5392_s9  ;;  %v340_v35 = vrot.slane %v338_v46, 4  ;;  %v4935_v46 = vld [vmem:[%s8345_s0 + $0x178] sm:$0xf] }
  0x7b   :  { %439 = vrot.lane.b32.xlu1 %v336_v30, %s5394_s13  ;;  %v1365_v30 = vrot.slane %v1364_v23, 4 }
  0x7c   :  { %v520_v47 = vpop.permute.xlu0 %519  ;;  %v344_v48 = vor.u32 %v343_v36, %v340_v35 }
  0x7d   :  { %v422_v7 = vpop.permute.xlu1 %421  ;;  %v1370_v37 = vsel %vm5480_vm2, %v1365_v30, %v1369_v26 }
  0x7e   :  { %470 = vst.msk [vmem:[#allocation3] sm:$0xf] %vm469_vm6, %v422_v7  ;;  %633 = vrot.lane.b32.xlu0 %v4907_v58, %s5395_s16 }
  0x7f   :  { %537 = vrot.lane.b32.xlu1 %v4892_v57, %s5392_s9  ;;  %568 = vst.msk [vmem:[#allocation3] sm:$0xf] %vm567_vm7, %v520_v47 }
  0x80   :  { %v618_v17 = vpop.permute.xlu0 %617  ;;  %1480 = vst.msk [vmem:[#allocation3 + $0x70] sm:$0xf] %vm47_vm4, %v1370_v37 }
  0x81   :  { %666 = vst.msk [vmem:[#allocation3] sm:$0xf] %vm665_vm8, %v618_v17  ;;  %v424_v27 = vpop.permute.xlu1 %423 }
  0x82   :  { %471 = vst.msk [vmem:[#allocation3 + $0xc] sm:$0xf] %vm469_vm6, %v424_v27  ;;  %954 = vrot.lane.b32.xlu0 %v839_v25, %s5397_s25 }
  0x83   :  { %569 = vst.msk [vmem:[#allocation3 + $0xc] sm:$0xf] %vm567_vm7, %v5972_v40  ;;  %635 = vrot.lane.b32.xlu1 %v4908_v13, %s5395_s16  ;;  %v41_v40 = vld [vmem:[%s8345_s0 + $0x58] sm:$0xf] }
  0x84   :  { %v939_v41 = vpop.permute.xlu0 %938  ;;  %58 = vst.msk [vmem:[#allocation3 + $0x78] sm:$0xf] %vm47_vm4, %v41_v40 }
  0x85   :  { %v620_v22 = vpop.permute.xlu1 %619  ;;  %987 = vst.msk [vmem:[#allocation3] sm:$0xf] %vm986_vm9, %v939_v41 }
  0x86   :  { %667 = vst.msk [vmem:[#allocation3 + $0xc] sm:$0xf] %vm665_vm8, %v620_v22  ;;  %1052 = vrot.lane.b32.xlu0 %v4955_v32, %s5398_s15 }
  0x87   :  { %956 = vrot.lane.b32.xlu1 %v853_v38, %s5397_s25 }
  0x88   :  { %v1037_v50 = vpop.permute.xlu0 %1036 }
  0x89   :  { %v941_v49 = vpop.permute.xlu1 %940  ;;  %1085 = vst.msk [vmem:[#allocation3] sm:$0xf] %vm1084_vm10, %v1037_v50 }
  0x8a   :  { %988 = vst.msk [vmem:[#allocation3 + $0xc] sm:$0xf] %vm986_vm9, %v941_v49 }
  0x8b   :  { %13 = vsyncpa [#allocation5], 0  ;;  %1054 = vrot.lane.b32.xlu1 %v4956_v31, %s5398_s15  ;;  %v4972_v51 = vld [vmem:[%s8345_s0 + $0xe8] sm:$0xf]  ;;  %1150 = vrot.lane.b32.xlu0 %v4971_v42, %s5399_s28  ;;  %vm1182_vm11 = vcmask 1044352   ;;  %v358_v53 = vor.u32 %v357_v45, %v354_v44  ;;  %v361_v54 = vshll.u32 %v185_v43, 16 }
  0x8c   :  { %v4877_v52 = vld [vmem:[%s8345_s0 + $0xe8] sm:$0xf]  ;;  %v345_v55 = vrot.slane %v344_v48, 4  ;;  %v349_v56 = vrot.slane %v347_v34, 5  ;;  %v4937_v57 = vld [vmem:[%s8345_s0 + $0x180] sm:$0xf]  ;;  %v1135_v61 = vpop.permute.xlu0 %1134 }
  0x8d   :  { %v855_v58 = vshrl.u32 %v4935_v46, 16  ;;  %v858_v59 = vshll.u32 %v4935_v46, 16  ;;  %v1039_v60 = vpop.permute.xlu1 %1038  ;;  %1183 = vst.msk [vmem:[#allocation3] sm:$0xf] %vm1182_vm11, %v1135_v61  ;;  %v359_v47 = vrot.slane %v358_v53, 4  ;;  %v363_v62 = vrot.slane %v361_v54, 5 }
  0x8e   :  { %1086 = vst.msk [vmem:[#allocation3 + $0xc] sm:$0xf] %vm1084_vm10, %v1039_v60  ;;  %v869_v63 = vshrl.u32 %v4937_v57, 16  ;;  %v4878_v0 = vld [vmem:[%s8345_s0 + $0xf0] sm:$0xf]  ;;  %v350_v1 = vsel %vm5480_vm2, %v345_v55, %v349_v56  ;;  %v872_v2 = vshll.u32 %v4937_v57, 16 }
  0x8f   :  { %1152 = vrot.lane.b32.xlu1 %v4972_v51, %s5399_s28  ;;  %117 = vrot.lane.b32.xlu0 %v4877_v52, %s5393_s10  ;;  %v857_v3 = vrot.slane %v855_v58, 4  ;;  %v860_v4 = vrot.slane %v858_v59, 5  ;;  %v4936_v7 = vld [vmem:[%s8345_s0 + $0x17c] sm:$0x1]  ;;  %v2395_v8 = vld [vmem:[#allocation2] sm:$0xf]  ;;  %v364_v12 = vsel %vm5480_vm2, %v359_v47, %v363_v62 }
  0x90   :  { %v102_v6 = vpop.permute.xlu0 %101  ;;  %v4893_v9 = vld [vmem:[%s8345_s0 + $0x178] sm:$0xf]  ;;  %v4938_v10 = vld [vmem:[%s8345_s0 + $0x184] sm:$0x1]  ;;  %v871_v11 = vrot.slane %v869_v63, 4  ;;  %v874_v13 = vrot.slane %v872_v2, 5 }
  0x91   :  { %v1137_v5 = vpop.permute.xlu1 %1136  ;;  %148 = vst.msk [vmem:[#allocation3 + $0x18] sm:$0xf] %vm145_vm5, %v102_v6  ;;  %v861_v14 = vor.u32 %v860_v4, %v857_v3  ;;  %v864_v15 = vshll.u32 %v4936_v7, 16  ;;  %v4999_v16 = vld [vmem:[%s8345_s0 + $0x60] sm:$0xf]  ;;  %vm1647_vm12 = vcmask 130048  }
  0x92   :  { %1184 = vst.msk [vmem:[#allocation3 + $0xc] sm:$0xf] %vm1182_vm11, %v1137_v5  ;;  %v5001_v17 = vld [vmem:[%s8345_s0 + $0x68] sm:$0xf]  ;;  %v1372_v23 = vshrl.u32 %v4999_v16, 16  ;;  %v1375_v24 = vshll.u32 %v4999_v16, 16  ;;  %v875_v35 = vor.u32 %v874_v13, %v871_v11 }
  0x93   :  { %119 = vrot.lane.b32.xlu1 %v4878_v0, %s5393_s10  ;;  %441 = vrot.lane.b32.xlu0 %v350_v1, %s5394_s13  ;;  %v1386_v25 = vshrl.u32 %v5001_v17, 16  ;;  %v1389_v26 = vshll.u32 %v5001_v17, 16  ;;  %v4894_v27 = vld [vmem:[%s8345_s0 + $0x180] sm:$0xf]  ;;  %v878_v28 = vshll.u32 %v4938_v10, 16  ;;  %v862_v36 = vrot.slane %v861_v14, 4 }
  0x94   :  { %v1487_v18 = vld [vmem:[#allocation3] sm:$0xff]  ;;  %v426_v21 = vpop.permute.xlu0 %425  ;;  %v4909_v29 = vld [vmem:[%s8345_s0 + $0x208] sm:$0xf]  ;;  %v1374_v30 = vrot.slane %v1372_v23, 4  ;;  %v1377_v32 = vrot.slane %v1375_v24, 5  ;;  %v866_v37 = vrot.slane %v864_v15, 5 }
  0x95   :  { %v104_v19 = vpop.permute.xlu1 %103  ;;  %2411 = vst.msk [vmem:[#allocation3] sm:$0xf] %vm1961_vm3, %v2395_v8  ;;  %v1388_v33 = vrot.slane %v1386_v25, 4  ;;  %v1391_v34 = vrot.slane %v1389_v26, 5  ;;  %v5000_v38 = vld [vmem:[%s8345_s0 + $0x64] sm:$0x1] }
  0x96   :  { %149 = vst.msk [vmem:[#allocation3 + $0x24] sm:$0xf] %vm145_vm5, %v104_v19  ;;  %v5002_v39 = vld [vmem:[%s8345_s0 + $0x6c] sm:$0x1]  ;;  %v186_v31 = vld [vmem:[%s8345_s0 + $0x68] sm:$0xf]  ;;  %v1378_v42 = vor.u32 %v1377_v32, %v1374_v30  ;;  %v867_v56 = vsel %vm5480_vm2, %v862_v36, %v866_v37 }
  0x97   :  { %472 = vst.msk [vmem:[#allocation3 + $0x18] sm:$0xf] %vm469_vm6, %v426_v21  ;;  %443 = vrot.lane.b32.xlu1 %v364_v12, %s5394_s13  ;;  %539 = vrot.lane.b32.xlu0 %v4893_v9, %s5392_s9  ;;  %v1381_v43 = vshll.u32 %v5000_v38, 16  ;;  %v1392_v44 = vor.u32 %v1391_v34, %v1388_v33  ;;  %v1395_v45 = vshll.u32 %v5002_v39, 16  ;;  %v880_v49 = vrot.slane %v878_v28, 5  ;;  %s5400_s18 = smov [#allocation4]  }
  0x98   :  { %v524_v41 = vpop.permute.xlu0 %523  ;;  %v4910_v50 = vld [vmem:[%s8345_s0 + $0x210] sm:$0xf]  ;;  %v1379_v51 = vrot.slane %v1378_v42, 4  ;;  %v876_v55 = vrot.slane %v875_v35, 4  ;;  %v366_v58 = vshrl.u32 %v186_v31, 16  ;;  %v369_v59 = vshll.u32 %v186_v31, 16 }
  0x99   :  { %v428_v40 = vpop.permute.xlu1 %427  ;;  %v1488_v22 = vld [vmem:[#allocation3 + $0xc] sm:$0xff]  ;;  %570 = vst.msk [vmem:[#allocation3 + $0x18] sm:$0xf] %vm567_vm7, %v524_v41  ;;  %v1383_v52 = vrot.slane %v1381_v43, 5  ;;  %v1393_v53 = vrot.slane %v1392_v44, 4  ;;  %v1397_v54 = vrot.slane %v1395_v45, 5 }
  0x9a   :  { %473 = vst.msk [vmem:[#allocation3 + $0x24] sm:$0xf] %vm469_vm6, %v428_v40  ;;  %v5012_v46 = vcombine.high %v1487_v18, %v1488_v22  ;;  %v5011_v48 = vcombine.low %v1487_v18, %v1488_v22  ;;  %v188_v57 = vld [vmem:[%s8345_s0 + $0x70] sm:$0xf]  ;;  %v4957_v63 = vld [vmem:[%s8345_s0 + $0x60] sm:$0xf]  ;;  %v881_v2 = vsel %vm5480_vm2, %v876_v55, %v880_v49 }
  0x9b   :  { %541 = vrot.lane.b32.xlu1 %v4894_v27, %s5392_s9  ;;  %637 = vrot.lane.b32.xlu0 %v4909_v29, %s5395_s16  ;;  %v1384_v47 = vsel %vm5480_vm2, %v1379_v51, %v1383_v52  ;;  %v1398_v62 = vsel %vm5480_vm2, %v1393_v53, %v1397_v54  ;;  %v380_v0 = vshrl.u32 %v188_v57, 16  ;;  %v383_v1 = vshll.u32 %v188_v57, 16  ;;  %v44_v5 = vld [vmem:[%s8345_s0 + $0x70] sm:$0xf]  ;;  %v43_v6 = vld [vmem:[%s8345_s0 + $0x68] sm:$0xf] }
  0x9c   :  { %5036 = vmatprep.mubr.msk.bf16.mxu0 %vm1647_vm12, %v5012_v46  ;;  %v622_v61 = vpop.permute.xlu0 %621  ;;  %1481 = vst.msk [vmem:[#allocation3 + $0x7c] sm:$0xf] %vm47_vm4, %v1384_v47  ;;  %1482 = vst.msk [vmem:[#allocation3 + $0x88] sm:$0xf] %vm47_vm4, %v1398_v62  ;;  %v368_v3 = vrot.slane %v366_v58, 4  ;;  %v371_v4 = vrot.slane %v369_v59, 5 }
  0x9d   :  { %v526_v60 = vpop.permute.xlu1 %525  ;;  %1705 = vmatmul.mubr.bf16.vlgmr.msra.gmra.mxu0 %v5011_v48  ;;  %668 = vst.msk [vmem:[#allocation3 + $0x18] sm:$0xf] %vm665_vm8, %v622_v61  ;;  %v187_v9 = vld [vmem:[%s8345_s0 + $0x6c] sm:$0x1]  ;;  %v4958_v10 = vld [vmem:[%s8345_s0 + $0x68] sm:$0xf] }
  0x9e   :  { %571 = vst.msk [vmem:[#allocation3 + $0x24] sm:$0xf] %vm567_vm7, %v526_v60  ;;  %v382_v11 = vrot.slane %v380_v0, 4  ;;  %v385_v12 = vrot.slane %v383_v1, 5  ;;  %v4973_v13 = vld [vmem:[%s8345_s0 + $0xf0] sm:$0xf]  ;;  %v372_v15 = vor.u32 %v371_v4, %v368_v3 }
  0x9f   :  { %639 = vrot.lane.b32.xlu1 %v4910_v50, %s5395_s16  ;;  %958 = vrot.lane.b32.xlu0 %v867_v56, %s5397_s25  ;;  %61 = vst.msk [vmem:[#allocation3 + $0x9c] sm:$0xf] %vm47_vm4, %v44_v5  ;;  %60 = vst.msk [vmem:[#allocation3 + $0x90] sm:$0xf] %vm47_vm4, %v43_v6  ;;  %v189_v14 = vld [vmem:[%s8345_s0 + $0x74] sm:$0x1] }
  0xa0   :  { %v943_v8 = vpop.permute.xlu0 %942  ;;  %v375_v16 = vshll.u32 %v187_v9, 16  ;;  %v4939_v19 = vld [vmem:[%s8345_s0 + $0x188] sm:$0xf]  ;;  %v4974_v21 = vld [vmem:[%s8345_s0 + $0xf8] sm:$0xf]  ;;  %v386_v24 = vor.u32 %v385_v12, %v382_v11  ;;  %v389_v25 = vshll.u32 %v189_v14, 16 }
  0xa1   :  { %v624_v7 = vpop.permute.xlu1 %623  ;;  %989 = vst.msk [vmem:[#allocation3 + $0x18] sm:$0xf] %vm986_vm9, %v943_v8  ;;  %v4879_v23 = vld [vmem:[%s8345_s0 + $0xf8] sm:$0xf]  ;;  %v373_v26 = vrot.slane %v372_v15, 4  ;;  %v883_v29 = vshrl.u32 %v4939_v19, 16 }
  0xa2   :  { %669 = vst.msk [vmem:[#allocation3 + $0x24] sm:$0xf] %vm665_vm8, %v624_v7  ;;  %v377_v27 = vrot.slane %v375_v16, 5  ;;  %v4941_v28 = vld [vmem:[%s8345_s0 + $0x190] sm:$0xf]  ;;  %v886_v30 = vshll.u32 %v4939_v19, 16 }
  0xa3   :  { %960 = vrot.lane.b32.xlu1 %v881_v2, %s5397_s25  ;;  %1056 = vrot.lane.b32.xlu0 %v4957_v63, %s5398_s15  ;;  %v387_v34 = vrot.slane %v386_v24, 4  ;;  %v391_v35 = vrot.slane %v389_v25, 5  ;;  %v897_v36 = vshrl.u32 %v4941_v28, 16  ;;  %v4880_v37 = vld [vmem:[%s8345_s0 + $0x100] sm:$0xf]  ;;  %v900_v39 = vshll.u32 %v4941_v28, 16 }
  0xa4   :  { %v1041_v18 = vpop.permute.xlu0 %1040  ;;  %v378_v38 = vsel %vm5480_vm2, %v373_v26, %v377_v27  ;;  %v885_v40 = vrot.slane %v883_v29, 4  ;;  %v888_v22 = vrot.slane %v886_v30, 5  ;;  %v4940_v42 = vld [vmem:[%s8345_s0 + $0x18c] sm:$0x1]  ;;  %v4895_v43 = vld [vmem:[%s8345_s0 + $0x188] sm:$0xf] }
  0xa5   :  { %v945_v17 = vpop.permute.xlu1 %944  ;;  %1087 = vst.msk [vmem:[#allocation3 + $0x18] sm:$0xf] %vm1084_vm10, %v1041_v18  ;;  %v4942_v44 = vld [vmem:[%s8345_s0 + $0x194] sm:$0x1]  ;;  %v899_v45 = vrot.slane %v897_v36, 4  ;;  %v392_v46 = vsel %vm5480_vm2, %v387_v34, %v391_v35  ;;  %v902_v48 = vrot.slane %v900_v39, 5 }
  0xa6   :  { %990 = vst.msk [vmem:[#allocation3 + $0x24] sm:$0xf] %vm986_vm9, %v945_v17  ;;  %v889_v49 = vor.u32 %v888_v22, %v885_v40  ;;  %v892_v50 = vshll.u32 %v4940_v42, 16  ;;  %v5003_v51 = vld [vmem:[%s8345_s0 + $0x70] sm:$0xf]  ;;  %v906_v60 = vshll.u32 %v4942_v44, 16 }
  0xa7   :  { %1058 = vrot.lane.b32.xlu1 %v4958_v10, %s5398_s15  ;;  %1154 = vrot.lane.b32.xlu0 %v4973_v13, %s5399_s28  ;;  %v5005_v52 = vld [vmem:[%s8345_s0 + $0x78] sm:$0xf]  ;;  %v1400_v55 = vshrl.u32 %v5003_v51, 16  ;;  %v1403_v56 = vshll.u32 %v5003_v51, 16  ;;  %v4896_v59 = vld [vmem:[%s8345_s0 + $0x190] sm:$0xf]  ;;  %v903_v3 = vor.u32 %v902_v48, %v899_v45 }
  0xa8   :  { %v1139_v33 = vpop.permute.xlu0 %1138  ;;  %v1414_v57 = vshrl.u32 %v5005_v52, 16  ;;  %v1417_v58 = vshll.u32 %v5005_v52, 16  ;;  %v4911_v47 = vld [vmem:[%s8345_s0 + $0x218] sm:$0xf]  ;;  %v890_v4 = vrot.slane %v889_v49, 4  ;;  %v894_v5 = vrot.slane %v892_v50, 5 }
  0xa9   :  { %v1043_v32 = vpop.permute.xlu1 %1042  ;;  %1185 = vst.msk [vmem:[#allocation3 + $0x18] sm:$0xf] %vm1182_vm11, %v1139_v33  ;;  %v190_v62 = vld [vmem:[%s8345_s0 + $0x78] sm:$0xf]  ;;  %v1402_v63 = vrot.slane %v1400_v55, 4  ;;  %v1405_v0 = vrot.slane %v1403_v56, 5 }
  0xaa   :  { %1088 = vst.msk [vmem:[#allocation3 + $0x24] sm:$0xf] %vm1084_vm10, %v1043_v32  ;;  %v1416_v1 = vrot.slane %v1414_v57, 4  ;;  %v1419_v2 = vrot.slane %v1417_v58, 5  ;;  %v5004_v6 = vld [vmem:[%s8345_s0 + $0x74] sm:$0x1]  ;;  %v895_v29 = vsel %vm5480_vm2, %v890_v4, %v894_v5 }
  0xab   :  { %1156 = vrot.lane.b32.xlu1 %v4974_v21, %s5399_s28  ;;  %121 = vrot.lane.b32.xlu0 %v4879_v23, %s5393_s10  ;;  %v5006_v7 = vld [vmem:[%s8345_s0 + $0x7c] sm:$0x1]  ;;  %v1406_v12 = vor.u32 %v1405_v0, %v1402_v63  ;;  %v1409_v13 = vshll.u32 %v5004_v6, 16  ;;  %v4912_v23 = vld [vmem:[%s8345_s0 + $0x220] sm:$0xf]  ;;  %v904_v24 = vrot.slane %v903_v3, 4 }
  0xac   :  { %v106_v31 = vpop.permute.xlu0 %105  ;;  %v5308_v10 = vld [vmem:[#allocation3 + $0x1c] ss:$12 sps:$4 sm:$0xff]   ;;  %v1420_v14 = vor.u32 %v1419_v2, %v1416_v1  ;;  %v1423_v15 = vshll.u32 %v5006_v7, 16  ;;  %v908_v25 = vrot.slane %v906_v60, 5  ;;  %v394_v26 = vshrl.u32 %v190_v62, 16  ;;  %s4856_s19 = sshll.u32 %s5400_s18, 4  ;;  %s4857_s19 = int_to_ptr.vmem [resolvable:$true] %s4856_s19 }
  0xad   :  { %v1141_v41 = vpop.permute.xlu1 %1140  ;;  %150 = vst.msk [vmem:[#allocation3 + $0x30] sm:$0xf] %vm145_vm5, %v106_v31  ;;  %5037 = vmatprep.mubr.msk.bf16.mxu0 %vm1647_vm12, %v5308_v10  ;;  %v1407_v17 = vrot.slane %v1406_v12, 4  ;;  %v1411_v18 = vrot.slane %v1409_v13, 5  ;;  %v192_v30 = vld [vmem:[%s8345_s0 + $0x80] sm:$0xf]  ;;  %p5375_p1 = scmp.lt.s32.totalorder %s4857_s19, %s4857_s19 }
  0xae   :  { %1186 = vst.msk [vmem:[#allocation3 + $0x24] sm:$0xf] %vm1182_vm11, %v1141_v41  ;;  %v1421_v19 = vrot.slane %v1420_v14, 4  ;;  %v1425_v21 = vrot.slane %v1423_v15, 5  ;;  %v397_v32 = vshll.u32 %v190_v62, 16  ;;  %v909_v35 = vsel %vm5480_vm2, %v904_v24, %v908_v25 }
  0xaf   :  { %123 = vrot.lane.b32.xlu1 %v4880_v37, %s5393_s10  ;;  %445 = vrot.lane.b32.xlu0 %v378_v38, %s5394_s13  ;;  %v1412_v33 = vsel %vm5480_vm2, %v1407_v17, %v1411_v18  ;;  %v408_v36 = vshrl.u32 %v192_v30, 16  ;;  %v411_v37 = vshll.u32 %v192_v30, 16  ;;  %v46_v38 = vld [vmem:[%s8345_s0 + $0x80] sm:$0xf]  ;;  %v45_v39 = vld [vmem:[%s8345_s0 + $0x78] sm:$0xf] }
  0xb0   :  { %v430_v54 = vpop.permute.xlu0 %429  ;;  %v1489_v61 = vld [vmem:[#allocation3 + $0x18] sm:$0xff]  ;;  %v1426_v34 = vsel %vm5480_vm2, %v1421_v19, %v1425_v21  ;;  %1483 = vst.msk [vmem:[#allocation3 + $0x94] sm:$0xf] %vm47_vm4, %v1412_v33  ;;  %v4959_v41 = vld [vmem:[%s8345_s0 + $0x70] sm:$0xf]  ;;  %v396_v31 = vrot.slane %v394_v26, 4 }
  0xb1   :  { %v108_v53 = vpop.permute.xlu1 %107  ;;  %474 = vst.msk [vmem:[#allocation3 + $0x30] sm:$0xf] %vm469_vm6, %v430_v54  ;;  %v399_v42 = vrot.slane %v397_v32, 5  ;;  %v4960_v44 = vld [vmem:[%s8345_s0 + $0x78] sm:$0xf]  ;;  %v413_v48 = vrot.slane %v411_v37, 5 }
  0xb2   :  { %151 = vst.msk [vmem:[#allocation3 + $0x3c] sm:$0xf] %vm145_vm5, %v108_v53  ;;  %v193_v45 = vld [vmem:[%s8345_s0 + $0x84] sm:$0x1]  ;;  %v4975_v51 = vld [vmem:[%s8345_s0 + $0x100] sm:$0xf] }
  0xb3   :  { %447 = vrot.lane.b32.xlu1 %v392_v46, %s5394_s13  ;;  %543 = vrot.lane.b32.xlu0 %v4895_v43, %s5392_s9  ;;  %1484 = vst.msk [vmem:[#allocation3 + $0xa0] sm:$0xf] %vm47_vm4, %v1426_v34  ;;  %63 = vst.msk [vmem:[#allocation3 + $0xb4] sm:$0xf] %vm47_vm4, %v46_v38  ;;  %v191_v43 = vld [vmem:[%s8345_s0 + $0x7c] sm:$0x1]  ;;  %v400_v52 = vor.u32 %v399_v42, %v396_v31 }
  0xb4   :  { %v528_v11 = vpop.permute.xlu0 %527  ;;  %62 = vst.msk [vmem:[#allocation3 + $0xa8] sm:$0xf] %vm47_vm4, %v45_v39  ;;  %v410_v46 = vrot.slane %v408_v36, 4  ;;  %v403_v53 = vshll.u32 %v191_v43, 16  ;;  %v4943_v54 = vld [vmem:[%s8345_s0 + $0x198] sm:$0xf] }
  0xb5   :  { %v432_v8 = vpop.permute.xlu1 %431  ;;  %v1490_v9 = vld [vmem:[#allocation3 + $0x24] sm:$0xff]  ;;  %572 = vst.msk [vmem:[#allocation3 + $0x30] sm:$0xf] %vm567_vm7, %v528_v11  ;;  %v417_v55 = vshll.u32 %v193_v45, 16  ;;  %v4945_v58 = vld [vmem:[%s8345_s0 + $0x1a0] sm:$0xf] }
  0xb6   :  { %475 = vst.msk [vmem:[#allocation3 + $0x3c] sm:$0xf] %vm469_vm6, %v432_v8  ;;  %v5013_v16 = vcombine.low %v1489_v61, %v1490_v9  ;;  %v4976_v56 = vld [vmem:[%s8345_s0 + $0x108] sm:$0xf]  ;;  %v414_v57 = vor.u32 %v413_v48, %v410_v46  ;;  %v914_v60 = vshll.u32 %v4943_v54, 16  ;;  %v401_v63 = vrot.slane %v400_v52, 4 }
  0xb7   :  { %545 = vrot.lane.b32.xlu1 %v4896_v59, %s5392_s9  ;;  %641 = vrot.lane.b32.xlu0 %v4911_v47, %s5395_s16  ;;  %v911_v59 = vshrl.u32 %v4943_v54, 16  ;;  %v4881_v62 = vld [vmem:[%s8345_s0 + $0x108] sm:$0xf]  ;;  %v405_v0 = vrot.slane %v403_v53, 5  ;;  %v419_v1 = vrot.slane %v417_v55, 5  ;;  %v925_v2 = vshrl.u32 %v4945_v58, 16 }
  0xb8   :  { %1713 = vmatmul.mubr.bf16.gmra.mxu0 %v5013_v16  ;;  %v626_v28 = vpop.permute.xlu0 %625  ;;  %v4882_v3 = vld [vmem:[%s8345_s0 + $0x110] sm:$0xf]  ;;  %v415_v4 = vrot.slane %v414_v57, 4  ;;  %v928_v5 = vshll.u32 %v4945_v58, 16  ;;  %v916_v7 = vrot.slane %v914_v60, 5  ;;  %vm1972_vm13 = vcmask 253952  }
  0xb9   :  { %v530_v27 = vpop.permute.xlu1 %529  ;;  %670 = vst.msk [vmem:[#allocation3 + $0x30] sm:$0xf] %vm665_vm8, %v626_v28  ;;  %v913_v6 = vrot.slane %v911_v59, 4  ;;  %v406_v10 = vsel %vm5480_vm2, %v401_v63, %v405_v0  ;;  %v4944_v11 = vld [vmem:[%s8345_s0 + $0x19c] sm:$0x1]  ;;  %v927_v13 = vrot.slane %v925_v2, 4 }
  0xba   :  { %573 = vst.msk [vmem:[#allocation3 + $0x3c] sm:$0xf] %vm567_vm7, %v530_v27  ;;  %v4946_v12 = vld [vmem:[%s8345_s0 + $0x1a4] sm:$0x1]  ;;  %v420_v14 = vsel %vm5480_vm2, %v415_v4, %v419_v1  ;;  %v930_v15 = vrot.slane %v928_v5, 5  ;;  %v920_v17 = vshll.u32 %v4944_v11, 16 }
  0xbb   :  { %643 = vrot.lane.b32.xlu1 %v4912_v23, %s5395_s16  ;;  %962 = vrot.lane.b32.xlu0 %v895_v29, %s5397_s25  ;;  %v917_v16 = vor.u32 %v916_v7, %v913_v6  ;;  %v5007_v18 = vld [vmem:[%s8345_s0 + $0x80] sm:$0xf]  ;;  %v5009_v19 = vld [vmem:[%s8345_s0 + $0x88] sm:$0xf]  ;;  %v934_v30 = vshll.u32 %v4946_v12, 16 }
  0xbc   :  { %v947_v22 = vpop.permute.xlu0 %946  ;;  %v4897_v24 = vld [vmem:[%s8345_s0 + $0x198] sm:$0xf]  ;;  %v1428_v25 = vshrl.u32 %v5007_v18, 16  ;;  %v1431_v26 = vshll.u32 %v5007_v18, 16  ;;  %v1442_v27 = vshrl.u32 %v5009_v19, 16  ;;  %v1445_v28 = vshll.u32 %v5009_v19, 16 }
  0xbd   :  { %v628_v40 = vpop.permute.xlu1 %627  ;;  %991 = vst.msk [vmem:[#allocation3 + $0x30] sm:$0xf] %vm986_vm9, %v947_v22  ;;  %v4898_v29 = vld [vmem:[%s8345_s0 + $0x1a0] sm:$0xf]  ;;  %v4913_v33 = vld [vmem:[%s8345_s0 + $0x228] sm:$0xf]  ;;  %v931_v38 = vor.u32 %v930_v15, %v927_v13 }
  0xbe   :  { %671 = vst.msk [vmem:[#allocation3 + $0x3c] sm:$0xf] %vm665_vm8, %v628_v40  ;;  %v1430_v34 = vrot.slane %v1428_v25, 4  ;;  %v1444_v36 = vrot.slane %v1442_v27, 4  ;;  %v1447_v37 = vrot.slane %v1445_v28, 5  ;;  %v918_v39 = vrot.slane %v917_v16, 4 }
  0xbf   :  { %964 = vrot.lane.b32.xlu1 %v909_v35, %s5397_s25  ;;  %1060 = vrot.lane.b32.xlu0 %v4959_v41, %s5398_s15  ;;  %v1433_v35 = vrot.slane %v1431_v26, 5  ;;  %v922_v40 = vrot.slane %v920_v17, 5  ;;  %v5008_v22 = vld [vmem:[%s8345_s0 + $0x84] sm:$0x1]  ;;  %v5010_v41 = vld [vmem:[%s8345_s0 + $0x8c] sm:$0x1] }
  0xc0   :  { %v1045_v50 = vpop.permute.xlu0 %1044  ;;  %v5310_v43 = vld [vmem:[#allocation3 + $0x34] ss:$12 sps:$4 sm:$0xff]   ;;  %v1437_v46 = vshll.u32 %v5008_v22, 16  ;;  %v1448_v48 = vor.u32 %v1447_v37, %v1444_v36  ;;  %v4914_v55 = vld [vmem:[%s8345_s0 + $0x230] sm:$0xf]  ;;  %v936_v57 = vrot.slane %v934_v30, 5 }
  0xc1   :  { %v949_v49 = vpop.permute.xlu1 %948  ;;  %1089 = vst.msk [vmem:[#allocation3 + $0x30] sm:$0xf] %vm1084_vm10, %v1045_v50  ;;  %v1434_v45 = vor.u32 %v1433_v35, %v1430_v34  ;;  %5038 = vmatprep.mubr.msk.bf16.mxu0 %vm1647_vm12, %v5310_v43  ;;  %v923_v60 = vsel %vm5480_vm2, %v918_v39, %v922_v40  ;;  %v4961_v1 = vld [vmem:[%s8345_s0 + $0x80] sm:$0xf]  ;;  %v4962_v2 = vld [vmem:[%s8345_s0 + $0x88] sm:$0xf] }
  0xc2   :  { %992 = vst.msk [vmem:[#allocation3 + $0x3c] sm:$0xf] %vm986_vm9, %v949_v49  ;;  %v1451_v49 = vshll.u32 %v5010_v41, 16  ;;  %v1439_v52 = vrot.slane %v1437_v46, 5  ;;  %v1449_v53 = vrot.slane %v1448_v48, 4 }
  0xc3   :  { %1062 = vrot.lane.b32.xlu1 %v4960_v44, %s5398_s15  ;;  %1158 = vrot.lane.b32.xlu0 %v4975_v51, %s5399_s28  ;;  %v1435_v51 = vrot.slane %v1434_v45, 4  ;;  %v4977_v5 = vld [vmem:[%s8345_s0 + $0x110] sm:$0xf]  ;;  %v4978_v6 = vld [vmem:[%s8345_s0 + $0x118] sm:$0xf] }
  0xc4   :  { %v1143_v47 = vpop.permute.xlu0 %1142  ;;  %v1453_v54 = vrot.slane %v1451_v49, 5  ;;  %v5312_v16 = vld [vmem:[#allocation3 + $0x4c] ss:$12 sps:$4 sm:$0xff]   ;;  %vm1973_vm14 = vsmask.f32 256 }
  0xc5   :  { %v1047_v61 = vpop.permute.xlu1 %1046  ;;  %1187 = vst.msk [vmem:[#allocation3 + $0x30] sm:$0xf] %vm1182_vm11, %v1143_v47  ;;  %vm2023_vm15 = vsmask.f32 7938  ;;  %vm6494_vm0 = vmand %vm1972_vm13, %vm1973_vm14 }
  0xc6   :  { %1090 = vst.msk [vmem:[#allocation3 + $0x3c] sm:$0xf] %vm1084_vm10, %v1047_v61  ;;  %v1440_v61 = vsel %vm5480_vm2, %v1435_v51, %v1439_v52  ;;  %v1454_v47 = vsel %vm5480_vm2, %v1449_v53, %v1453_v54  ;;  %vm6501_vm1 = vmand %vm1972_vm13, %vm2023_vm15 }
  0xc7   :  { %1160 = vrot.lane.b32.xlu1 %v4976_v56, %s5399_s28  ;;  %125 = vrot.lane.b32.xlu0 %v4881_v62, %s5393_s10  ;;  %v932_v56 = vrot.slane %v931_v38, 4  ;;  %1485 = vst.msk [vmem:[#allocation3 + $0xac] sm:$0xf] %vm47_vm4, %v1440_v61  ;;  %1486 = vst.msk [vmem:[#allocation3 + $0xb8] sm:$0xf] %vm47_vm4, %v1454_v47  ;;  %vm2812_vm4 = vcmask 1042432  }
  0xc8   :  { %v110_v9 = vpop.permute.xlu0 %109 }
  0xc9   :  { %v1145_v8 = vpop.permute.xlu1 %1144  ;;  %152 = vst.msk [vmem:[#allocation3 + $0x48] sm:$0xf] %vm145_vm5, %v110_v9  ;;  %v937_v62 = vsel %vm5480_vm2, %v932_v56, %v936_v57 }
  0xca   :  { %1188 = vst.msk [vmem:[#allocation3 + $0x3c] sm:$0xf] %vm1182_vm11, %v1145_v8 }
  0xcb   :  { %127 = vrot.lane.b32.xlu1 %v4882_v3, %s5393_s10  ;;  %449 = vrot.lane.b32.xlu0 %v406_v10, %s5394_s13 }
  0xcc   :  { %v434_v23 = vpop.permute.xlu0 %433  ;;  %v1491_v32 = vld [vmem:[#allocation3 + $0x30] sm:$0xff] }
  0xcd   :  { %v112_v21 = vpop.permute.xlu1 %111  ;;  %476 = vst.msk [vmem:[#allocation3 + $0x48] sm:$0xf] %vm469_vm6, %v434_v23 }
  0xce   :  { %153 = vst.msk [vmem:[#allocation3 + $0x54] sm:$0xf] %vm145_vm5, %v112_v21 }
  0xcf   :  { %451 = vrot.lane.b32.xlu1 %v420_v14, %s5394_s13  ;;  %547 = vrot.lane.b32.xlu0 %v4897_v24, %s5392_s9 }
  0xd0   :  { %v532_v44 = vpop.permute.xlu0 %531 }
  0xd1   :  { %v436_v31 = vpop.permute.xlu1 %435  ;;  %v1492_v42 = vld [vmem:[#allocation3 + $0x3c] sm:$0xff]  ;;  %574 = vst.msk [vmem:[#allocation3 + $0x48] sm:$0xf] %vm567_vm7, %v532_v44 }
  0xd2   :  { %477 = vst.msk [vmem:[#allocation3 + $0x54] sm:$0xf] %vm469_vm6, %v436_v31  ;;  %v5015_v50 = vcombine.low %v1491_v32, %v1492_v42  ;;  %v2403_v32 = vld [vmem:[#allocation2 + $0x50] sm:$0xf] }
  0xd3   :  { %549 = vrot.lane.b32.xlu1 %v4898_v29, %s5392_s9  ;;  %645 = vrot.lane.b32.xlu0 %v4913_v33, %s5395_s16 }
  0xd4   :  { %1721 = vmatmul.mubr.bf16.gmra.mxu0 %v5015_v50  ;;  %v630_v59 = vpop.permute.xlu0 %629 }
  0xd5   :  { %v534_v58 = vpop.permute.xlu1 %533  ;;  %672 = vst.msk [vmem:[#allocation3 + $0x48] sm:$0xf] %vm665_vm8, %v630_v59  ;;  %5039 = vmatprep.mubr.msk.bf16.mxu0 %vm1647_vm12, %v5312_v16 }
  0xd6   :  { %575 = vst.msk [vmem:[#allocation3 + $0x54] sm:$0xf] %vm567_vm7, %v534_v58 }
  0xd7   :  { %647 = vrot.lane.b32.xlu1 %v4914_v55, %s5395_s16  ;;  %966 = vrot.lane.b32.xlu0 %v923_v60, %s5397_s25  ;;  %v5314_v55 = vld [vmem:[#allocation3 + $0x7c] ss:$12 sps:$4 sm:$0xff]  }
  0xd8   :  { %v951_v0 = vpop.permute.xlu0 %950 }
  0xd9   :  { %v632_v63 = vpop.permute.xlu1 %631  ;;  %993 = vst.msk [vmem:[#allocation3 + $0x48] sm:$0xf] %vm986_vm9, %v951_v0 }
  0xda   :  { %673 = vst.msk [vmem:[#allocation3 + $0x54] sm:$0xf] %vm665_vm8, %v632_v63 }
  0xdb   :  { %968 = vrot.lane.b32.xlu1 %v937_v62, %s5397_s25  ;;  %1064 = vrot.lane.b32.xlu0 %v4961_v1, %s5398_s15 }
  0xdc   :  { %v1049_v4 = vpop.permute.xlu0 %1048 }
  0xdd   :  { %v953_v3 = vpop.permute.xlu1 %952  ;;  %1091 = vst.msk [vmem:[#allocation3 + $0x48] sm:$0xf] %vm1084_vm10, %v1049_v4 }
  0xde   :  { %994 = vst.msk [vmem:[#allocation3 + $0x54] sm:$0xf] %vm986_vm9, %v953_v3 }
  0xdf   :  { %1066 = vrot.lane.b32.xlu1 %v4962_v2, %s5398_s15  ;;  %1162 = vrot.lane.b32.xlu0 %v4977_v5, %s5399_s28 }
  0xe0   :  { %v1147_v8 = vpop.permute.xlu0 %1146 }
  0xe1   :  { %v1051_v7 = vpop.permute.xlu1 %1050  ;;  %1189 = vst.msk [vmem:[#allocation3 + $0x48] sm:$0xf] %vm1182_vm11, %v1147_v8  ;;  %v5316_v8 = vld [vmem:[#allocation3 + $0x94] ss:$12 sps:$4 sm:$0xff]  }
  0xe2   :  { %1092 = vst.msk [vmem:[#allocation3 + $0x54] sm:$0xf] %vm1084_vm10, %v1051_v7 }
  0xe3   :  { %1164 = vrot.lane.b32.xlu1 %v4978_v6, %s5399_s28 }
  0xe4   :  { %v114_v10 = vpop.permute.xlu0 %113 }
  0xe5   :  { %v1149_v9 = vpop.permute.xlu1 %1148  ;;  %154 = vst.msk [vmem:[#allocation3 + $0x60] sm:$0xf] %vm145_vm5, %v114_v10 }
  0xe6   :  { %1190 = vst.msk [vmem:[#allocation3 + $0x54] sm:$0xf] %vm1182_vm11, %v1149_v9 }
  0xe8   :  { %v438_v12 = vpop.permute.xlu0 %437  ;;  %v1493_v13 = vld [vmem:[#allocation3 + $0x48] sm:$0xff] }
  0xe9   :  { %v116_v11 = vpop.permute.xlu1 %115  ;;  %478 = vst.msk [vmem:[#allocation3 + $0x60] sm:$0xf] %vm469_vm6, %v438_v12 }
  0xea   :  { %155 = vst.msk [vmem:[#allocation3 + $0x6c] sm:$0xf] %vm145_vm5, %v116_v11 }
  0xec   :  { %v536_v17 = vpop.permute.xlu0 %535 }
  0xed   :  { %v440_v14 = vpop.permute.xlu1 %439  ;;  %v1494_v15 = vld [vmem:[#allocation3 + $0x54] sm:$0xff]  ;;  %576 = vst.msk [vmem:[#allocation3 + $0x60] sm:$0xf] %vm567_vm7, %v536_v17 }
  0xee   :  { %479 = vst.msk [vmem:[#allocation3 + $0x6c] sm:$0xf] %vm469_vm6, %v440_v14  ;;  %v5017_v18 = vcombine.low %v1493_v13, %v1494_v15 }
  0xf0   :  { %1729 = vmatmul.mubr.bf16.gmra.mxu0 %v5017_v18  ;;  %v634_v21 = vpop.permute.xlu0 %633 }
  0xf1   :  { %v538_v19 = vpop.permute.xlu1 %537  ;;  %674 = vst.msk [vmem:[#allocation3 + $0x60] sm:$0xf] %vm665_vm8, %v634_v21 }
  0xf2   :  { %577 = vst.msk [vmem:[#allocation3 + $0x6c] sm:$0xf] %vm567_vm7, %v538_v19 }
  0xf4   :  { %v955_v24 = vpop.permute.xlu0 %954 }
  0xf5   :  { %v636_v23 = vpop.permute.xlu1 %635  ;;  %995 = vst.msk [vmem:[#allocation3 + $0x60] sm:$0xf] %vm986_vm9, %v955_v24 }
  0xf6   :  { %675 = vst.msk [vmem:[#allocation3 + $0x6c] sm:$0xf] %vm665_vm8, %v636_v23  ;;  %v5318_v23 = vld [vmem:[#allocation3 + $0xac] ss:$12 sps:$4 sm:$0xff]  }
  0xf8   :  { %v1053_v26 = vpop.permute.xlu0 %1052 }
  0xf9   :  { %v957_v25 = vpop.permute.xlu1 %956  ;;  %1093 = vst.msk [vmem:[#allocation3 + $0x60] sm:$0xf] %vm1084_vm10, %v1053_v26 }
  0xfa   :  { %996 = vst.msk [vmem:[#allocation3 + $0x6c] sm:$0xf] %vm986_vm9, %v957_v25 }
  0xfd   :  { %v1055_v27 = vpop.permute.xlu1 %1054  ;;  %v1151_v28 = vpop.permute.xlu0 %1150 }
  0xfe   :  { %1094 = vst.msk [vmem:[#allocation3 + $0x6c] sm:$0xf] %vm1084_vm10, %v1055_v27 }
  0xff   :  { %1191 = vst.msk [vmem:[#allocation3 + $0x60] sm:$0xf] %vm1182_vm11, %v1151_v28 }
 0x101   :  { %v1153_v29 = vpop.permute.xlu1 %1152  ;;  %v118_v30 = vpop.permute.xlu0 %117 }
 0x102   :  { %1192 = vst.msk [vmem:[#allocation3 + $0x6c] sm:$0xf] %vm1182_vm11, %v1153_v29 }
 0x103   :  { %156 = vst.msk [vmem:[#allocation3 + $0x78] sm:$0xf] %vm145_vm5, %v118_v30 }
 0x105   :  { %v120_v34 = vpop.permute.xlu1 %119  ;;  %v442_v35 = vpop.permute.xlu0 %441 }
 0x106   :  { %v1495_v33 = vld [vmem:[#allocation3 + $0x60] sm:$0xff]  ;;  %157 = vst.msk [vmem:[#allocation3 + $0x84] sm:$0xf] %vm145_vm5, %v120_v34 }
 0x107   :  { %2419 = vst.msk [vmem:[#allocation3 + $0x60] sm:$0xf] %vm1961_vm3, %v2403_v32 }
 0x108   :  { %480 = vst.msk [vmem:[#allocation3 + $0x78] sm:$0xf] %vm469_vm6, %v442_v35 }
 0x109   :  { %v444_v36 = vpop.permute.xlu1 %443  ;;  %v1496_v37 = vld [vmem:[#allocation3 + $0x6c] sm:$0xff]  ;;  %v540_v38 = vpop.permute.xlu0 %539 }
 0x10a   :  { %481 = vst.msk [vmem:[#allocation3 + $0x84] sm:$0xf] %vm469_vm6, %v444_v36  ;;  %v5020_v39 = vcombine.high %v1495_v33, %v1496_v37  ;;  %v5019_v40 = vcombine.low %v1495_v33, %v1496_v37 }
 0x10b   :  { %578 = vst.msk [vmem:[#allocation3 + $0x78] sm:$0xf] %vm567_vm7, %v540_v38 }
 0x10c   :  { %5040 = vmatprep.mubr.msk.bf16.mxu0 %vm1647_vm12, %v5020_v39 }
 0x10d   :  { %v542_v22 = vpop.permute.xlu1 %541  ;;  %1737 = vmatmul.mubr.bf16.gmra.mxu0 %v5019_v40  ;;  %v638_v41 = vpop.permute.xlu0 %637 }
 0x10e   :  { %579 = vst.msk [vmem:[#allocation3 + $0x84] sm:$0xf] %vm567_vm7, %v542_v22  ;;  %5041 = vmatprep.mubr.msk.bf16.mxu0 %vm1647_vm12, %v5314_v55  ;;  %v2443_v22 = vld [vmem:[#allocation2 + $0x50] sm:$0xf]  ;;  %v2070_v55 = vld [vmem:[#allocation2 + $0x94] sm:$0x1] }
 0x10f   :  { %676 = vst.msk [vmem:[#allocation3 + $0x78] sm:$0xf] %vm665_vm8, %v638_v41  ;;  %v2572_v41 = vshrl.u32 %v2443_v22, 16 }
 0x111   :  { %v640_v31 = vpop.permute.xlu1 %639  ;;  %v959_v42 = vpop.permute.xlu0 %958 }
 0x112   :  { %677 = vst.msk [vmem:[#allocation3 + $0x84] sm:$0xf] %vm665_vm8, %v640_v31  ;;  %v2575_v31 = vshll.u32 %v2443_v22, 16 }
 0x113   :  { %997 = vst.msk [vmem:[#allocation3 + $0x78] sm:$0xf] %vm986_vm9, %v959_v42 }
 0x115   :  { %v961_v43 = vpop.permute.xlu1 %960  ;;  %v1057_v44 = vpop.permute.xlu0 %1056 }
 0x116   :  { %998 = vst.msk [vmem:[#allocation3 + $0x84] sm:$0xf] %vm986_vm9, %v961_v43  ;;  %v2574_v43 = vrot.slane %v2572_v41, 4  ;;  %v3649_v41 = vld [vmem:[#allocation2 + $0x9c] sm:$0x1] }
 0x117   :  { %1095 = vst.msk [vmem:[#allocation3 + $0x78] sm:$0xf] %vm1084_vm10, %v1057_v44  ;;  %v2577_v44 = vrot.slane %v2575_v31, 5 }
 0x119   :  { %v1059_v45 = vpop.permute.xlu1 %1058  ;;  %v1155_v46 = vpop.permute.xlu0 %1154 }
 0x11a   :  { %1096 = vst.msk [vmem:[#allocation3 + $0x84] sm:$0xf] %vm1084_vm10, %v1059_v45 }
 0x11b   :  { %1193 = vst.msk [vmem:[#allocation3 + $0x78] sm:$0xf] %vm1182_vm11, %v1155_v46  ;;  %v2444_v46 = vld [vmem:[#allocation2 + $0x54] sm:$0x1] }
 0x11d   :  { %v1157_v48 = vpop.permute.xlu1 %1156  ;;  %v122_v49 = vpop.permute.xlu0 %121 }
 0x11e   :  { %1194 = vst.msk [vmem:[#allocation3 + $0x84] sm:$0xf] %vm1182_vm11, %v1157_v48  ;;  %v3632_v48 = vld [vmem:[#allocation2 + $0x48] sm:$0xf] }
 0x11f   :  { %158 = vst.msk [vmem:[#allocation3 + $0x90] sm:$0xf] %vm145_vm5, %v122_v49  ;;  %v2578_v49 = vor.u32 %v2577_v44, %v2574_v43 }
 0x121   :  { %v124_v50 = vpop.permute.xlu1 %123  ;;  %v446_v51 = vpop.permute.xlu0 %445 }
 0x122   :  { %159 = vst.msk [vmem:[#allocation3 + $0x9c] sm:$0xf] %vm145_vm5, %v124_v50  ;;  %v1497_v52 = vld [vmem:[#allocation3 + $0x78] sm:$0xff]  ;;  %v2581_v50 = vshll.u32 %v2444_v46, 16 }
 0x123   :  { %482 = vst.msk [vmem:[#allocation3 + $0x90] sm:$0xf] %vm469_vm6, %v446_v51  ;;  %v3749_v51 = vshrl.u32 %v3632_v48, 16 }
 0x125   :  { %v448_v53 = vpop.permute.xlu1 %447  ;;  %v1498_v54 = vld [vmem:[#allocation3 + $0x84] sm:$0xff]  ;;  %v544_v56 = vpop.permute.xlu0 %543 }
 0x126   :  { %483 = vst.msk [vmem:[#allocation3 + $0x9c] sm:$0xf] %vm469_vm6, %v448_v53  ;;  %v5021_v57 = vcombine.low %v1497_v52, %v1498_v54  ;;  %v2020_v54 = vld [vmem:[#allocation2 + $0x90] sm:$0x1] }
 0x127   :  { %580 = vst.msk [vmem:[#allocation3 + $0x90] sm:$0xf] %vm567_vm7, %v544_v56  ;;  %v2579_v56 = vrot.slane %v2578_v49, 4 }
 0x128   :  { %1745 = vmatmul.mubr.bf16.gmra.mxu0 %v5021_v57 }
 0x129   :  { %v546_v58 = vpop.permute.xlu1 %545  ;;  %v642_v59 = vpop.permute.xlu0 %641  ;;  %5042 = vmatprep.mubr.msk.bf16.mxu0 %vm1647_vm12, %v5316_v8  ;;  %v1987_v8 = vld [vmem:[#allocation2 + $0x28] sm:$0x1] }
 0x12a   :  { %581 = vst.msk [vmem:[#allocation3 + $0x9c] sm:$0xf] %vm567_vm7, %v546_v58  ;;  %v2021_v58 = vsel %vm6494_vm0, 0, %v2020_v54 }
 0x12b   :  { %678 = vst.msk [vmem:[#allocation3 + $0x90] sm:$0xf] %vm665_vm8, %v642_v59  ;;  %2022 = vst [vmem:[#allocation2 + $0x90] sm:$0x1] %v2021_v58 }
 0x12d   :  { %v644_v60 = vpop.permute.xlu1 %643  ;;  %v963_v61 = vpop.permute.xlu0 %962 }
 0x12e   :  { %679 = vst.msk [vmem:[#allocation3 + $0x9c] sm:$0xf] %vm665_vm8, %v644_v60  ;;  %v2583_v60 = vrot.slane %v2581_v50, 5  ;;  %v2748_v50 = vld [vmem:[#allocation2] sm:$0xe] }
 0x12f   :  { %999 = vst.msk [vmem:[#allocation3 + $0x90] sm:$0xf] %vm986_vm9, %v963_v61  ;;  %v3633_v61 = vld [vmem:[#allocation2 + $0x4c] sm:$0x1] }
 0x131   :  { %v965_v47 = vpop.permute.xlu1 %964  ;;  %v1061_v62 = vpop.permute.xlu0 %1060 }
 0x132   :  { %1000 = vst.msk [vmem:[#allocation3 + $0x9c] sm:$0xf] %vm986_vm9, %v965_v47  ;;  %v2071_v47 = vsel %vm6501_vm1, 0, %v2070_v55 }
 0x133   :  { %1097 = vst.msk [vmem:[#allocation3 + $0x90] sm:$0xf] %vm1084_vm10, %v1061_v62  ;;  %v3529_v62 = vld [vmem:[#allocation2 + $0x48] sm:$0xf]  ;;  %2072 = vst [vmem:[#allocation2 + $0x94] sm:$0x1] %v2071_v47 }
 0x134   :  { %3568 = vrot.lane.b32.xlu1 %v3529_v62, %s5395_s16  ;;  %v1996_v62 = vld [vmem:[#allocation2 + $0x40] sm:$0x1] }
 0x135   :  { %v1063_v63 = vpop.permute.xlu1 %1062  ;;  %v1159_v0 = vpop.permute.xlu0 %1158 }
 0x136   :  { %1098 = vst.msk [vmem:[#allocation3 + $0x9c] sm:$0xf] %vm1084_vm10, %v1063_v63  ;;  %v3751_v63 = vrot.slane %v3749_v51, 4  ;;  %v2749_v51 = vld [vmem:[#allocation2 + $0x4] sm:$0x1] }
 0x137   :  { %1195 = vst.msk [vmem:[#allocation3 + $0x90] sm:$0xf] %vm1182_vm11, %v1159_v0  ;;  %v3752_v0 = vshll.u32 %v3632_v48, 16  ;;  %v3870_v48 = vshll.u32 %v3649_v41, 16  ;;  %v2817_v58 = vrot.slane %v2749_v51, 5 }
 0x138   :  { %v2028_v41 = vld [vmem:[#allocation2 + $0x14] sm:$0x1]  ;;  %v2049_v51 = vld [vmem:[#allocation2 + $0x5c] sm:$0x1] }
 0x139   :  { %v1161_v1 = vpop.permute.xlu1 %1160  ;;  %v126_v2 = vpop.permute.xlu0 %125 }
 0x13a   :  { %1196 = vst.msk [vmem:[#allocation3 + $0x9c] sm:$0xf] %vm1182_vm11, %v1161_v1  ;;  %v3758_v1 = vshll.u32 %v3633_v61, 16 }
 0x13b   :  { %160 = vst.msk [vmem:[#allocation3 + $0xa8] sm:$0xf] %vm145_vm5, %v126_v2  ;;  %v2584_v2 = vsel %vm5480_vm2, %v2579_v56, %v2583_v60  ;;  %v3872_v56 = vrot.slane %v3870_v48, 5  ;;  %v1990_v60 = vld [vmem:[#allocation2 + $0x30] sm:$0x1] }
 0x13c   :  { %2699 = vrot.lane.b32.xlu0 %v2584_v2, %s5394_s13  ;;  %v1991_v47 = vsel %vm6494_vm0, 0, %v1990_v60  ;;  %v2052_v48 = vld [vmem:[#allocation2 + $0x64] sm:$0x1] }
 0x13d   :  { %v128_v3 = vpop.permute.xlu1 %127  ;;  %v450_v4 = vpop.permute.xlu0 %449  ;;  %1992 = vst [vmem:[#allocation2 + $0x30] sm:$0x1] %v1991_v47  ;;  %v2061_v47 = vld [vmem:[#allocation2 + $0x7c] sm:$0x1] }
 0x13e   :  { %161 = vst.msk [vmem:[#allocation3 + $0xb4] sm:$0xf] %vm145_vm5, %v128_v3  ;;  %v1499_v5 = vld [vmem:[#allocation3 + $0x90] sm:$0xff]  ;;  %vm2813_vm5 = vcmask 1046532  }
 0x13f   :  { %484 = vst.msk [vmem:[#allocation3 + $0xa8] sm:$0xf] %vm469_vm6, %v450_v4  ;;  %v2764_v3 = vld [vmem:[#allocation2 + $0x50] sm:$0xe]  ;;  %v2765_v4 = vld [vmem:[#allocation2 + $0x54] sm:$0x1] }
 0x141   :  { %v452_v6 = vpop.permute.xlu1 %451  ;;  %v1500_v7 = vld [vmem:[#allocation3 + $0x9c] sm:$0xff]  ;;  %v548_v9 = vpop.permute.xlu0 %547 }
 0x142   :  { %485 = vst.msk [vmem:[#allocation3 + $0xb4] sm:$0xf] %vm469_vm6, %v452_v6  ;;  %v5023_v10 = vcombine.low %v1499_v5, %v1500_v7  ;;  %v2427_v5 = vld [vmem:[#allocation2] sm:$0xf]  ;;  %v3754_v6 = vrot.slane %v3752_v0, 5  ;;  %v3760_v7 = vrot.slane %v3758_v1, 5  ;;  %vm6511_vm6 = vmor %vm2812_vm4, %vm2813_vm5 }
 0x143   :  { %582 = vst.msk [vmem:[#allocation3 + $0xa8] sm:$0xf] %vm567_vm7, %v548_v9  ;;  %v8376_v9 = vmov 0  ;;  %v1997_v1 = vsel %vm6494_vm0, 0, %v1996_v62  ;;  %v2067_v62 = vld [vmem:[#allocation2 + $0x8c] sm:$0x1] }
 0x144   :  { %1753 = vmatmul.mubr.bf16.gmra.mxu0 %v5023_v10  ;;  %v8377_v9 = vsel %vm6511_vm6, 4294967295, %v8376_v9  ;;  %v5070_v10 = vrot.slane %v2764_v3, 9  ;;  %1998 = vst [vmem:[#allocation2 + $0x40] sm:$0x1] %v1997_v1 }
 0x145   :  { %v550_v11 = vpop.permute.xlu1 %549  ;;  %v646_v12 = vpop.permute.xlu0 %645  ;;  %5043 = vmatprep.mubr.msk.bf16.mxu0 %vm1647_vm12, %v5318_v23  ;;  %8378 = vst [vmem:[#allocation7_spill] sm:$0xff] %v8377_v9 }
 0x146   :  { %583 = vst.msk [vmem:[#allocation3 + $0xb4] sm:$0xf] %vm567_vm7, %v550_v11  ;;  %v2849_v11 = vrot.slane %v2765_v4, 5  ;;  %vm1771_vm7 = vcmask 261120  }
 0x147   :  { %680 = vst.msk [vmem:[#allocation3 + $0xa8] sm:$0xf] %vm665_vm8, %v646_v12  ;;  %v2428_v12 = vld [vmem:[#allocation2 + $0x4] sm:$0x1] }
 0x148   :  { %v2850_v23 = vsel %vm6511_vm6, %v5070_v10, %v2849_v11  ;;  %v1999_v10 = vld [vmem:[#allocation2 + $0x58] sm:$0x1] }
 0x149   :  { %v648_v13 = vpop.permute.xlu1 %647  ;;  %v967_v14 = vpop.permute.xlu0 %966  ;;  %2895 = vrot.lane.b32.xlu0 %v2850_v23, %s5395_s16  ;;  %v2014_v23 = vld [vmem:[#allocation2 + $0x80] sm:$0x1] }
 0x14a   :  { %681 = vst.msk [vmem:[#allocation3 + $0xb4] sm:$0xf] %vm665_vm8, %v648_v13  ;;  %v2460_v13 = vshrl.u32 %v2427_v5, 16  ;;  %vm2731_vm8 = vcmask 519424  }
 0x14b   :  { %1001 = vst.msk [vmem:[#allocation3 + $0xa8] sm:$0xf] %vm986_vm9, %v967_v14  ;;  %v2463_v14 = vshll.u32 %v2427_v5, 16  ;;  %v2002_v5 = vld [vmem:[#allocation2 + $0x60] sm:$0x1] }
 0x14d   :  { %v969_v15 = vpop.permute.xlu1 %968  ;;  %v1065_v16 = vpop.permute.xlu0 %1064 }
 0x14e   :  { %1002 = vst.msk [vmem:[#allocation3 + $0xb4] sm:$0xf] %vm986_vm9, %v969_v15  ;;  %v3755_v15 = vor.u32 %v3754_v6, %v3751_v63  ;;  %v2005_v63 = vld [vmem:[#allocation2 + $0x68] sm:$0x1]  ;;  %v2011_v6 = vld [vmem:[#allocation2 + $0x78] sm:$0x1] }
 0x14f   :  { %1099 = vst.msk [vmem:[#allocation3 + $0xa8] sm:$0xf] %vm1084_vm10, %v1065_v16  ;;  %v2469_v16 = vshll.u32 %v2428_v12, 16  ;;  %v2006_v2 = vsel %vm6494_vm0, 0, %v2005_v63  ;;  %v2000_v12 = vsel %vm6494_vm0, 0, %v1999_v10  ;;  %v2062_v63 = vsel %vm6501_vm1, 0, %v2061_v47 }
 0x150   :  { %2007 = vst [vmem:[#allocation2 + $0x68] sm:$0x1] %v2006_v2  ;;  %2001 = vst [vmem:[#allocation2 + $0x58] sm:$0x1] %v2000_v12  ;;  %vm2927_vm9 = vcmask 781824  }
 0x151   :  { %v1067_v17 = vpop.permute.xlu1 %1066  ;;  %v1163_v18 = vpop.permute.xlu0 %1162  ;;  %v2471_v22 = vrot.slane %v2469_v16, 5  ;;  %2063 = vst [vmem:[#allocation2 + $0x7c] sm:$0x1] %v2062_v63 }
 0x152   :  { %1100 = vst.msk [vmem:[#allocation3 + $0xb4] sm:$0xf] %vm1084_vm10, %v1067_v17  ;;  %v3648_v17 = vld [vmem:[#allocation2 + $0x98] sm:$0xf]  ;;  %vm6751_vm10 = vmand %vm1961_vm3, %vm2023_vm15 }
 0x153   :  { %1197 = vst.msk [vmem:[#allocation3 + $0xa8] sm:$0xf] %vm1182_vm11, %v1163_v18  ;;  %v1988_v18 = vsel %vm6494_vm0, 0, %v1987_v8  ;;  %v2012_v8 = vsel %vm6494_vm0, 0, %v2011_v6 }
 0x154   :  { %1989 = vst [vmem:[#allocation2 + $0x28] sm:$0x1] %v1988_v18  ;;  %2013 = vst [vmem:[#allocation2 + $0x78] sm:$0x1] %v2012_v8 }
 0x155   :  { %v1165_v19 = vpop.permute.xlu1 %1164 }
 0x156   :  { %1198 = vst.msk [vmem:[#allocation3 + $0xb4] sm:$0xf] %vm1182_vm11, %v1165_v19  ;;  %v1984_v19 = vld [vmem:[#allocation2 + $0x20] sm:$0x1]  ;;  %vm3024_vm11 = vcmask 1044224  }
 0x15d   :  { %v6473_v21 = vpop.f32.mrf.mxu0  ;;  %v5320_v24 = vld [vmem:[#allocation3 + $0xa8] ss:$12 sps:$4 sm:$0xff]  }
 0x15e   :  { %1761 = vmatmul.mubr.bf16.gmra.mxu0 %v5320_v24  ;;  %v2462_v24 = vrot.slane %v2460_v13, 4  ;;  %v2008_v13 = vld [vmem:[#allocation2 + $0x70] sm:$0x1]  ;;  %v1772_v8 = vsel %vm1771_vm7, %v6473_v21, 0.0 }
 0x15f   :  { %v1708_v25 = vpop.f32.mrf.mxu0  ;;  %v2009_v16 = vsel %vm6494_vm0, 0, %v2008_v13 }
 0x160   :  { %v2465_v25 = vrot.slane %v2463_v14, 5  ;;  %v2017_v14 = vld [vmem:[#allocation2 + $0x88] sm:$0x1]  ;;  %2010 = vst [vmem:[#allocation2 + $0x70] sm:$0x1] %v2009_v16 }
 0x161   :  { %v6476_v26 = vpop.f32.mrf.mxu0 }
 0x162   :  { %v1810_v2 = vmul.f32 %v6476_v26, %v6476_v26 }
 0x163   :  { %v1711_v27 = vpop.f32.mrf.mxu0 }
 0x164   :  { %v3861_v27 = vshrl.u32 %v3648_v17, 16  ;;  %v1826_v10 = vsel %vm1771_vm7, %v1810_v2, 0.0 }
 0x166   :  { %v3863_v31 = vrot.slane %v3861_v27, 4  ;;  %v2031_v27 = vld [vmem:[#allocation2 + $0x1c] sm:$0x1] }
 0x178   :  { %v6478_v28 = vpop.f32.mrf.mxu0 }
 0x179   :  { %v1811_v6 = vmul.f32 %v6478_v28, %v6478_v28  ;;  %v1775_v12 = vsel %vm1771_vm7, %v6478_v28, 0.0 }
 0x17a   :  { %v1716_v29 = vpop.f32.mrf.mxu0 }
 0x17b   :  { %v1981_v29 = vld [vmem:[#allocation2 + $0x18] sm:$0x1] }
 0x17c   :  { %v6480_v30 = vpop.f32.mrf.mxu0  ;;  %v1982_v43 = vsel %vm6494_vm0, 0, %v1981_v29 }
 0x17d   :  { %1983 = vst [vmem:[#allocation2 + $0x18] sm:$0x1] %v1982_v43  ;;  %v2029_v43 = vsel %vm6501_vm1, 0, %v2028_v41  ;;  %v1812_v13 = vmul.f32 %v6480_v30, %v6480_v30  ;;  %v1975_v41 = vld [vmem:[#allocation2 + $0x8] sm:$0x1] }
 0x17e   :  { %v1719_v32 = vpop.f32.mrf.mxu0  ;;  %2030 = vst [vmem:[#allocation2 + $0x14] sm:$0x1] %v2029_v43 }
 0x17f   :  { %v3756_v32 = vrot.slane %v3755_v15, 4 }
 0x181   :  { %v3761_v44 = vsel %vm5480_vm2, %v3756_v32, %v3760_v7  ;;  %v2003_v7 = vsel %vm6494_vm0, 0, %v2002_v5  ;;  %v2032_v32 = vsel %vm6501_vm1, 0, %v2031_v27  ;;  %v1773_v5 = vsel %vm1771_vm7, %v6476_v26, 0.0 }
 0x182   :  { %3888 = vrot.lane.b32.xlu1 %v3761_v44, %s5398_s15  ;;  %2004 = vst [vmem:[#allocation2 + $0x60] sm:$0x1] %v2003_v7  ;;  %2033 = vst [vmem:[#allocation2 + $0x1c] sm:$0x1] %v2032_v32  ;;  %v2046_v44 = vld [vmem:[#allocation2 + $0x44] sm:$0x1] }
 0x183   :  { %v1830_v27 = vsel %vm1771_vm7, %v1812_v13, 0.0 }
 0x194   :  { %v6482_v33 = vpop.f32.mrf.mxu0 }
 0x196   :  { %v1724_v34 = vpop.f32.mrf.mxu0 }
 0x197   :  { %v3864_v34 = vshll.u32 %v3648_v17, 16  ;;  %v2018_v17 = vsel %vm6494_vm0, 0, %v2017_v14  ;;  %v1774_v14 = vadd.f32 %v1773_v5, %v1772_v8 }
 0x198   :  { %v6484_v35 = vpop.f32.mrf.mxu0  ;;  %2019 = vst [vmem:[#allocation2 + $0x88] sm:$0x1] %v2018_v17  ;;  %v1828_v17 = vsel %vm1771_vm7, %v1811_v6, 0.0 }
 0x199   :  { %v3866_v46 = vrot.slane %v3864_v34, 5  ;;  %v2040_v34 = vld [vmem:[#allocation2 + $0x34] sm:$0x1]  ;;  %v1814_v32 = vmul.f32 %v6484_v35, %v6484_v35 }
 0x19a   :  { %v1727_v36 = vpop.f32.mrf.mxu0 }
 0x19b   :  { %v1985_v36 = vsel %vm6494_vm0, 0, %v1984_v19  ;;  %v3867_v55 = vor.u32 %v3866_v46, %v3863_v31  ;;  %v2043_v46 = vld [vmem:[#allocation2 + $0x3c] sm:$0x1] }
 0x19c   :  { %1986 = vst [vmem:[#allocation2 + $0x20] sm:$0x1] %v1985_v36  ;;  %v2041_v36 = vsel %vm6501_vm1, 0, %v2040_v34 }
 0x19d   :  { %v3868_v0 = vrot.slane %v3867_v55, 4  ;;  %2042 = vst [vmem:[#allocation2 + $0x34] sm:$0x1] %v2041_v36  ;;  %v2050_v55 = vsel %vm6501_vm1, 0, %v2049_v51 }
 0x19e   :  { %2051 = vst [vmem:[#allocation2 + $0x5c] sm:$0x1] %v2050_v55 }
 0x19f   :  { %v3873_v4 = vsel %vm5480_vm2, %v3868_v0, %v3872_v56  ;;  %v2068_v0 = vsel %vm6501_vm1, 0, %v2067_v62 }
 0x1a0   :  { %2069 = vst [vmem:[#allocation2 + $0x8c] sm:$0x1] %v2068_v0 }
 0x1b0   :  { %v6486_v37 = vpop.f32.mrf.mxu0 }
 0x1b2   :  { %v1732_v38 = vpop.f32.mrf.mxu0 }
 0x1b3   :  { %v1993_v38 = vld [vmem:[#allocation2 + $0x38] sm:$0x1] }
 0x1b4   :  { %v6488_v39 = vpop.f32.mrf.mxu0  ;;  %v1994_v54 = vsel %vm6494_vm0, 0, %v1993_v38  ;;  %v2037_v38 = vld [vmem:[#allocation2 + $0x2c] sm:$0x1] }
 0x1b5   :  { %1995 = vst [vmem:[#allocation2 + $0x38] sm:$0x1] %v1994_v54  ;;  %v2058_v54 = vld [vmem:[#allocation2 + $0x74] sm:$0x1] }
 0x1b6   :  { %v1735_v40 = vpop.f32.mrf.mxu0  ;;  %v2059_v56 = vsel %vm6501_vm1, 0, %v2058_v54 }
 0x1b7   :  { %v2466_v40 = vor.u32 %v2465_v25, %v2462_v24  ;;  %v2015_v24 = vsel %vm6494_vm0, 0, %v2014_v23  ;;  %v2034_v25 = vld [vmem:[#allocation2 + $0x24] sm:$0x1]  ;;  %2060 = vst [vmem:[#allocation2 + $0x74] sm:$0x1] %v2059_v56  ;;  %v1813_v23 = vmul.f32 %v6482_v33, %v6482_v33  ;;  %v1785_v56 = vsel %vm1771_vm7, %v6488_v39, 0.0 }
 0x1b8   :  { %2016 = vst [vmem:[#allocation2 + $0x80] sm:$0x1] %v2015_v24  ;;  %v2035_v29 = vsel %vm6501_vm1, 0, %v2034_v25  ;;  %v1776_v25 = vadd.f32 %v1775_v12, %v1774_v14 }
 0x1b9   :  { %v2467_v49 = vrot.slane %v2466_v40, 4  ;;  %2036 = vst [vmem:[#allocation2 + $0x24] sm:$0x1] %v2035_v29  ;;  %v2038_v40 = vsel %vm6501_vm1, 0, %v2037_v38  ;;  %v1779_v29 = vsel %vm1771_vm7, %v6482_v33, 0.0  ;;  %v1832_v38 = vsel %vm1771_vm7, %v1813_v23, 0.0 }
 0x1ba   :  { %2039 = vst [vmem:[#allocation2 + $0x2c] sm:$0x1] %v2038_v40  ;;  %v1781_v40 = vsel %vm1771_vm7, %v6484_v35, 0.0 }
 0x1bb   :  { %v2472_v61 = vsel %vm5480_vm2, %v2467_v49, %v2471_v22  ;;  %v1978_v22 = vld [vmem:[#allocation2 + $0x10] sm:$0x1]  ;;  %v2044_v49 = vsel %vm6501_vm1, 0, %v2043_v46 }
 0x1bc   :  { %2683 = vrot.lane.b32.xlu0 %v2472_v61, %s5394_s13  ;;  %v1979_v31 = vsel %vm6494_vm0, 0, %v1978_v22  ;;  %2045 = vst [vmem:[#allocation2 + $0x3c] sm:$0x1] %v2044_v49  ;;  %v1815_v22 = vmul.f32 %v6486_v37, %v6486_v37  ;;  %v1783_v49 = vsel %vm1771_vm7, %v6486_v37, 0.0 }
 0x1bd   :  { %1980 = vst [vmem:[#allocation2 + $0x10] sm:$0x1] %v1979_v31  ;;  %v2025_v31 = vld [vmem:[#allocation2 + $0xc] sm:$0x1] }
 0x1be   :  { %v2026_v46 = vsel %vm6501_vm1, 0, %v2025_v31  ;;  %v1836_v55 = vsel %vm1771_vm7, %v1815_v22, 0.0 }
 0x1bf   :  { %2027 = vst [vmem:[#allocation2 + $0xc] sm:$0x1] %v2026_v46 }
 0x1cd   :  { %v6490_v42 = vpop.f32.mrf.mxu0 }
 0x1ce   :  { %v1817_v59 = vmul.f32 %v6490_v42, %v6490_v42 }
 0x1cf   :  { %v1740_v45 = vpop.f32.mrf.mxu0 }
 0x1d0   :  { %v3537_v45 = vld [vmem:[#allocation2 + $0x98] sm:$0xf]  ;;  %v1840_v0 = vsel %vm1771_vm7, %v1817_v59, 0.0 }
 0x1d1   :  { %v6492_v52 = vpop.f32.mrf.mxu0  ;;  %3584 = vrot.lane.b32.xlu1 %v3537_v45, %s5395_s16  ;;  %v2047_v45 = vsel %vm6501_vm1, 0, %v2046_v44 }
 0x1d2   :  { %2048 = vst [vmem:[#allocation2 + $0x44] sm:$0x1] %v2047_v45  ;;  %v1976_v45 = vsel %vm6494_vm0, 0, %v1975_v41  ;;  %v1818_v47 = vmul.f32 %v6492_v52, %v6492_v52  ;;  %v1789_v2 = vsel %vm1771_vm7, %v6492_v52, 0.0 }
 0x1d3   :  { %v1743_v57 = vpop.f32.mrf.mxu0  ;;  %1977 = vst [vmem:[#allocation2 + $0x8] sm:$0x1] %v1976_v45 }
 0x1d4   :  { %v5062_v57 = vrot.slane %v2748_v50, 9  ;;  %v2053_v50 = vsel %vm6501_vm1, 0, %v2052_v48  ;;  %v1834_v48 = vsel %vm1771_vm7, %v1814_v32, 0.0  ;;  %v1842_v6 = vsel %vm1771_vm7, %v1818_v47, 0.0 }
 0x1d5   :  { %3904 = vrot.lane.b32.xlu1 %v3873_v4, %s5398_s15  ;;  %2054 = vst [vmem:[#allocation2 + $0x64] sm:$0x1] %v2053_v50  ;;  %v1809_v4 = vmul.f32 %v6473_v21, %v6473_v21  ;;  %v1816_v50 = vmul.f32 %v6488_v39, %v6488_v39 }
 0x1d6   :  { %v2818_v3 = vsel %vm6511_vm6, %v5062_v57, %v2817_v58  ;;  %v2055_v57 = vld [vmem:[#allocation2 + $0x6c] sm:$0x1]  ;;  %v2064_v58 = vld [vmem:[#allocation2 + $0x84] sm:$0x1] }
 0x1d7   :  { %2879 = vrot.lane.b32.xlu0 %v2818_v3, %s5395_s16  ;;  %v2056_v60 = vsel %vm6501_vm1, 0, %v2055_v57  ;;  %v2065_v61 = vsel %vm6501_vm1, 0, %v2064_v58  ;;  %v1825_v16 = vsel %vm1771_vm7, %v1809_v4, 0.0 }
 0x1d8   :  { %2057 = vst [vmem:[#allocation2 + $0x6c] sm:$0x1] %v2056_v60  ;;  %2066 = vst [vmem:[#allocation2 + $0x84] sm:$0x1] %v2065_v61  ;;  %v1827_v24 = vadd.f32 %v1826_v10, %v1825_v16  ;;  %v1838_v60 = vsel %vm1771_vm7, %v1816_v50, 0.0  ;;  %v1787_v61 = vsel %vm1771_vm7, %v6490_v42, 0.0 }
 0x1da   :  { %v1829_v34 = vadd.f32 %v1828_v17, %v1827_v24 }
 0x1dc   :  { %v1831_v43 = vadd.f32 %v1830_v27, %v1829_v34 }
 0x1de   :  { %v1833_v51 = vadd.f32 %v1832_v38, %v1831_v43 }
 0x1e0   :  { %v1835_v57 = vadd.f32 %v1834_v48, %v1833_v51 }
 0x1e2   :  { %v1837_v62 = vadd.f32 %v1836_v55, %v1835_v57 }
 0x1e4   :  { %v1839_v4 = vadd.f32 %v1838_v60, %v1837_v62 }
 0x1e6   :  { %v1841_v12 = vadd.f32 %v1840_v0, %v1839_v4 }
 0x1e8   :  { %v6549_v11 = vpop.f32.mrf.mxu0  ;;  %v1843_v17 = vadd.f32 %v1842_v6, %v1841_v12 }
 0x1e9   :  { %v1791_v8 = vsel %vm1771_vm7, %v6549_v11, 0.0 }
 0x1ea   :  { %v1748_v15 = vpop.f32.mrf.mxu0 }
 0x1ec   :  { %v6557_v18 = vpop.f32.mrf.mxu0 }
 0x1ed   :  { %v1820_v10 = vmul.f32 %v6557_v18, %v6557_v18 }
 0x1ee   :  { %v1751_v19 = vpop.f32.mrf.mxu0 }
 0x1ef   :  { %v1777_v19 = vsel %vm1771_vm7, %v6480_v30, 0.0  ;;  %v1846_v23 = vsel %vm1771_vm7, %v1820_v10, 0.0 }
 0x1f0   :  { %v1778_v36 = vadd.f32 %v1777_v19, %v1776_v25 }
 0x1f2   :  { %v1780_v44 = vadd.f32 %v1779_v29, %v1778_v36 }
 0x1f4   :  { %v1782_v54 = vadd.f32 %v1781_v40, %v1780_v44 }
 0x1f6   :  { %v1784_v58 = vadd.f32 %v1783_v49, %v1782_v54 }
 0x1f8   :  { %v1786_v63 = vadd.f32 %v1785_v56, %v1784_v58 }
 0x1fa   :  { %v1788_v5 = vadd.f32 %v1787_v61, %v1786_v63 }
 0x1fc   :  { %v1790_v13 = vadd.f32 %v1789_v2, %v1788_v5 }
 0x1fe   :  { %v1792_v19 = vadd.f32 %v1791_v8, %v1790_v13 }
 0x204   :  { %v6591_v1 = vpop.f32.mrf.mxu0 }
 0x205   :  { %v1821_v16 = vmul.f32 %v6591_v1, %v6591_v1  ;;  %v1795_v24 = vsel %vm1771_vm7, %v6591_v1, 0.0 }
 0x206   :  { %v1756_v3 = vpop.f32.mrf.mxu0 }
 0x207   :  { %v1819_v3 = vmul.f32 %v6549_v11, %v6549_v11  ;;  %v1848_v32 = vsel %vm1771_vm7, %v1821_v16, 0.0 }
 0x208   :  { %v6601_v7 = vpop.f32.mrf.mxu0 }
 0x209   :  { %v1844_v14 = vsel %vm1771_vm7, %v1819_v3, 0.0  ;;  %v1822_v25 = vmul.f32 %v6601_v7, %v6601_v7  ;;  %v1797_v34 = vsel %vm1771_vm7, %v6601_v7, 0.0 }
 0x20a   :  { %v1759_v15 = vpop.f32.mrf.mxu0  ;;  %v1845_v27 = vadd.f32 %v1844_v14, %v1843_v17  ;;  %v2700_v17 = vpop.permute.xlu0 %2699 }
 0x20b   :  { %v1793_v15 = vsel %vm1771_vm7, %v6557_v18, 0.0  ;;  %v1850_v22 = vsel %vm1771_vm7, %v1822_v25, 0.0  ;;  %2740 = vst.msk [vmem:[#allocation3 + $0x60] sm:$0xf] %vm2731_vm8, %v2700_v17 }
 0x20c   :  { %v1794_v29 = vadd.f32 %v1793_v15, %v1792_v19  ;;  %v1847_v36 = vadd.f32 %v1846_v23, %v1845_v27 }
 0x20e   :  { %v1796_v38 = vadd.f32 %v1795_v24, %v1794_v29  ;;  %v1849_v43 = vadd.f32 %v1848_v32, %v1847_v36 }
 0x210   :  { %v1798_v44 = vadd.f32 %v1797_v34, %v1796_v38  ;;  %v1851_v48 = vadd.f32 %v1850_v22, %v1849_v43 }
 0x21e   :  { %v6668_v40 = vpop.f32.mrf.mxu0 }
 0x21f   :  { %v1799_v41 = vsel %vm1771_vm7, %v6668_v40, 0.0  ;;  %v1823_v31 = vmul.f32 %v6668_v40, %v6668_v40 }
 0x220   :  { %v1764_v45 = vpop.f32.mrf.mxu0  ;;  %v1800_v49 = vadd.f32 %v1799_v41, %v1798_v44  ;;  %v2896_v41 = vpop.permute.xlu0 %2895 }
 0x221   :  { %v1852_v46 = vsel %vm1771_vm7, %v1823_v31, 0.0  ;;  %2936 = vst.msk [vmem:[#allocation3 + $0x60] sm:$0xf] %vm2927_vm9, %v2896_v41 }
 0x222   :  { %v1765_v50 = vpop.f32.mrf.mxu0  ;;  %v1853_v55 = vadd.f32 %v1852_v46, %v1851_v48 }
 0x223   :  { %v1801_v51 = vsel %vm1771_vm7, %v1765_v50, 0.0  ;;  %v1824_v54 = vmul.f32 %v1765_v50, %v1765_v50 }
 0x224   :  { %v1802_v56 = vadd.f32 %v1801_v51, %v1800_v49  ;;  %v1767_v59 = vpop.f32.mrf.mxu0 }
 0x225   :  { %v1854_v57 = vsel %vm1771_vm7, %v1824_v54, 0.0 }
 0x226   :  { %v1803_v58 = vrot.slane %v1802_v56, 4  ;;  %v1855_v60 = vadd.f32 %v1854_v57, %v1853_v55 }
 0x228   :  { %v1804_v61 = vadd.f32 %v1803_v58, %v1802_v56  ;;  %v1856_v47 = vrot.slane %v1855_v60, 4 }
 0x22a   :  { %v1805_v62 = vrot.slane %v1804_v61, 2  ;;  %v1857_v63 = vadd.f32 %v1856_v47, %v1855_v60 }
 0x22c   :  { %v1806_v0 = vadd.f32 %v1805_v62, %v1804_v61  ;;  %v1858_v2 = vrot.slane %v1857_v63, 2 }
 0x22e   :  { %v1807_v3 = vrot.slane %v1806_v0, 1  ;;  %v1859_v4 = vadd.f32 %v1858_v2, %v1857_v63 }
 0x230   :  { %v1808_v5 = vadd.f32 %v1807_v3, %v1806_v0  ;;  %v1860_v6 = vrot.slane %v1859_v4, 1 }
 0x232   :  { %v1861_v8 = vadd.f32 %v1860_v6, %v1859_v4  ;;  %v6678_v10 = vmul.f32 0.0078125, %v1808_v5  ;;  %v2684_v4 = vpop.permute.xlu0 %2683 }
 0x233   :  { %2732 = vst.msk [vmem:[#allocation3] sm:$0xf] %vm2731_vm8, %v2684_v4 }
 0x234   :  { %v1863_v12 = vmul.f32 0.0078125, %v1861_v8  ;;  %v1864_v13 = vmul.f32 %v6678_v10, %v6678_v10  ;;  %v1882_v19 = vsub.f32 %v1765_v50, %v6678_v10  ;;  %v1871_v23 = vsub.f32 %v6482_v33, %v6678_v10  ;;  %v6699_v33 = vld [vmem:[%s8347_s2] ss:$0 sm:$0xff] }
 0x235   :  { %v1870_v24 = vsub.f32 %v6480_v30, %v6678_v10  ;;  %v1869_v25 = vsub.f32 %v6478_v28, %v6678_v10  ;;  %v1873_v27 = vsub.f32 %v6486_v37, %v6678_v10  ;;  %v1872_v29 = vsub.f32 %v6484_v35, %v6678_v10 }
 0x236   :  { %v1865_v14 = vsub.f32 %v1863_v12, %v1864_v13  ;;  %v1874_v30 = vsub.f32 %v6488_v39, %v6678_v10  ;;  %v1877_v28 = vsub.f32 %v6549_v11, %v6678_v10  ;;  %v1876_v37 = vsub.f32 %v6492_v52, %v6678_v10  ;;  %v6716_v39 = vld [vmem:[%s8348_s3] ss:$0 sm:$0xff] }
 0x237   :  { %v1879_v35 = vsub.f32 %v6591_v1, %v6678_v10  ;;  %v1875_v12 = vsub.f32 %v6490_v42, %v6678_v10 }
 0x238   :  { %v1866_v15 = vmax.f32 %v1865_v14, 0.0 }
 0x23a   :  { %v1883_v16 = vadd.f32 1e-05, %v1866_v15 }
 0x23c   :  { %5366 = vrsqrt.f32 %v1883_v16 }
 0x249   :  { %v6694_v32 = vpop.eup %5366 }
 0x24a   :  { %v1900_v34 = vmul.f32 %v6694_v32, %v1882_v19  ;;  %v1889_v36 = vmul.f32 %v6694_v32, %v1871_v23  ;;  %v1888_v38 = vmul.f32 %v6694_v32, %v1870_v24  ;;  %v1887_v22 = vmul.f32 %v6694_v32, %v1869_v25 }
 0x24b   :  { %v1891_v11 = vmul.f32 %v6694_v32, %v1873_v27  ;;  %v1890_v31 = vmul.f32 %v6694_v32, %v1872_v29  ;;  %v1892_v43 = vmul.f32 %v6694_v32, %v1874_v30  ;;  %v1895_v44 = vmul.f32 %v6694_v32, %v1877_v28  ;;  %v2880_v28 = vpop.permute.xlu0 %2879 }
 0x24c   :  { %v1922_v45 = vmul.f32 %v6699_v33, %v1900_v34  ;;  %v1911_v46 = vmul.f32 %v6699_v33, %v1889_v36  ;;  %v1910_v48 = vmul.f32 %v6699_v33, %v1888_v38  ;;  %v1909_v49 = vmul.f32 %v6699_v33, %v1887_v22  ;;  %v2389_v36 = vld [vmem:[#allocation2 + $0x90] sm:$0xf]  ;;  %2928 = vst.msk [vmem:[#allocation3] sm:$0xf] %vm2927_vm9, %v2880_v28 }
 0x24d   :  { %v1913_v50 = vmul.f32 %v6699_v33, %v1891_v11  ;;  %v1912_v51 = vmul.f32 %v6699_v33, %v1890_v31  ;;  %v1914_v54 = vmul.f32 %v6699_v33, %v1892_v43  ;;  %v1917_v55 = vmul.f32 %v6699_v33, %v1895_v44  ;;  %v2392_v31 = vld [vmem:[#allocation2 + $0x94] sm:$0x1] }
 0x24e   :  { %v1944_v56 = vadd.f32 %v6716_v39, %v1922_v45  ;;  %v1933_v59 = vadd.f32 %v6716_v39, %v1911_v46  ;;  %v1932_v57 = vadd.f32 %v6716_v39, %v1910_v48  ;;  %v1931_v58 = vadd.f32 %v6716_v39, %v1909_v49  ;;  %v2323_v48 = vld [vmem:[#allocation2 + $0x28] sm:$0xf] }
 0x24f   :  { %v1935_v60 = vadd.f32 %v6716_v39, %v1913_v50  ;;  %v1934_v61 = vadd.f32 %v6716_v39, %v1912_v51  ;;  %v1936_v47 = vadd.f32 %v6716_v39, %v1914_v54  ;;  %v1939_v62 = vadd.f32 %v6716_v39, %v1917_v55 }
 0x250   :  { %v1960_v63 = vmax.f32 %v1944_v56, 0.0  ;;  %v1949_v0 = vmax.f32 %v1933_v59, 0.0  ;;  %v1948_v2 = vmax.f32 %v1932_v57, 0.0  ;;  %v1947_v3 = vmax.f32 %v1931_v58, 0.0  ;;  %v2317_v57 = vld [vmem:[#allocation2 + $0x20] sm:$0xf] }
 0x251   :  { %v1951_v5 = vmax.f32 %v1935_v60, 0.0  ;;  %v1950_v6 = vmax.f32 %v1934_v61, 0.0  ;;  %v1952_v8 = vmax.f32 %v1936_v47, 0.0  ;;  %v1878_v23 = vsub.f32 %v6557_v18, %v6678_v10  ;;  %v2311_v58 = vld [vmem:[#allocation2 + $0x18] sm:$0xf] }
 0x252   :  { %v5177_v13 = vpack.c.bf16 %v1960_v63, %v1960_v63  ;;  %v5166_v14 = vpack.c.bf16 %v1949_v0, %v1949_v0  ;;  %v5165_v15 = vpack.c.bf16 %v1948_v2, %v1948_v2  ;;  %v5164_v16 = vpack.c.bf16 %v1947_v3, %v1947_v3 }
 0x253   :  { %v5168_v17 = vpack.c.bf16 %v1951_v5, %v1951_v5  ;;  %v5167_v19 = vpack.c.bf16 %v1950_v6, %v1950_v6  ;;  %v1881_v24 = vsub.f32 %v6668_v40, %v6678_v10  ;;  %v5169_v29 = vpack.c.bf16 %v1952_v8, %v1952_v8  ;;  %v2335_v8 = vld [vmem:[#allocation2 + $0x38] sm:$0xf] }
 0x254   :  { %v2258_v25 = vshrl.u32 %v5177_v13, 16  ;;  %v2170_v27 = vshrl.u32 %v5166_v14, 16  ;;  %v1955_v30 = vmax.f32 %v1939_v62, 0.0  ;;  %v2261_v34 = vshll.u32 %v5177_v13, 16 }
 0x255   :  { %v2173_v38 = vshll.u32 %v5166_v14, 16  ;;  %v2162_v22 = vshrl.u32 %v5165_v15, 16  ;;  %v2154_v41 = vshrl.u32 %v5164_v16, 16  ;;  %v2165_v44 = vshll.u32 %v5165_v15, 16 }
 0x256   :  { %v2260_v11 = vrot.slane %v2258_v25, 7  ;;  %v6747_v43 = vrot.slane %v2170_v27, 7  ;;  %v2186_v45 = vshrl.u32 %v5168_v17, 16  ;;  %v2157_v51 = vshll.u32 %v5164_v16, 16 }
 0x257   :  { %v6755_v49 = vrot.slane %v2162_v22, 7  ;;  %v6757_v50 = vrot.slane %v2154_v41, 7  ;;  %v2178_v54 = vshrl.u32 %v5167_v19, 16  ;;  %v5172_v60 = vpack.c.bf16 %v1955_v30, %v1955_v30 }
 0x258   :  { %v2263_v55 = vor.u32 %v2261_v34, %v2260_v11  ;;  %v2264_v56 = vrot.slane %v2260_v11, 4  ;;  %v2175_v59 = vor.u32 %v2173_v38, %v6747_v43  ;;  %v2189_v62 = vshll.u32 %v5168_v17, 16  ;;  %v2329_v17 = vld [vmem:[#allocation2 + $0x30] sm:$0xf]  ;;  %v2341_v38 = vld [vmem:[#allocation2 + $0x40] sm:$0xf] }
 0x259   :  { %v2167_v61 = vor.u32 %v2165_v44, %v6755_v49  ;;  %v2159_v47 = vor.u32 %v2157_v51, %v6757_v50  ;;  %v2181_v63 = vshll.u32 %v5167_v19, 16  ;;  %v6768_v4 = vrot.slane %v2186_v45, 7  ;;  %v2359_v44 = vld [vmem:[#allocation2 + $0x68] sm:$0xf]  ;;  %v2314_v51 = vld [vmem:[#allocation2 + $0x1c] sm:$0x1] }
 0x25a   :  { %v2390_v0 = vsel %vm6751_vm10, %v2263_v55, %v2389_v36  ;;  %v2393_v2 = vsel %vm6494_vm0, %v2264_v56, %v2392_v31  ;;  %v2324_v3 = vsel %vm6751_vm10, %v2175_v59, %v2323_v48  ;;  %v6774_v13 = vrot.slane %v2178_v54, 7  ;;  %v2320_v48 = vld [vmem:[#allocation2 + $0x24] sm:$0x1] }
 0x25b   :  { %2391 = vst [vmem:[#allocation2 + $0x90] sm:$0xf] %v2390_v0  ;;  %2394 = vst [vmem:[#allocation2 + $0x94] sm:$0x1] %v2393_v2  ;;  %v2318_v5 = vsel %vm6751_vm10, %v2167_v61, %v2317_v57  ;;  %v2312_v6 = vsel %vm6751_vm10, %v2159_v47, %v2311_v58  ;;  %v2194_v14 = vshrl.u32 %v5169_v29, 16  ;;  %v2168_v15 = vrot.slane %v6755_v49, 4 }
 0x25c   :  { %2325 = vst [vmem:[#allocation2 + $0x28] sm:$0xf] %v2324_v3  ;;  %2319 = vst [vmem:[#allocation2 + $0x20] sm:$0xf] %v2318_v5  ;;  %v2191_v16 = vor.u32 %v2189_v62, %v6768_v4  ;;  %v2218_v19 = vshrl.u32 %v5172_v60, 16  ;;  %v1880_v25 = vsub.f32 %v6601_v7, %v6678_v10  ;;  %v2183_v27 = vor.u32 %v2181_v63, %v6774_v13 }
 0x25d   :  { %2313 = vst [vmem:[#allocation2 + $0x18] sm:$0xf] %v2312_v6  ;;  %v6781_v30 = vrot.slane %v2194_v14, 7  ;;  %v2197_v28 = vshll.u32 %v5169_v29, 16  ;;  %v2221_v34 = vshll.u32 %v5172_v60, 16  ;;  %v1894_v41 = vmul.f32 %v6694_v32, %v1876_v37 }
 0x25e   :  { %v2336_v36 = vsel %vm6751_vm10, %v2191_v16, %v2335_v8  ;;  %v6785_v22 = vrot.slane %v2218_v19, 7  ;;  %v1897_v7 = vmul.f32 %v6694_v32, %v1879_v35  ;;  %v2160_v11 = vrot.slane %v6757_v50, 4  ;;  %v2332_v63 = vld [vmem:[#allocation2 + $0x34] sm:$0x1] }
 0x25f   :  { %2337 = vst [vmem:[#allocation2 + $0x38] sm:$0xf] %v2336_v36  ;;  %v2330_v29 = vsel %vm6751_vm10, %v2183_v27, %v2329_v17  ;;  %v2199_v31 = vor.u32 %v2197_v28, %v6781_v30  ;;  %v1893_v52 = vmul.f32 %v6694_v32, %v1875_v12  ;;  %v2184_v37 = vrot.slane %v6774_v13, 4  ;;  %v2353_v36 = vld [vmem:[#allocation2 + $0x60] sm:$0xf] }
 0x260   :  { %2331 = vst [vmem:[#allocation2 + $0x30] sm:$0xf] %v2330_v29  ;;  %v2223_v1 = vor.u32 %v2221_v34, %v6785_v22  ;;  %v1916_v35 = vmul.f32 %v6699_v33, %v1894_v41  ;;  %v1919_v45 = vmul.f32 %v6699_v33, %v1897_v7  ;;  %v1896_v42 = vmul.f32 %v6694_v32, %v1878_v23 }
 0x261   :  { %v2342_v49 = vsel %vm6751_vm10, %v2199_v31, %v2341_v38  ;;  %v1915_v50 = vmul.f32 %v6699_v33, %v1893_v52  ;;  %v1899_v12 = vmul.f32 %v6694_v32, %v1881_v24  ;;  %v1898_v57 = vmul.f32 %v6694_v32, %v1880_v25  ;;  %v2326_v25 = vld [vmem:[#allocation2 + $0x2c] sm:$0x1]  ;;  %v2371_v38 = vld [vmem:[#allocation2 + $0x78] sm:$0xf] }
 0x262   :  { %2343 = vst [vmem:[#allocation2 + $0x40] sm:$0xf] %v2342_v49  ;;  %v2360_v55 = vsel %vm6751_vm10, %v2223_v1, %v2359_v44  ;;  %v1938_v56 = vadd.f32 %v6716_v39, %v1916_v35  ;;  %v1941_v59 = vadd.f32 %v6716_v39, %v1919_v45  ;;  %v1918_v23 = vmul.f32 %v6699_v33, %v1896_v42 }
 0x263   :  { %v3525_v54 = vld [vmem:[#allocation2 + $0x28] sm:$0xf]  ;;  %v3524_v18 = vld [vmem:[#allocation2 + $0x20] sm:$0xf]  ;;  %2361 = vst [vmem:[#allocation2 + $0x68] sm:$0xf] %v2360_v55  ;;  %v1937_v40 = vadd.f32 %v6716_v39, %v1915_v50  ;;  %v1921_v24 = vmul.f32 %v6699_v33, %v1899_v12  ;;  %v2321_v58 = vsel %vm6494_vm0, %v2168_v15, %v2320_v48  ;;  %v1920_v47 = vmul.f32 %v6699_v33, %v1898_v57 }
 0x264   :  { %3560 = vrot.lane.b32.xlu1 %v3525_v54, %s5395_s16  ;;  %3558 = vrot.lane.b32.xlu0 %v3524_v18, %s5395_s16  ;;  %v1954_v60 = vmax.f32 %v1938_v56, 0.0  ;;  %v1957_v61 = vmax.f32 %v1941_v59, 0.0  ;;  %2322 = vst [vmem:[#allocation2 + $0x24] sm:$0x1] %v2321_v58  ;;  %v2315_v62 = vsel %vm6494_vm0, %v2160_v11, %v2314_v51  ;;  %v1940_v2 = vadd.f32 %v6716_v39, %v1918_v23  ;;  %v2947_v6 = vld [vmem:[#allocation2 + $0x20] sm:$0xf] }
 0x265   :  { %v1953_v0 = vmax.f32 %v1937_v40, 0.0  ;;  %v1943_v3 = vadd.f32 %v6716_v39, %v1921_v24  ;;  %2316 = vst [vmem:[#allocation2 + $0x1c] sm:$0x1] %v2315_v62  ;;  %v2176_v5 = vrot.slane %v6747_v43, 4  ;;  %v2946_v14 = vld [vmem:[#allocation2 + $0x18] sm:$0xf]  ;;  %v2333_v19 = vsel %vm6494_vm0, %v2184_v37, %v2332_v63 }
 0x266   :  { %v5171_v8 = vpack.c.bf16 %v1954_v60, %v1954_v60  ;;  %v5174_v13 = vpack.c.bf16 %v1957_v61, %v1957_v61  ;;  %v1956_v16 = vmax.f32 %v1940_v2, 0.0  ;;  %v1942_v34 = vadd.f32 %v6716_v39, %v1920_v47  ;;  %2334 = vst [vmem:[#allocation2 + $0x34] sm:$0x1] %v2333_v19  ;;  %v3527_v29 = vld [vmem:[#allocation2 + $0x38] sm:$0xf] }
 0x267   :  { %v5170_v15 = vpack.c.bf16 %v1953_v0, %v1953_v0  ;;  %v1959_v17 = vmax.f32 %v1943_v3, 0.0  ;;  %v2327_v37 = vsel %vm6494_vm0, %v2176_v5, %v2326_v25  ;;  %v3526_v1 = vld [vmem:[#allocation2 + $0x30] sm:$0xf]  ;;  %v2347_v12 = vld [vmem:[#allocation2 + $0x58] sm:$0xf]  ;;  %v1868_v51 = vsub.f32 %v6476_v26, %v6678_v10 }
 0x268   :  { %2982 = vrot.lane.b32.xlu1 %v2947_v6, %s5398_s15  ;;  %2980 = vrot.lane.b32.xlu0 %v2946_v14, %s5398_s15  ;;  %v2210_v27 = vshrl.u32 %v5171_v8, 16  ;;  %v2234_v28 = vshrl.u32 %v5174_v13, 16  ;;  %v2213_v43 = vshll.u32 %v5171_v8, 16  ;;  %v5173_v7 = vpack.c.bf16 %v1956_v16, %v1956_v16  ;;  %2328 = vst [vmem:[#allocation2 + $0x2c] sm:$0x1] %v2327_v37 }
 0x269   :  { %v2202_v41 = vshrl.u32 %v5170_v15, 16  ;;  %v5176_v11 = vpack.c.bf16 %v1959_v17, %v1959_v17  ;;  %v2237_v52 = vshll.u32 %v5174_v13, 16  ;;  %v2205_v45 = vshll.u32 %v5170_v15, 16  ;;  %v2949_v57 = vld [vmem:[#allocation2 + $0x30] sm:$0xf] }
 0x26a   :  { %v6841_v31 = vrot.slane %v2210_v27, 7  ;;  %v6843_v44 = vrot.slane %v2234_v28, 7  ;;  %v2226_v48 = vshrl.u32 %v5173_v7, 16  ;;  %v2229_v56 = vshll.u32 %v5173_v7, 16  ;;  %v2365_v23 = vld [vmem:[#allocation2 + $0x70] sm:$0xf] }
 0x26b   :  { %v6848_v35 = vrot.slane %v2202_v41, 7  ;;  %v2250_v49 = vshrl.u32 %v5176_v11, 16  ;;  %v2253_v24 = vshll.u32 %v5176_v11, 16  ;;  %v1958_v58 = vmax.f32 %v1942_v34, 0.0  ;;  %v2948_v26 = vld [vmem:[#allocation2 + $0x28] sm:$0xf] }
 0x26c   :  { %3564 = vrot.lane.b32.xlu1 %v3527_v29, %s5395_s16  ;;  %3562 = vrot.lane.b32.xlu0 %v3526_v1, %s5395_s16  ;;  %v2215_v50 = vor.u32 %v2213_v43, %v6841_v31  ;;  %v2239_v42 = vor.u32 %v2237_v52, %v6843_v44  ;;  %v6856_v55 = vrot.slane %v2226_v48, 7  ;;  %v2383_v47 = vld [vmem:[#allocation2 + $0x88] sm:$0xf]  ;;  %v2200_v62 = vrot.slane %v6781_v30, 4  ;;  %v2344_v5 = vld [vmem:[#allocation2 + $0x44] sm:$0x1] }
 0x26d   :  { %v2207_v54 = vor.u32 %v2205_v45, %v6848_v35  ;;  %v6858_v59 = vrot.slane %v2250_v49, 7  ;;  %v5175_v0 = vpack.c.bf16 %v1958_v58, %v1958_v58  ;;  %v1886_v2 = vmul.f32 %v6694_v32, %v1868_v51  ;;  %v2338_v6 = vld [vmem:[#allocation2 + $0x3c] sm:$0x1]  ;;  %v2951_v13 = vld [vmem:[#allocation2 + $0x40] sm:$0xf] }
 0x26e   :  { %v2354_v18 = vsel %vm6751_vm10, %v2215_v50, %v2353_v36  ;;  %v2372_v40 = vsel %vm6751_vm10, %v2239_v42, %v2371_v38  ;;  %v2231_v61 = vor.u32 %v2229_v56, %v6856_v55  ;;  %v2192_v8 = vrot.slane %v6768_v4, 4  ;;  %v6877_v30 = vld [vmem:[#allocation2 + $0x20] sm:$0xe]  ;;  %v2356_v25 = vld [vmem:[#allocation2 + $0x64] sm:$0x1] }
 0x26f   :  { %2355 = vst [vmem:[#allocation2 + $0x60] sm:$0xf] %v2354_v18  ;;  %2373 = vst [vmem:[#allocation2 + $0x78] sm:$0xf] %v2372_v40  ;;  %v2348_v60 = vsel %vm6751_vm10, %v2207_v54, %v2347_v12  ;;  %v2255_v63 = vor.u32 %v2253_v24, %v6858_v59  ;;  %v2242_v15 = vshrl.u32 %v5175_v0, 16  ;;  %v2216_v17 = vrot.slane %v6841_v31, 4 }
 0x270   :  { %2986 = vrot.lane.b32.xlu1 %v2949_v57, %s5398_s15  ;;  %2984 = vrot.lane.b32.xlu0 %v2948_v26, %s5398_s15  ;;  %2349 = vst [vmem:[#allocation2 + $0x58] sm:$0xf] %v2348_v60  ;;  %v2366_v3 = vsel %vm6751_vm10, %v2231_v61, %v2365_v23  ;;  %v3528_v16 = vld [vmem:[#allocation2 + $0x40] sm:$0xf]  ;;  %v2245_v4 = vshll.u32 %v5175_v0, 16  ;;  %v1908_v34 = vmul.f32 %v6699_v33, %v1886_v2  ;;  %v2224_v41 = vrot.slane %v6785_v22, 4 }
 0x271   :  { %2367 = vst [vmem:[#allocation2 + $0x70] sm:$0xf] %v2366_v3  ;;  %v2384_v14 = vsel %vm6751_vm10, %v2255_v63, %v2383_v47  ;;  %v2377_v19 = vld [vmem:[#allocation2 + $0x80] sm:$0xf]  ;;  %v2244_v27 = vrot.slane %v2242_v15, 7  ;;  %v2345_v43 = vsel %vm6494_vm0, %v2200_v62, %v2344_v5  ;;  %v2208_v7 = vrot.slane %v6848_v35, 4 }
 0x272   :  { %2385 = vst [vmem:[#allocation2 + $0x88] sm:$0xf] %v2384_v14  ;;  %v6882_v28 = vld [vmem:[#allocation2 + $0x18] sm:$0xe]  ;;  %v2350_v36 = vld [vmem:[#allocation2 + $0x5c] sm:$0x1]  ;;  %v1930_v50 = vadd.f32 %v6716_v39, %v1908_v34  ;;  %v2339_v22 = vsel %vm6494_vm0, %v2192_v8, %v2338_v6 }
 0x273   :  { %v2368_v38 = vld [vmem:[#allocation2 + $0x74] sm:$0x1]  ;;  %v2232_v11 = vrot.slane %v6856_v55, 4  ;;  %v5081_v29 = vrot.slane %v6877_v30, 9  ;;  %2346 = vst [vmem:[#allocation2 + $0x44] sm:$0x1] %v2345_v43  ;;  %v2247_v45 = vor.u32 %v2245_v4, %v2244_v27  ;;  %v2357_v55 = vsel %vm6494_vm0, %v2216_v17, %v2356_v25 }
 0x274   :  { %2990 = vrot.lane.b32.xlu1 %v2951_v13, %s5398_s15  ;;  %3566 = vrot.lane.b32.xlu0 %v3528_v16, %s5395_s16  ;;  %v2362_v31 = vld [vmem:[#allocation2 + $0x6c] sm:$0x1]  ;;  %v2380_v52 = vld [vmem:[#allocation2 + $0x84] sm:$0x1]  ;;  %v3531_v37 = vld [vmem:[#allocation2 + $0x68] sm:$0xf]  ;;  %v1867_v17 = vsub.f32 %v6473_v21, %v6678_v10 }
 0x275   :  { %v2950_v1 = vld [vmem:[#allocation2 + $0x38] sm:$0xf]  ;;  %v6891_v48 = vld [vmem:[#allocation2 + $0x24] sm:$0x1]  ;;  %v2248_v35 = vrot.slane %v2244_v27, 4  ;;  %v5065_v12 = vrot.slane %v6882_v28, 9  ;;  %v2378_v57 = vsel %vm6751_vm10, %v2247_v45, %v2377_v19  ;;  %v2369_v47 = vsel %vm6494_vm0, %v2232_v11, %v2368_v38 }
 0x276   :  { %v6893_v49 = vld [vmem:[#allocation2 + $0x18] sm:$0xe]  ;;  %v6899_v42 = vld [vmem:[#allocation2 + $0x1c] sm:$0x1]  ;;  %v6904_v54 = vld [vmem:[#allocation2 + $0x30] sm:$0xe]  ;;  %v2363_v5 = vsel %vm6494_vm0, %v2224_v41, %v2362_v31 }
 0x277   :  { %v6902_v51 = vld [vmem:[#allocation2 + $0x1c] sm:$0x1]  ;;  %2340 = vst [vmem:[#allocation2 + $0x3c] sm:$0x1] %v2339_v22  ;;  %v2240_v56 = vrot.slane %v6843_v44, 4  ;;  %v1946_v40 = vmax.f32 %v1930_v50, 0.0  ;;  %v2351_v44 = vsel %vm6494_vm0, %v2208_v7, %v2350_v36  ;;  %v2381_v6 = vsel %vm6494_vm0, %v2248_v35, %v2380_v52 }
 0x278   :  { %3572 = vrot.lane.b32.xlu1 %v3531_v37, %s5395_s16  ;;  %2988 = vrot.lane.b32.xlu0 %v2950_v1, %s5398_s15  ;;  %v6912_v18 = vld [vmem:[#allocation2 + $0x28] sm:$0xe]  ;;  %v6914_v23 = vld [vmem:[#allocation2 + $0x40] sm:$0xe]  ;;  %2358 = vst [vmem:[#allocation2 + $0x64] sm:$0x1] %v2357_v55  ;;  %v1885_v22 = vmul.f32 %v6694_v32, %v1867_v17 }
 0x279   :  { %v2374_v24 = vld [vmem:[#allocation2 + $0x7c] sm:$0x1]  ;;  %v2256_v58 = vrot.slane %v6858_v59, 4  ;;  %2379 = vst [vmem:[#allocation2 + $0x80] sm:$0xf] %v2378_v57  ;;  %v3407_v26 = vrot.slane %v6891_v48, 5  ;;  %v5163_v59 = vpack.c.bf16 %v1946_v40, %v1946_v40 }
 0x27a   :  { %v6918_v60 = vld [vmem:[#allocation2 + $0x34] sm:$0x1]  ;;  %v6920_v61 = vld [vmem:[#allocation2 + $0x28] sm:$0xe]  ;;  %v2386_v62 = vld [vmem:[#allocation2 + $0x8c] sm:$0x1]  ;;  %v2375_v10 = vsel %vm6494_vm0, %v2240_v56, %v2374_v24 }
 0x27b   :  { %v2953_v63 = vld [vmem:[#allocation2 + $0x60] sm:$0xf]  ;;  %v2829_v0 = vrot.slane %v6899_v42, 5  ;;  %v6927_v2 = vld [vmem:[#allocation2 + $0x2c] sm:$0x1]  ;;  %v5080_v13 = vrot.slane %v6893_v49, 9  ;;  %v2387_v50 = vsel %vm6494_vm0, %v2256_v58, %v2386_v62 }
 0x27c   :  { %v6929_v3 = vld [vmem:[#allocation2 + $0x38] sm:$0xe]  ;;  %2352 = vst [vmem:[#allocation2 + $0x5c] sm:$0x1] %v2351_v44  ;;  %2370 = vst [vmem:[#allocation2 + $0x74] sm:$0x1] %v2369_v47  ;;  %2994 = vrot.lane.b32.xlu1 %v2953_v63, %s5398_s15 }
 0x27d   :  { %v3530_v8 = vld [vmem:[#allocation2 + $0x60] sm:$0xf]  ;;  %v3403_v14 = vrot.slane %v6902_v51, 5  ;;  %v6940_v16 = vld [vmem:[#allocation2 + $0x24] sm:$0x1]  ;;  %v5083_v19 = vrot.slane %v6904_v54, 9 }
 0x27e   :  { %v6938_v15 = vld [vmem:[#allocation2 + $0x20] sm:$0xe]  ;;  %2364 = vst [vmem:[#allocation2 + $0x6c] sm:$0x1] %v2363_v5  ;;  %2382 = vst [vmem:[#allocation2 + $0x84] sm:$0x1] %v2381_v6  ;;  %3570 = vrot.lane.b32.xlu0 %v3530_v8, %s5395_s16 }
 0x27f   :  { %v3415_v25 = vrot.slane %v6918_v60, 5  ;;  %v5067_v27 = vrot.slane %v6912_v18, 9  ;;  %v2146_v4 = vshrl.u32 %v5163_v59, 16  ;;  %v6948_v34 = vld [vmem:[#allocation2 + $0x2c] sm:$0x1]  ;;  %v2837_v43 = vrot.slane %v6927_v2, 5 }
 0x280   :  { %v2305_v36 = vld [vmem:[#allocation2 + $0x10] sm:$0xf]  ;;  %v2308_v38 = vld [vmem:[#allocation2 + $0x14] sm:$0x1]  ;;  %v5085_v41 = vrot.slane %v6914_v23, 9  ;;  %v5082_v7 = vrot.slane %v6920_v61, 9  ;;  %v7032_v48 = vsel %vm6511_vm6, %v5080_v13, %v3403_v14 }
 0x281   :  { %v6953_v21 = vld [vmem:[#allocation2 + $0x38] sm:$0xe]  ;;  %v2148_v31 = vrot.slane %v2146_v4, 7  ;;  %v2149_v52 = vshll.u32 %v5163_v59, 16  ;;  %v6957_v37 = vld [vmem:[#allocation2 + $0x30] sm:$0xe]  ;;  %v7047_v49 = vsel %vm6511_vm6, %v5083_v19, %v3415_v25  ;;  %v7055_v42 = vsel %vm6511_vm6, %v5067_v27, %v2837_v43 }
 0x282   :  { %v3533_v11 = vld [vmem:[#allocation2 + $0x78] sm:$0xf]  ;;  %v6959_v1 = vld [vmem:[#allocation2 + $0x34] sm:$0x1]  ;;  %v6961_v45 = vld [vmem:[#allocation2 + $0x68] sm:$0xe] }
 0x283   :  { %2376 = vst [vmem:[#allocation2 + $0x7c] sm:$0x1] %v2375_v10  ;;  %3576 = vrot.lane.b32.xlu1 %v3533_v11, %s5395_s16  ;;  %v2952_v35 = vld [vmem:[#allocation2 + $0x58] sm:$0xf]  ;;  %v3411_v55 = vrot.slane %v6948_v34, 5  ;;  %v2151_v44 = vor.u32 %v2149_v52, %v2148_v31  ;;  %v2152_v58 = vrot.slane %v2148_v31, 4 }
 0x284   :  { %v6969_v57 = vld [vmem:[#allocation2 + $0x60] sm:$0xe]  ;;  %v6971_v40 = vld [vmem:[#allocation2 + $0x68] sm:$0xe]  ;;  %v6973_v24 = vld [vmem:[#allocation2 + $0x90] sm:$0xe]  ;;  %2992 = vrot.lane.b32.xlu0 %v2952_v35, %s5398_s15 }
 0x285   :  { %2388 = vst [vmem:[#allocation2 + $0x8c] sm:$0x1] %v2387_v50  ;;  %v5066_v32 = vrot.slane %v6938_v15, 9  ;;  %v2833_v47 = vrot.slane %v6940_v16, 5  ;;  %v6978_v62 = vld [vmem:[#allocation2 + $0x58] sm:$0xe]  ;;  %v2306_v6 = vsel %vm6751_vm10, %v2151_v44, %v2305_v36  ;;  %v2309_v8 = vsel %vm6494_vm0, %v2152_v58, %v2308_v38 }
 0x286   :  { %v2955_v63 = vld [vmem:[#allocation2 + $0x70] sm:$0xf]  ;;  %v6980_v59 = vld [vmem:[#allocation2 + $0x44] sm:$0x1]  ;;  %v6988_v17 = vld [vmem:[#allocation2 + $0x3c] sm:$0x1]  ;;  %v1907_v38 = vmul.f32 %v6699_v33, %v1885_v22  ;;  %v7024_v33 = vsel %vm6511_vm6, %v5065_v12, %v2829_v0  ;;  %v7063_v54 = vsel %vm6511_vm6, %v5082_v7, %v3411_v55 }
 0x287   :  { %v6982_v5 = vld [vmem:[#allocation2 + $0x70] sm:$0xe]  ;;  %v6992_v10 = vld [vmem:[#allocation2 + $0x58] sm:$0xe]  ;;  %2998 = vrot.lane.b32.xlu1 %v2955_v63, %s5398_s15  ;;  %2307 = vst [vmem:[#allocation2 + $0x10] sm:$0xf] %v2306_v6  ;;  %v7080_v61 = vsel %vm6511_vm6, %v5066_v32, %v2833_v47 }
 0x288   :  { %v3532_v11 = vld [vmem:[#allocation2 + $0x70] sm:$0xf]  ;;  %2310 = vst [vmem:[#allocation2 + $0x14] sm:$0x1] %v2309_v8  ;;  %v5068_v36 = vrot.slane %v6957_v37, 9  ;;  %v2841_v52 = vrot.slane %v6959_v1, 5  ;;  %v1929_v18 = vadd.f32 %v6716_v39, %v1907_v38 }
 0x289   :  { %3574 = vrot.lane.b32.xlu0 %v3532_v11, %s5395_s16  ;;  %v3535_v50 = vld [vmem:[#allocation2 + $0x88] sm:$0xf]  ;;  %v3423_v35 = vrot.slane %v6980_v59, 5  ;;  %v5089_v44 = vrot.slane %v6982_v5, 9  ;;  %v5088_v58 = vrot.slane %v6971_v40, 9  ;;  %v5093_v63 = vrot.slane %v6973_v24, 9 }
 0x28a   :  { %v2954_v6 = vld [vmem:[#allocation2 + $0x68] sm:$0xf]  ;;  %v2845_v8 = vrot.slane %v6988_v17, 5  ;;  %v3348_v31 = vld [vmem:[#allocation2 + $0x64] sm:$0x1]  ;;  %v5086_v1 = vrot.slane %v6992_v10, 9  ;;  %v7016_v59 = vsel %vm6511_vm6, %v5081_v29, %v3407_v26  ;;  %v7084_v39 = vsel %vm6511_vm6, %v5068_v36, %v2841_v52 }
 0x28b   :  { %v3342_v37 = vld [vmem:[#allocation2 + $0x3c] sm:$0x1]  ;;  %v3352_v11 = vld [vmem:[#allocation2 + $0x74] sm:$0x1]  ;;  %v7007_v56 = vld [vmem:[#allocation2 + $0x60] sm:$0xe]  ;;  %3580 = vrot.lane.b32.xlu1 %v3535_v50, %s5395_s16  ;;  %v7097_v15 = vsel %vm6511_vm6, %v5085_v41, %v3423_v35 }
 0x28c   :  { %v2767_v34 = vld [vmem:[#allocation2 + $0x5c] sm:$0x1]  ;;  %v7034_v30 = vld [vmem:[#allocation2 + $0x6c] sm:$0x1]  ;;  %v7038_v26 = vld [vmem:[#allocation2 + $0x80] sm:$0xe] }
 0x28d   :  { %v3346_v4 = vld [vmem:[#allocation2 + $0x5c] sm:$0x1]  ;;  %v7036_v29 = vld [vmem:[#allocation2 + $0x6c] sm:$0x1]  ;;  %2996 = vrot.lane.b32.xlu0 %v2954_v6, %s5398_s15  ;;  %v2957_v28 = vld [vmem:[#allocation2 + $0x80] sm:$0xf] }
 0x28e   :  { %v3431_v12 = vrot.slane %v3348_v31, 5  ;;  %v3419_v51 = vrot.slane %v3342_v37, 5  ;;  %v7057_v0 = vld [vmem:[#allocation2 + $0x64] sm:$0x1]  ;;  %v3534_v13 = vld [vmem:[#allocation2 + $0x80] sm:$0xf] }
 0x28f   :  { %v2853_v60 = vrot.slane %v2767_v34, 5  ;;  %v3439_v14 = vrot.slane %v3352_v11, 5  ;;  %v3356_v2 = vld [vmem:[#allocation2 + $0x84] sm:$0x1]  ;;  %v7065_v19 = vld [vmem:[#allocation2 + $0x78] sm:$0xe]  ;;  %3002 = vrot.lane.b32.xlu1 %v2957_v28, %s5398_s15 }
 0x290   :  { %v3427_v25 = vrot.slane %v3346_v4, 5  ;;  %v2861_v27 = vrot.slane %v7034_v30, 5  ;;  %v3435_v43 = vrot.slane %v7036_v29, 5  ;;  %v5091_v22 = vrot.slane %v7038_v26, 9  ;;  %v7071_v17 = vld [vmem:[#allocation2 + $0x7c] sm:$0x1] }
 0x291   :  { %v5072_v7 = vrot.slane %v7007_v56, 9  ;;  %v2857_v55 = vrot.slane %v7057_v0, 5  ;;  %v7088_v4 = vld [vmem:[#allocation2 + $0x78] sm:$0xe]  ;;  %v7090_v34 = vld [vmem:[#allocation2 + $0x7c] sm:$0x1]  ;;  %3578 = vrot.lane.b32.xlu0 %v3534_v13, %s5395_s16 }
 0x292   :  { %v2959_v16 = vld [vmem:[#allocation2 + $0x90] sm:$0xf]  ;;  %v8381_v32 = vrot.slane %v6929_v3, 9  ;;  %v3447_v47 = vrot.slane %v3356_v2, 5  ;;  %v5075_v31 = vrot.slane %v7065_v19, 9  ;;  %v8382_v23 = vrot.slane %v6969_v57, 9 }
 0x293   :  { %v7106_v36 = vld [vmem:[#allocation2 + $0x94] sm:$0x1]  ;;  %v7108_v52 = vld [vmem:[#allocation2 + $0x70] sm:$0xe]  ;;  %v2956_v38 = vld [vmem:[#allocation2 + $0x78] sm:$0xf]  ;;  %3006 = vrot.lane.b32.xlu1 %v2959_v16, %s5398_s15  ;;  %v7150_v5 = vsel %vm6511_vm6, %v5086_v1, %v3427_v25 }
 0x294   :  { %v7103_v56 = vsel %vm6511_vm6, %v8381_v32, %v2845_v8  ;;  %v7114_v41 = vsel %vm6511_vm6, %v8382_v23, %v3431_v12  ;;  %v8383_v3 = vrot.slane %v6953_v21, 9  ;;  %v2869_v35 = vrot.slane %v7071_v17, 5  ;;  %v7123_v6 = vld [vmem:[#allocation2 + $0x74] sm:$0x1]  ;;  %v7125_v8 = vld [vmem:[#allocation2 + $0x88] sm:$0xe] }
 0x295   :  { %v1945_v37 = vmax.f32 %v1929_v18, 0.0  ;;  %v8384_v11 = vrot.slane %v6978_v62, 9  ;;  %v7137_v21 = vsel %vm6511_vm6, %v5089_v44, %v3439_v14  ;;  %v5090_v30 = vrot.slane %v7088_v4, 9  ;;  %v7141_v26 = vld [vmem:[#allocation2 + $0x8c] sm:$0x1]  ;;  %3000 = vrot.lane.b32.xlu0 %v2956_v38, %s5398_s15 }
 0x296   :  { %v7120_v50 = vsel %vm6511_vm6, %v8383_v3, %v3419_v51  ;;  %v3443_v29 = vrot.slane %v7090_v34, 5  ;;  %v2431_v28 = vld [vmem:[#allocation2 + $0x10] sm:$0xf]  ;;  %v3455_v44 = vrot.slane %v7106_v36, 5  ;;  %v7154_v51 = vld [vmem:[#allocation2 + $0x88] sm:$0xe]  ;;  %v7169_v17 = vsel %vm6511_vm6, %v5088_v58, %v3435_v43 }
 0x297   :  { %v7131_v57 = vsel %vm6511_vm6, %v8384_v11, %v2853_v60  ;;  %v7144_v62 = vld [vmem:[#allocation2 + $0x10] sm:$0xe]  ;;  %v5162_v0 = vpack.c.bf16 %v1945_v37, %v1945_v37  ;;  %v2865_v13 = vrot.slane %v7123_v6, 5  ;;  %v2488_v14 = vshrl.u32 %v2431_v28, 16  ;;  %v2433_v10 = vld [vmem:[#allocation2 + $0x18] sm:$0xf]  ;;  %3463 = vrot.lane.b32.xlu1 %v7016_v59, %s5394_s13 }
 0x298   :  { %v2491_v2 = vshll.u32 %v2431_v28, 16  ;;  %v3536_v19 = vld [vmem:[#allocation2 + $0x90] sm:$0xf]  ;;  %v2753_v18 = vld [vmem:[#allocation2 + $0x14] sm:$0x1]  ;;  %v8385_v1 = vrot.slane %v6961_v45, 9  ;;  %v7175_v38 = vsel %vm6511_vm6, %v5091_v22, %v3447_v47  ;;  %v7179_v45 = vsel %vm6511_vm6, %v5072_v7, %v2857_v55 }
 0x299   :  { %v2877_v4 = vrot.slane %v7141_v26, 5  ;;  %v2138_v34 = vshrl.u32 %v5162_v0, 16  ;;  %v3622_v16 = vld [vmem:[#allocation2 + $0x20] sm:$0xf]  ;;  %v5064_v32 = vrot.slane %v7144_v62, 9  ;;  %v5092_v40 = vrot.slane %v7154_v51, 9  ;;  %3582 = vrot.lane.b32.xlu0 %v3536_v19, %s5395_s16 }
 0x29a   :  { %v7163_v25 = vsel %vm6511_vm6, %v8385_v1, %v2861_v27  ;;  %v3358_v27 = vld [vmem:[#allocation2 + $0x8c] sm:$0x1]  ;;  %v3331_v23 = vld [vmem:[#allocation2 + $0x10] sm:$0xe]  ;;  %v2299_v58 = vld [vmem:[#allocation2 + $0x8] sm:$0xf]  ;;  %v7187_v59 = vsel %vm6511_vm6, %v5075_v31, %v2869_v35  ;;  %v7206_v53 = vsel %vm6511_vm6, %v5093_v63, %v3455_v44 }
 0x29b   :  { %v3332_v43 = vld [vmem:[#allocation2 + $0x14] sm:$0x1]  ;;  %v2140_v3 = vrot.slane %v2138_v34, 7  ;;  %v2141_v6 = vshll.u32 %v5162_v0, 16  ;;  %v2502_v37 = vshrl.u32 %v2433_v10, 16  ;;  %v2505_v11 = vshll.u32 %v2433_v10, 16  ;;  %2885 = vrot.lane.b32.xlu1 %v7024_v33, %s5395_s16 }
 0x29c   :  { %v2302_v22 = vld [vmem:[#allocation2 + $0xc] sm:$0x1]  ;;  %v2490_v47 = vrot.slane %v2488_v14, 4  ;;  %v2493_v26 = vrot.slane %v2491_v2, 5  ;;  %v3679_v7 = vshrl.u32 %v3622_v16, 16  ;;  %v3682_v55 = vshll.u32 %v3622_v16, 16 }
 0x29d   :  { %v2958_v28 = vld [vmem:[#allocation2 + $0x88] sm:$0xf]  ;;  %v2825_v62 = vrot.slane %v2753_v18, 5  ;;  %v3451_v51 = vrot.slane %v3358_v27, 5  ;;  %v2143_v1 = vor.u32 %v2141_v6, %v2140_v3  ;;  %v2144_v60 = vrot.slane %v2140_v3, 4 }
 0x29e   :  { %v3624_v12 = vld [vmem:[#allocation2 + $0x28] sm:$0xf]  ;;  %v7191_v0 = vsel %vm6511_vm6, %v5090_v30, %v3443_v29  ;;  %v5079_v10 = vrot.slane %v3331_v23, 9  ;;  %v3399_v19 = vrot.slane %v3332_v43, 5  ;;  %v2776_v14 = vld [vmem:[#allocation2 + $0x80] sm:$0xe]  ;;  %3004 = vrot.lane.b32.xlu0 %v2958_v28, %s5398_s15  ;;  %v2494_v30 = vor.u32 %v2493_v26, %v2490_v47 }
 0x29f   :  { %v2777_v2 = vld [vmem:[#allocation2 + $0x84] sm:$0x1]  ;;  %v2300_v18 = vsel %vm6751_vm10, %v2143_v1, %v2299_v58  ;;  %v2303_v34 = vsel %vm6494_vm0, %v2144_v60, %v2302_v22  ;;  %v2432_v16 = vld [vmem:[#allocation2 + $0x14] sm:$0x1]  ;;  %v2434_v31 = vld [vmem:[#allocation2 + $0x1c] sm:$0x1]  ;;  %v2826_v6 = vsel %vm6511_vm6, %v5064_v32, %v2825_v62  ;;  %3467 = vrot.lane.b32.xlu1 %v7047_v49, %s5394_s13 }
 0x2a0   :  { %v2504_v35 = vrot.slane %v2502_v37, 4  ;;  %v2507_v27 = vrot.slane %v2505_v11, 5  ;;  %2301 = vst [vmem:[#allocation2 + $0x8] sm:$0xf] %v2300_v18  ;;  %2304 = vst [vmem:[#allocation2 + $0xc] sm:$0x1] %v2303_v34 }
 0x2a1   :  { %v3623_v29 = vld [vmem:[#allocation2 + $0x24] sm:$0x1]  ;;  %v3681_v23 = vrot.slane %v3679_v7, 4  ;;  %v3684_v43 = vrot.slane %v3682_v55, 5  ;;  %v3693_v3 = vshrl.u32 %v3624_v12, 16  ;;  %v8386_v46 = vrot.slane %v7108_v52, 9 }
 0x2a2   :  { %v5076_v60 = vrot.slane %v2776_v14, 9  ;;  %v3696_v58 = vshll.u32 %v3624_v12, 16  ;;  %v8387_v37 = vrot.slane %v7125_v8, 9  ;;  %v2497_v36 = vshll.u32 %v2432_v16, 16  ;;  %v3625_v44 = vld [vmem:[#allocation2 + $0x2c] sm:$0x1]  ;;  %3461 = vrot.lane.b32.xlu0 %v7032_v48, %s5394_s13 }
 0x2a3   :  { %v7212_v33 = vsel %vm6511_vm6, %v8386_v46, %v2865_v13  ;;  %v2511_v63 = vshll.u32 %v2434_v31, 16  ;;  %v2435_v11 = vld [vmem:[#allocation2 + $0x20] sm:$0xf]  ;;  %v7226_v52 = vsel %vm6511_vm6, %v5092_v40, %v3451_v51  ;;  %v2873_v12 = vrot.slane %v2777_v2, 5  ;;  %v2437_v22 = vld [vmem:[#allocation2 + $0x28] sm:$0xf]  ;;  %2889 = vrot.lane.b32.xlu1 %v7055_v42, %s5395_s16 }
 0x2a4   :  { %v7220_v24 = vsel %vm6511_vm6, %v8387_v37, %v2877_v4  ;;  %v2508_v13 = vor.u32 %v2507_v27, %v2504_v35  ;;  %v3688_v32 = vshll.u32 %v3623_v29, 16  ;;  %v7232_v8 = vsel %vm6511_vm6, %v5079_v10, %v3399_v19  ;;  %v2436_v49 = vld [vmem:[#allocation2 + $0x24] sm:$0x1]  ;;  %v3626_v7 = vld [vmem:[#allocation2 + $0x30] sm:$0xf] }
 0x2a5   :  { %v7234_v4 = vrot.slane %v2494_v30, 4  ;;  %v3685_v47 = vor.u32 %v3684_v43, %v3681_v23  ;;  %v3695_v26 = vrot.slane %v3693_v3, 4  ;;  %v3698_v55 = vrot.slane %v3696_v58, 5  ;;  %v3628_v34 = vld [vmem:[#allocation2 + $0x38] sm:$0xf] }
 0x2a6   :  { %v3702_v40 = vshll.u32 %v3625_v44, 16  ;;  %v2516_v28 = vshrl.u32 %v2435_v11, 16  ;;  %v2519_v62 = vshll.u32 %v2435_v11, 16  ;;  %v7236_v51 = vrot.slane %v2497_v36, 5  ;;  %2883 = vrot.lane.b32.xlu0 %v2826_v6, %s5395_s16  ;;  %v2438_v27 = vld [vmem:[#allocation2 + $0x2c] sm:$0x1] }
 0x2a7   :  { %v7238_v1 = vrot.slane %v2511_v63, 5  ;;  %v2530_v14 = vshrl.u32 %v2437_v22, 16  ;;  %v2533_v48 = vshll.u32 %v2437_v22, 16  ;;  %v7242_v10 = vrot.slane %v2508_v13, 4  ;;  %v3627_v30 = vld [vmem:[#allocation2 + $0x34] sm:$0x1]  ;;  %3471 = vrot.lane.b32.xlu1 %v7097_v15, %s5394_s13 }
 0x2a8   :  { %v2525_v19 = vshll.u32 %v2436_v49, 16  ;;  %v3707_v2 = vshrl.u32 %v3626_v7, 16  ;;  %v3710_v18 = vshll.u32 %v3626_v7, 16  ;;  %v7247_v16 = vsel %vm6511_vm6, %v5076_v60, %v2873_v12  ;;  %v2439_v46 = vld [vmem:[#allocation2 + $0x30] sm:$0xf] }
 0x2a9   :  { %v7253_v35 = vrot.slane %v3685_v47, 4  ;;  %v7255_v42 = vrot.slane %v3688_v32, 5  ;;  %v3699_v29 = vor.u32 %v3698_v55, %v3695_v26  ;;  %v7257_v23 = vrot.slane %v3702_v40, 5  ;;  %v2441_v36 = vld [vmem:[#allocation2 + $0x38] sm:$0xf] }
 0x2aa   :  { %v2518_v43 = vrot.slane %v2516_v28, 4  ;;  %v2521_v3 = vrot.slane %v2519_v62, 5  ;;  %v2532_v58 = vrot.slane %v2530_v14, 4  ;;  %v2535_v60 = vrot.slane %v2533_v48, 5  ;;  %3465 = vrot.lane.b32.xlu0 %v7063_v54, %s5394_s13  ;;  %v3329_v13 = vld [vmem:[#allocation2 + $0x8] sm:$0xe] }
 0x2ab   :  { %v3721_v6 = vshrl.u32 %v3628_v34, 16  ;;  %v3724_v37 = vshll.u32 %v3628_v34, 16  ;;  %v7261_v63 = vrot.slane %v2525_v19, 5  ;;  %v2539_v44 = vshll.u32 %v2438_v27, 16  ;;  %v3330_v32 = vld [vmem:[#allocation2 + $0xc] sm:$0x1]  ;;  %2893 = vrot.lane.b32.xlu1 %v7103_v56, %s5395_s16 }
 0x2ac   :  { %v3709_v11 = vrot.slane %v3707_v2, 4  ;;  %v3712_v12 = vrot.slane %v3710_v18, 5  ;;  %v2544_v47 = vshrl.u32 %v2439_v46, 16  ;;  %v2547_v26 = vshll.u32 %v2439_v46, 16  ;;  %v2750_v54 = vld [vmem:[#allocation2 + $0x8] sm:$0xe] }
 0x2ad   :  { %v7273_v49 = vrot.slane %v3699_v29, 4  ;;  %v3716_v7 = vshll.u32 %v3627_v30, 16  ;;  %v2558_v55 = vshrl.u32 %v2441_v36, 16  ;;  %v2561_v40 = vshll.u32 %v2441_v36, 16  ;;  %v3629_v14 = vld [vmem:[#allocation2 + $0x3c] sm:$0x1] }
 0x2ae   :  { %v2522_v28 = vor.u32 %v2521_v3, %v2518_v43  ;;  %v2536_v62 = vor.u32 %v2535_v60, %v2532_v58  ;;  %v3723_v48 = vrot.slane %v3721_v6, 4  ;;  %v3726_v19 = vrot.slane %v3724_v37, 5  ;;  %v3630_v2 = vld [vmem:[#allocation2 + $0x40] sm:$0xf]  ;;  %v2751_v27 = vld [vmem:[#allocation2 + $0xc] sm:$0x1]  ;;  %2887 = vrot.lane.b32.xlu0 %v7080_v61, %s5395_s16 }
 0x2af   :  { %v5078_v18 = vrot.slane %v3329_v13, 9  ;;  %v3395_v34 = vrot.slane %v3330_v32, 5  ;;  %v7277_v15 = vrot.slane %v2539_v44, 5  ;;  %v3713_v29 = vor.u32 %v3712_v12, %v3709_v11  ;;  %v2440_v30 = vld [vmem:[#allocation2 + $0x34] sm:$0x1]  ;;  %3475 = vrot.lane.b32.xlu1 %v7114_v41, %s5394_s13 }
 0x2b0   :  { %v2546_v46 = vrot.slane %v2544_v47, 4  ;;  %v2549_v43 = vrot.slane %v2547_v26, 5  ;;  %v2560_v3 = vrot.slane %v2558_v55, 4  ;;  %v2563_v58 = vrot.slane %v2561_v40, 5  ;;  %v2442_v6 = vld [vmem:[#allocation2 + $0x3c] sm:$0x1] }
 0x2b1   :  { %v5063_v60 = vrot.slane %v2750_v54, 9  ;;  %v3735_v37 = vshrl.u32 %v3630_v2, 16  ;;  %v3738_v36 = vshll.u32 %v3630_v2, 16  ;;  %v2821_v44 = vrot.slane %v2751_v27, 5  ;;  %v2445_v12 = vld [vmem:[#allocation2 + $0x58] sm:$0xf] }
 0x2b2   :  { %v7285_v13 = vrot.slane %v2522_v28, 4  ;;  %v7287_v11 = vrot.slane %v2536_v62, 4  ;;  %v3727_v61 = vor.u32 %v3726_v19, %v3723_v48  ;;  %v7293_v32 = vsel %vm6511_vm6, %v5078_v18, %v3395_v34  ;;  %v3634_v40 = vld [vmem:[#allocation2 + $0x60] sm:$0xf]  ;;  %3469 = vrot.lane.b32.xlu0 %v7120_v50, %s5394_s13  ;;  %v3631_v19 = vld [vmem:[#allocation2 + $0x44] sm:$0x1] }
 0x2b3   :  { %v7295_v47 = vrot.slane %v3716_v7, 5  ;;  %v3730_v26 = vshll.u32 %v3629_v14, 16  ;;  %v2553_v55 = vshll.u32 %v2440_v30, 16  ;;  %v7299_v54 = vrot.slane %v3713_v29, 4  ;;  %v2446_v18 = vld [vmem:[#allocation2 + $0x5c] sm:$0x1]  ;;  %2897 = vrot.lane.b32.xlu1 %v7131_v57, %s5395_s16 }
 0x2b4   :  { %v2550_v28 = vor.u32 %v2549_v43, %v2546_v46  ;;  %v2564_v62 = vor.u32 %v2563_v58, %v2560_v3  ;;  %v2567_v48 = vshll.u32 %v2442_v6, 16  ;;  %v3737_v2 = vrot.slane %v3735_v37, 4  ;;  %v3636_v3 = vld [vmem:[#allocation2 + $0x68] sm:$0xf]  ;;  %v2447_v37 = vld [vmem:[#allocation2 + $0x60] sm:$0xf] }
 0x2b5   :  { %v3740_v41 = vrot.slane %v3738_v36, 5  ;;  %v2586_v27 = vshrl.u32 %v2445_v12, 16  ;;  %v2589_v56 = vshll.u32 %v2445_v12, 16  ;;  %v7303_v7 = vsel %vm6511_vm6, %v5063_v60, %v2821_v44  ;;  %v2448_v31 = vld [vmem:[#allocation2 + $0x64] sm:$0x1] }
 0x2b6   :  { %v7309_v50 = vrot.slane %v3727_v61, 4  ;;  %v3763_v34 = vshrl.u32 %v3634_v40, 16  ;;  %v7317_v30 = vrot.slane %v3730_v26, 5  ;;  %v7319_v46 = vrot.slane %v2553_v55, 5  ;;  %2891 = vrot.lane.b32.xlu0 %v7084_v39, %s5395_s16  ;;  %v2449_v26 = vld [vmem:[#allocation2 + $0x68] sm:$0xf] }
 0x2b7   :  { %v3766_v43 = vshll.u32 %v3634_v40, 16  ;;  %v7327_v57 = vrot.slane %v2550_v28, 4  ;;  %v7329_v60 = vrot.slane %v2567_v48, 5  ;;  %v3744_v6 = vshll.u32 %v3631_v19, 16  ;;  %v3635_v40 = vld [vmem:[#allocation2 + $0x64] sm:$0x1]  ;;  %3479 = vrot.lane.b32.xlu1 %v7137_v21, %s5394_s13 }
 0x2b8   :  { %8388 = vst [vmem:[#allocation8_spill] sm:$0xff] %v7319_v46  ;;  %v7331_v36 = vrot.slane %v2564_v62, 4  ;;  %v3741_v44 = vor.u32 %v3740_v41, %v3737_v2  ;;  %v2588_v61 = vrot.slane %v2586_v27, 4  ;;  %v2591_v12 = vrot.slane %v2589_v56, 5  ;;  %v3638_v2 = vld [vmem:[#allocation2 + $0x70] sm:$0xf] }
 0x2b9   :  { %8389 = vst [vmem:[#allocation9_spill] sm:$0xff] %v7327_v57  ;;  %v2595_v55 = vshll.u32 %v2446_v18, 16  ;;  %v3765_v58 = vrot.slane %v3763_v34, 4  ;;  %v3777_v28 = vshrl.u32 %v3636_v3, 16  ;;  %v3768_v48 = vrot.slane %v3766_v43, 5 }
 0x2ba   :  { %v3780_v19 = vshll.u32 %v3636_v3, 16  ;;  %v2600_v62 = vshrl.u32 %v2447_v37, 16  ;;  %v2603_v14 = vshll.u32 %v2447_v37, 16  ;;  %3473 = vrot.lane.b32.xlu0 %v7150_v5, %s5394_s13  ;;  %v7345_v41 = vrot.slane %v3744_v6, 5  ;;  %v3637_v37 = vld [vmem:[#allocation2 + $0x6c] sm:$0x1] }
 0x2bb   :  { %v2614_v27 = vshrl.u32 %v2449_v26, 16  ;;  %v2617_v18 = vshll.u32 %v2449_v26, 16  ;;  %v7351_v34 = vrot.slane %v3741_v44, 4  ;;  %v2592_v43 = vor.u32 %v2591_v12, %v2588_v61  ;;  %v3640_v5 = vld [vmem:[#allocation2 + $0x78] sm:$0xf]  ;;  %2901 = vrot.lane.b32.xlu1 %v7163_v25, %s5395_s16 }
 0x2bc   :  { %v3772_v3 = vshll.u32 %v3635_v40, 16  ;;  %v7353_v39 = vrot.slane %v2595_v55, 5  ;;  %v3779_v29 = vrot.slane %v3777_v28, 4  ;;  %v3791_v56 = vshrl.u32 %v3638_v2, 16  ;;  %v2450_v21 = vld [vmem:[#allocation2 + $0x6c] sm:$0x1] }
 0x2bd   :  { %v3794_v6 = vshll.u32 %v3638_v2, 16  ;;  %v3769_v26 = vor.u32 %v3768_v48, %v3765_v58  ;;  %v3782_v22 = vrot.slane %v3780_v19, 5  ;;  %v2602_v9 = vrot.slane %v2600_v62, 4  ;;  %v2451_v44 = vld [vmem:[#allocation2 + $0x70] sm:$0xf]  ;;  %v5321_v61 = vld [vmem:[%s8349_s4 + $0x78] sm:$0xff]  }
 0x2be   :  { %v2605_v46 = vrot.slane %v2603_v14, 5  ;;  %3477 = vrot.lane.b32.xlu0 %v7169_v17, %s5394_s13  ;;  %v2616_v12 = vrot.slane %v2614_v27, 4  ;;  %v2619_v55 = vrot.slane %v2617_v18, 5  ;;  %v3805_v40 = vshrl.u32 %v3640_v5, 16  ;;  %v5322_v25 = vld [vmem:[%s8349_s4 + $0x38] sm:$0xff]   ;;  %5272 = vmatprep.subr.bf16.mxu1 %v5321_v61  ;;  %v5323_v62 = vld [vmem:[%s8349_s4 + $0x70] sm:$0xff]  }
 0x2bf   :  { %v3808_v28 = vshll.u32 %v3640_v5, 16  ;;  %v7365_v58 = vrot.slane %v2592_v43, 4  ;;  %v7367_v14 = vrot.slane %v3772_v3, 5  ;;  %v3786_v48 = vshll.u32 %v3637_v37, 16  ;;  %5178 = vmatprep.subr.bf16.mxu0 %v5321_v61  ;;  %v2453_v5 = vld [vmem:[#allocation2 + $0x78] sm:$0xf]  ;;  %5280 = vmatpush3.bf16.msra.mxu1 %v5322_v25 }
 0x2c0   :  { %v2609_v19 = vshll.u32 %v2448_v31, 16  ;;  %v3793_v17 = vrot.slane %v3791_v56, 4  ;;  %v3796_v2 = vrot.slane %v3794_v6, 5  ;;  %v2628_v27 = vshrl.u32 %v2451_v44, 16  ;;  %5179 = vmatpush3.bf16.msra.mxu0 %v5322_v25  ;;  %3483 = vrot.lane.b32.xlu1 %v7175_v38, %s5394_s13  ;;  %v3639_v61 = vld [vmem:[#allocation2 + $0x74] sm:$0x1]  ;;  %v7382_v38 = vpop.permute.xlu1 %3568 }
 0x2c1   :  { %8390 = vst [vmem:[#allocation10_spill] sm:$0xff] %v7367_v14  ;;  %v2631_v18 = vshll.u32 %v2451_v44, 16  ;;  %v7378_v43 = vrot.slane %v3769_v26, 4  ;;  %v3783_v3 = vor.u32 %v3782_v22, %v3779_v29  ;;  %v2606_v37 = vor.u32 %v2605_v46, %v2602_v9  ;;  %5273 = vmatprep.subr.bf16.mxu1 %v5323_v62  ;;  %v3641_v44 = vld [vmem:[#allocation2 + $0x7c] sm:$0x1]  ;;  %5180 = vmatprep.subr.bf16.mxu0 %v5323_v62 }
 0x2c2   :  { %2899 = vrot.lane.b32.xlu0 %v7179_v45, %s5395_s16  ;;  %v2620_v56 = vor.u32 %v2619_v55, %v2616_v12  ;;  %v2623_v6 = vshll.u32 %v2450_v21, 16  ;;  %v3807_v25 = vrot.slane %v3805_v40, 4  ;;  %v3810_v57 = vrot.slane %v3808_v28, 5  ;;  %8391 = vst [vmem:[#allocation11_spill] sm:$0xff] %v7382_v38  ;;  %v2452_v9 = vld [vmem:[#allocation2 + $0x74] sm:$0x1] }
 0x2c3   :  { %v7388_v22 = vrot.slane %v3786_v48, 5  ;;  %v2454_v29 = vld [vmem:[#allocation2 + $0x7c] sm:$0x1]  ;;  %v2642_v46 = vshrl.u32 %v2453_v5, 16  ;;  %v2645_v31 = vshll.u32 %v2453_v5, 16  ;;  %v7390_v45 = vrot.slane %v2609_v19, 5 }
 0x2c4   :  { %v3797_v21 = vor.u32 %v3796_v2, %v3793_v17  ;;  %v2630_v12 = vrot.slane %v2628_v27, 4  ;;  %v2633_v55 = vrot.slane %v2631_v18, 5  ;;  %v3642_v40 = vld [vmem:[#allocation2 + $0x80] sm:$0xf]  ;;  %2905 = vrot.lane.b32.xlu1 %v7187_v59, %s5395_s16  ;;  %v7394_v28 = vrot.slane %v3783_v3, 4  ;;  %v5324_v18 = vld [vmem:[%s8349_s4 + $0x30] sm:$0xff]  }
 0x2c5   :  { %8392 = vst [vmem:[#allocation12_spill] sm:$0xff] %v7390_v45  ;;  %v7396_v62 = vrot.slane %v2606_v37, 4  ;;  %v3800_v26 = vshll.u32 %v3639_v61, 16  ;;  %v3814_v48 = vshll.u32 %v3641_v44, 16  ;;  %v3643_v38 = vld [vmem:[#allocation2 + $0x84] sm:$0x1]  ;;  %v3811_v59 = vor.u32 %v3810_v57, %v3807_v25  ;;  %5281 = vmatpush3.bf16.msra.mxu1 %v5324_v18  ;;  %5181 = vmatpush3.bf16.msra.mxu0 %v5324_v18 }
 0x2c6   :  { %3481 = vrot.lane.b32.xlu0 %v7191_v0, %s5394_s13  ;;  %v7404_v17 = vrot.slane %v2620_v56, 4  ;;  %v7406_v2 = vrot.slane %v2623_v6, 5  ;;  %v3644_v27 = vld [vmem:[#allocation2 + $0x88] sm:$0xf]  ;;  %v2644_v5 = vrot.slane %v2642_v46, 4  ;;  %v2647_v3 = vrot.slane %v2645_v31, 5  ;;  %v7421_v31 = vpop.permute.xlu1 %3888 }
 0x2c7   :  { %8393 = vst [vmem:[#allocation13_spill] sm:$0xff] %v7396_v62  ;;  %v3819_v37 = vshrl.u32 %v3642_v40, 16  ;;  %v3822_v61 = vshll.u32 %v3642_v40, 16  ;;  %v5325_v0 = vld [vmem:[%s8349_s4 + $0x68] sm:$0xff]   ;;  %v7414_v44 = vrot.slane %v3797_v21, 4  ;;  %v2634_v56 = vor.u32 %v2633_v55, %v2630_v12  ;;  %8395 = vst [vmem:[#allocation15_spill] sm:$0xff] %v7421_v31 }
 0x2c8   :  { %v2637_v19 = vshll.u32 %v2452_v9, 16  ;;  %v2651_v6 = vshll.u32 %v2454_v29, 16  ;;  %v3645_v14 = vld [vmem:[#allocation2 + $0x8c] sm:$0x1]  ;;  %3487 = vrot.lane.b32.xlu1 %v7206_v53, %s5394_s13  ;;  %v7431_v29 = vrot.slane %v3800_v26, 5  ;;  %v7433_v46 = vrot.slane %v3814_v48, 5  ;;  %5274 = vmatprep.subr.bf16.mxu1 %v5325_v0 }
 0x2c9   :  { %8394 = vst [vmem:[#allocation14_spill] sm:$0xff] %v7414_v44  ;;  %v5326_v57 = vld [vmem:[%s8349_s4 + $0x28] sm:$0xff]   ;;  %v2455_v21 = vld [vmem:[#allocation2 + $0x80] sm:$0xf]  ;;  %v7444_v55 = vrot.slane %v3811_v59, 4  ;;  %v3828_v26 = vshll.u32 %v3643_v38, 16  ;;  %5182 = vmatprep.subr.bf16.mxu0 %v5325_v0  ;;  %v2648_v18 = vor.u32 %v2647_v3, %v2644_v5 }
 0x2ca   :  { %8396 = vst [vmem:[#allocation16_spill] sm:$0xff] %v7431_v29  ;;  %8397 = vst [vmem:[#allocation17_spill] sm:$0xff] %v7433_v46  ;;  %v5327_v53 = vld [vmem:[%s8349_s4 + $0x60] sm:$0xff]   ;;  %2903 = vrot.lane.b32.xlu0 %v7212_v33, %s5395_s16  ;;  %v3833_v40 = vshrl.u32 %v3644_v27, 16  ;;  %v3821_v9 = vrot.slane %v3819_v37, 4  ;;  %v3824_v25 = vrot.slane %v3822_v61, 5  ;;  %5282 = vmatpush3.bf16.msra.mxu1 %v5326_v57 }
 0x2cb   :  { %8398 = vst [vmem:[#allocation18_spill] sm:$0xff] %v7444_v55  ;;  %v3047_v48 = vld [vmem:[#allocation2 + $0x20] sm:$0xf]  ;;  %v3836_v31 = vshll.u32 %v3644_v27, 16  ;;  %v7450_v45 = vrot.slane %v2634_v56, 4  ;;  %v7452_v62 = vrot.slane %v2637_v19, 5  ;;  %5183 = vmatpush3.bf16.msra.mxu0 %v5326_v57  ;;  %5275 = vmatprep.subr.bf16.mxu1 %v5327_v53 }
 0x2cc   :  { %v7454_v12 = vrot.slane %v2651_v6, 5  ;;  %v2457_v59 = vld [vmem:[#allocation2 + $0x88] sm:$0xf]  ;;  %2909 = vrot.lane.b32.xlu1 %v7220_v24, %s5395_s16  ;;  %v3842_v38 = vshll.u32 %v3645_v14, 16  ;;  %v7458_v5 = vld [vmem:[#allocation2 + $0x84] sm:$0x1]  ;;  %5184 = vmatprep.subr.bf16.mxu0 %v5327_v53  ;;  %v7470_v6 = vpop.permute.xlu1 %3584 }
 0x2cd   :  { %8399 = vst [vmem:[#allocation19_spill] sm:$0xff] %v7450_v45  ;;  %8400 = vst [vmem:[#allocation20_spill] sm:$0xff] %v7452_v62  ;;  %v2656_v27 = vshrl.u32 %v2455_v21, 16  ;;  %v2659_v3 = vshll.u32 %v2455_v21, 16  ;;  %v3048_v37 = vld [vmem:[#allocation2 + $0x24] sm:$0x1]  ;;  %v3825_v21 = vor.u32 %v3824_v25, %v3821_v9 }
 0x2ce   :  { %8401 = vst [vmem:[#allocation21_spill] sm:$0xff] %v7454_v12  ;;  %v3116_v61 = vshrl.u32 %v3047_v48, 16  ;;  %3485 = vrot.lane.b32.xlu0 %v7226_v52, %s5394_s13  ;;  %v7466_v0 = vrot.slane %v3828_v26, 5  ;;  %v7468_v56 = vrot.slane %v3833_v40, 4  ;;  %v3119_v24 = vshll.u32 %v3047_v48, 16  ;;  %8402 = vst [vmem:[#allocation22_spill] sm:$0xff] %v7470_v6 }
 0x2cf   :  { %v3646_v14 = vld [vmem:[#allocation2 + $0x90] sm:$0xf]  ;;  %v7472_v57 = vrot.slane %v2648_v18, 4  ;;  %v7474_v33 = vrot.slane %v3836_v31, 5  ;;  %v3045_v29 = vld [vmem:[#allocation2 + $0x18] sm:$0xf] }
 0x2d0   :  { %v3118_v52 = vrot.slane %v3116_v61, 4  ;;  %v5328_v19 = vld [vmem:[%s8349_s4 + $0x20] sm:$0xff]   ;;  %v2670_v26 = vshrl.u32 %v2457_v59, 16  ;;  %v2673_v44 = vshll.u32 %v2457_v59, 16  ;;  %v3121_v40 = vrot.slane %v3119_v24, 5  ;;  %v5329_v53 = vld [vmem:[%s8349_s4 + $0x58] sm:$0xff]   ;;  %3459 = vrot.lane.b32.xlu1 %v7232_v8, %s5394_s13  ;;  %v7509_v45 = vpop.permute.xlu1 %3904 }
 0x2d1   :  { %8403 = vst [vmem:[#allocation23_spill] sm:$0xff] %v7472_v57  ;;  %v3125_v46 = vshll.u32 %v3048_v37, 16  ;;  %v7488_v25 = vrot.slane %v3842_v38, 5  ;;  %v2658_v9 = vrot.slane %v2656_v27, 4  ;;  %v2661_v48 = vrot.slane %v2659_v3, 5  ;;  %5283 = vmatpush3.bf16.msra.mxu1 %v5328_v19  ;;  %v5330_v18 = vld [vmem:[%s8349_s4 + $0x18] sm:$0xff]   ;;  %5185 = vmatpush3.bf16.msra.mxu0 %v5328_v19 }
 0x2d2   :  { %2907 = vrot.lane.b32.xlu0 %v7247_v16, %s5395_s16  ;;  %v2665_v59 = vshll.u32 %v7458_v5, 16  ;;  %v2458_v8 = vld [vmem:[#allocation2 + $0x8c] sm:$0x1]  ;;  %v3122_v37 = vor.u32 %v3121_v40, %v3118_v52  ;;  %v3847_v61 = vshrl.u32 %v3646_v14, 16  ;;  %v3850_v24 = vshll.u32 %v3646_v14, 16  ;;  %5276 = vmatprep.subr.bf16.mxu1 %v5329_v53  ;;  %v5331_v38 = vld [vmem:[%s8349_s4 + $0x50] sm:$0xff]  }
 0x2d3   :  { %v7503_v3 = vrot.slane %v3825_v21, 4  ;;  %v3839_v16 = vor.u32 %v7474_v33, %v7468_v56  ;;  %v3102_v5 = vshrl.u32 %v3045_v29, 16  ;;  %v3051_v31 = vld [vmem:[#allocation2 + $0x30] sm:$0xf]  ;;  %v2672_v52 = vrot.slane %v2670_v26, 4  ;;  %5186 = vmatprep.subr.bf16.mxu0 %v5329_v53  ;;  %v8451_v20 = vld [vmem:[#allocation15_spill] sm:$0xff] }
 0x2d4   :  { %v2675_v14 = vrot.slane %v2673_v44, 5  ;;  %v3123_v40 = vrot.slane %v3122_v37, 4  ;;  %v3127_v6 = vrot.slane %v3125_v46, 5  ;;  %v3046_v62 = vld [vmem:[#allocation2 + $0x1c] sm:$0x1]  ;;  %2881 = vrot.lane.b32.xlu1 %v7303_v7, %s5395_s16  ;;  %v2662_v27 = vor.u32 %v2661_v48, %v2658_v9 }
 0x2d5   :  { %v2679_v21 = vshll.u32 %v2458_v8, 16  ;;  %v2429_v12 = vld [vmem:[#allocation2 + $0x8] sm:$0xf]  ;;  %v3104_v57 = vrot.slane %v3102_v5, 4  ;;  %v3105_v55 = vshll.u32 %v3045_v29, 16  ;;  %5284 = vmatpush3.bf16.msra.mxu1 %v5330_v18  ;;  %v3849_v46 = vrot.slane %v3847_v61, 4  ;;  %5187 = vmatpush3.bf16.msra.mxu0 %v5330_v18 }
 0x2d6   :  { %3457 = vrot.lane.b32.xlu0 %v7293_v32, %s5394_s13  ;;  %v3128_v44 = vsel %vm5480_vm2, %v3123_v40, %v3127_v6  ;;  %v3852_v33 = vrot.slane %v3850_v24, 5  ;;  %v3052_v19 = vld [vmem:[#allocation2 + $0x34] sm:$0x1]  ;;  %v3144_v56 = vshrl.u32 %v3051_v31, 16  ;;  %5277 = vmatprep.subr.bf16.mxu1 %v5331_v38  ;;  %v7515_v7 = vrot.slane %v2665_v59, 5  ;;  %v5333_v5 = vld [vmem:[%s8349_s4 + $0x48] sm:$0xff]   ;;  %v7553_v40 = vpop.permute.xlu1 %3560 }
 0x2d7   :  { %3316 = vst.msk [vmem:[#allocation3 + $0x28] sm:$0xf] %vm1961_vm3, %v3128_v44  ;;  %v7518_v26 = vld [vmem:[#allocation2 + $0x94] sm:$0x1]  ;;  %v3107_v53 = vrot.slane %v3105_v55, 5  ;;  %v3111_v29 = vshll.u32 %v3046_v62, 16  ;;  %v2676_v6 = vor.u32 %v2675_v14, %v2672_v52  ;;  %5188 = vmatprep.subr.bf16.mxu0 %v5331_v38  ;;  %v8404_v62 = vsel %vm5480_vm2, %v7242_v10, %v7238_v1 }
 0x2d8   :  { %v3147_v9 = vshll.u32 %v3051_v31, 16  ;;  %v2474_v48 = vshrl.u32 %v2429_v12, 16  ;;  %v3146_v8 = vrot.slane %v3144_v56, 4  ;;  %v7524_v37 = vld [vmem:[#allocation2 + $0x10] sm:$0xf]  ;;  %2689 = vrot.lane.b32.xlu1 %v8404_v62, %s5394_s13  ;;  %v2477_v55 = vshll.u32 %v2429_v12, 16 }
 0x2d9   :  { %v5332_v59 = vld [vmem:[%s8349_s4 + $0x10] sm:$0xff]   ;;  %v3108_v31 = vor.u32 %v3107_v53, %v3104_v57  ;;  %v3153_v61 = vshll.u32 %v3052_v19, 16  ;;  %v3055_v24 = vld [vmem:[#allocation2 + $0x40] sm:$0xf]  ;;  %v8405_v38 = vsel %vm5480_vm2, %v7234_v4, %v7236_v51  ;;  %v7544_v52 = vrot.slane %v3839_v16, 4  ;;  %v5334_v14 = vld [vmem:[%s8349_s4 + $0x8] sm:$0xff]  }
 0x2da   :  { %v3149_v18 = vrot.slane %v3147_v9, 5  ;;  %2687 = vrot.lane.b32.xlu0 %v8405_v38, %s5394_s13  ;;  %v7546_v1 = vrot.slane %v2662_v27, 4  ;;  %v7548_v10 = vrot.slane %v2679_v21, 5  ;;  %v3853_v12 = vor.u32 %v3852_v33, %v3849_v46  ;;  %v3056_v57 = vld [vmem:[#allocation2 + $0x44] sm:$0x1]  ;;  %5285 = vmatpush3.bf16.msra.mxu1 %v5332_v59  ;;  %v7561_v21 = vpop.permute.xlu0 %3558 }
 0x2db   :  { %v3109_v44 = vrot.slane %v3108_v31, 4  ;;  %v3113_v19 = vrot.slane %v3111_v29, 5  ;;  %v3651_v4 = vshrl.u32 %v7524_v37, 16  ;;  %v7556_v51 = vld [vmem:[#allocation2 + $0x18] sm:$0xf]  ;;  %5278 = vmatprep.subr.bf16.mxu1 %v5333_v5  ;;  %v5335_v16 = vld [vmem:[%s8349_s4 + $0x40] sm:$0xff]   ;;  %5189 = vmatpush3.bf16.msra.mxu0 %v5332_v59 }
 0x2dc   :  { %v3150_v56 = vor.u32 %v3149_v18, %v3146_v8  ;;  %v3049_v27 = vld [vmem:[#allocation2 + $0x28] sm:$0xf]  ;;  %v7563_v46 = vrot.slane %v2676_v6, 4  ;;  %v7566_v53 = vrot.slane %v2474_v48, 4  ;;  %v3172_v29 = vshrl.u32 %v3055_v24, 16  ;;  %5190 = vmatprep.subr.bf16.mxu0 %v5333_v5 }
 0x2dd   :  { %v3050_v9 = vld [vmem:[#allocation2 + $0x2c] sm:$0x1]  ;;  %v8406_v8 = vsel %vm5480_vm2, %v7273_v49, %v7257_v23  ;;  %v7574_v62 = vrot.slane %v2477_v55, 5  ;;  %v3114_v6 = vsel %vm5480_vm2, %v3109_v44, %v3113_v19  ;;  %v3155_v31 = vrot.slane %v3153_v61, 5  ;;  %v3059_v18 = vld [vmem:[#allocation2 + $0x60] sm:$0xf]  ;;  %v7587_v44 = vpop.permute.xlu1 %2982 }
 0x2de   :  { %3880 = vrot.lane.b32.xlu1 %v8406_v8, %s5398_s15  ;;  %v3151_v59 = vrot.slane %v3150_v56, 4  ;;  %v8407_v48 = vsel %vm5480_vm2, %v7253_v35, %v7255_v42  ;;  %v7584_v5 = vrot.slane %v3853_v12, 4  ;;  %3315 = vst.msk [vmem:[#allocation3 + $0x1c] sm:$0xf] %vm1961_vm3, %v3114_v6  ;;  %v3174_v23 = vrot.slane %v3172_v29, 4  ;;  %5286 = vmatpush3.bf16.msra.mxu1 %v5334_v14  ;;  %v7594_v12 = vpop.permute.xlu0 %2980  ;;  %v7624_v56 = vld [vmem:[%s8349_s4 + $0x88] sm:$0xff]  }
 0x2df   :  { %3878 = vrot.lane.b32.xlu0 %v8407_v48, %s5398_s15  ;;  %v3175_v49 = vshll.u32 %v3055_v24, 16  ;;  %v3181_v55 = vshll.u32 %v3056_v57, 16  ;;  %v3060_v38 = vld [vmem:[#allocation2 + $0x64] sm:$0x1]  ;;  %v7591_v19 = vrot.slane %v3651_v4, 4  ;;  %v3130_v35 = vshrl.u32 %v3049_v27, 16  ;;  %5279 = vmatprep.subr.bf16.mxu1 %v5335_v16 }
 0x2e0   :  { %v3156_v61 = vsel %vm5480_vm2, %v3151_v59, %v3155_v31  ;;  %v3053_v42 = vld [vmem:[#allocation2 + $0x38] sm:$0xf]  ;;  %5191 = vmatpush3.bf16.msra.mxu0 %v5334_v14  ;;  %v3133_v29 = vshll.u32 %v3049_v27, 16  ;;  %v3139_v8 = vshll.u32 %v3050_v9, 16  ;;  %v3054_v6 = vld [vmem:[#allocation2 + $0x3c] sm:$0x1]  ;;  %v8408_v4 = vsel %vm5480_vm2, %v7287_v11, %v7277_v15 }
 0x2e1   :  { %3318 = vst.msk [vmem:[#allocation3 + $0x40] sm:$0xf] %vm1961_vm3, %v3156_v61  ;;  %v3177_v57 = vrot.slane %v3175_v49, 5  ;;  %v7598_v48 = vld [vmem:[#allocation2 + $0x70] sm:$0xf]  ;;  %5192 = vmatprep.subr.bf16.mxu0 %v5335_v16  ;;  %v3132_v27 = vrot.slane %v3130_v35, 4  ;;  %v8409_v15 = vsel %vm5480_vm2, %v7285_v13, %v7261_v63  ;;  %v7626_v59 = vpop.permute.xlu1 %3564 }
 0x2e2   :  { %2693 = vrot.lane.b32.xlu1 %v8408_v4, %s5394_s13  ;;  %v3200_v9 = vshrl.u32 %v3059_v18, 16  ;;  %v2397_v31 = vld [vmem:[#allocation2 + $0x10] sm:$0xf]  ;;  %v5336_v16 = vld [vmem:[%s8349_s4] sm:$0xff]   ;;  %v3183_v49 = vrot.slane %v3181_v55, 5  ;;  %v3135_v61 = vrot.slane %v3133_v29, 5 }
 0x2e3   :  { %2691 = vrot.lane.b32.xlu0 %v8409_v15, %s5394_s13  ;;  %v3178_v11 = vor.u32 %v3177_v57, %v3174_v23  ;;  %v3203_v4 = vshll.u32 %v3059_v18, 16  ;;  %v3064_v33 = vld [vmem:[#allocation2 + $0x74] sm:$0x1]  ;;  %2413 = vst.msk [vmem:[#allocation3 + $0x18] sm:$0xf] %vm1961_vm3, %v2397_v31  ;;  %8410 = vst [vmem:[#allocation24_spill] sm:$0xff] %v7624_v56  ;;  %5287 = vmatpush3.bf16.msra.mxu1 %v5336_v16  ;;  %v7631_v23 = vpop.permute.xlu0 %3562 }
 0x2e4   :  { %v2398_v35 = vld [vmem:[#allocation2 + $0x18] sm:$0xf]  ;;  %v3141_v24 = vrot.slane %v3139_v8, 5  ;;  %v3202_v32 = vrot.slane %v3200_v9, 4  ;;  %v3209_v14 = vshll.u32 %v3060_v38, 16  ;;  %v3158_v63 = vshrl.u32 %v3053_v42, 16  ;;  %5193 = vmatpush3.bf16.msra.mxu0 %v5336_v16  ;;  %5252 = vmatprep.subr.bf16.mxu1 %v7624_v56 }
 0x2e5   :  { %v7628_v13 = vld [vmem:[#allocation2 + $0x58] sm:$0xf]  ;;  %2414 = vst.msk [vmem:[#allocation3 + $0x24] sm:$0xf] %vm1961_vm3, %v2398_v35  ;;  %v2399_v18 = vld [vmem:[#allocation2 + $0x20] sm:$0xf]  ;;  %v3136_v57 = vor.u32 %v3135_v61, %v3132_v27  ;;  %v8411_v38 = vsel %vm5480_vm2, %v7309_v50, %v7317_v30  ;;  %v8412_v61 = vsel %vm5480_vm2, %v7299_v54, %v7295_v47 }
 0x2e6   :  { %v3179_v55 = vrot.slane %v3178_v11, 4  ;;  %v3205_v29 = vrot.slane %v3203_v4, 5  ;;  %v3161_v31 = vshll.u32 %v3053_v42, 16  ;;  %v3058_v15 = vld [vmem:[#allocation2 + $0x5c] sm:$0x1]  ;;  %3884 = vrot.lane.b32.xlu1 %v8411_v38, %s5398_s15  ;;  %v3211_v9 = vrot.slane %v3209_v14, 5 }
 0x2e7   :  { %2415 = vst.msk [vmem:[#allocation3 + $0x30] sm:$0xf] %vm1961_vm3, %v2399_v18  ;;  %v2400_v8 = vld [vmem:[#allocation2 + $0x28] sm:$0xf]  ;;  %v3160_v16 = vrot.slane %v3158_v63, 4  ;;  %v3167_v35 = vshll.u32 %v3054_v6, 16  ;;  %3882 = vrot.lane.b32.xlu0 %v8412_v61, %s5398_s15  ;;  %v7654_v18 = vpop.permute.xlu1 %2986 }
 0x2e8   :  { %v3228_v27 = vshrl.u32 %v7598_v48, 16  ;;  %v7642_v11 = vld [vmem:[#allocation2 + $0x68] sm:$0xf]  ;;  %2416 = vst.msk [vmem:[#allocation3 + $0x3c] sm:$0xf] %vm1961_vm3, %v2400_v8  ;;  %v3184_v50 = vsel %vm5480_vm2, %v3179_v55, %v3183_v49  ;;  %v3137_v30 = vrot.slane %v3136_v57, 4  ;;  %v3206_v14 = vor.u32 %v3205_v29, %v3202_v32  ;;  %v7662_v49 = vpop.permute.xlu0 %2984 }
 0x2e9   :  { %v2401_v42 = vld [vmem:[#allocation2 + $0x30] sm:$0xf]  ;;  %v3163_v6 = vrot.slane %v3161_v31, 5  ;;  %v2402_v4 = vld [vmem:[#allocation2 + $0x38] sm:$0xf]  ;;  %v3169_v8 = vrot.slane %v3167_v35, 5  ;;  %v8414_v35 = vsel %vm5480_vm2, %v7331_v36, %v7329_v60 }
 0x2ea   :  { %2417 = vst.msk [vmem:[#allocation3 + $0x48] sm:$0xf] %vm1961_vm3, %v2401_v42  ;;  %v2404_v63 = vld [vmem:[#allocation2 + $0x58] sm:$0xf]  ;;  %3320 = vst.msk [vmem:[#allocation3 + $0x58] sm:$0xf] %vm1961_vm3, %v3184_v50  ;;  %v3142_v55 = vsel %vm5480_vm2, %v3137_v30, %v3141_v24  ;;  %2697 = vrot.lane.b32.xlu1 %v8414_v35, %s5394_s13 }
 0x2eb   :  { %v3230_v38 = vrot.slane %v3228_v27, 4  ;;  %v3231_v56 = vshll.u32 %v7598_v48, 16  ;;  %v3237_v47 = vshll.u32 %v3064_v33, 16  ;;  %v3062_v54 = vld [vmem:[#allocation2 + $0x6c] sm:$0x1]  ;;  %8413 = vst [vmem:[#allocation25_spill] sm:$0xff] %v7662_v49  ;;  %v3164_v29 = vor.u32 %v3163_v6, %v3160_v16 }
 0x2ec   :  { %v7658_v61 = vld [vmem:[#allocation2 + $0x80] sm:$0xf]  ;;  %2418 = vst.msk [vmem:[#allocation3 + $0x54] sm:$0xf] %vm1961_vm3, %v2402_v4  ;;  %2420 = vst.msk [vmem:[#allocation3 + $0x6c] sm:$0xf] %vm1961_vm3, %v2404_v63 }
 0x2ed   :  { %v2405_v32 = vld [vmem:[#allocation2 + $0x60] sm:$0xf]  ;;  %v3207_v57 = vrot.slane %v3206_v14, 4  ;;  %v3186_v31 = vshrl.u32 %v7628_v13, 16  ;;  %v2406_v33 = vld [vmem:[#allocation2 + $0x68] sm:$0xf] }
 0x2ee   :  { %2421 = vst.msk [vmem:[#allocation3 + $0x78] sm:$0xf] %vm1961_vm3, %v2405_v32  ;;  %v2407_v48 = vld [vmem:[#allocation2 + $0x70] sm:$0xf]  ;;  %3317 = vst.msk [vmem:[#allocation3 + $0x34] sm:$0xf] %vm1961_vm3, %v3142_v55  ;;  %v7690_v32 = vpop.permute.xlu1 %2990 }
 0x2ef   :  { %v3233_v27 = vrot.slane %v3231_v56, 5  ;;  %v3239_v42 = vrot.slane %v3237_v47, 5  ;;  %v3189_v24 = vshll.u32 %v7628_v13, 16  ;;  %v3195_v16 = vshll.u32 %v3058_v15, 16  ;;  %v3068_v50 = vld [vmem:[#allocation2 + $0x84] sm:$0x1] }
 0x2f0   :  { %v7676_v30 = vld [vmem:[#allocation2 + $0x78] sm:$0xf]  ;;  %2422 = vst.msk [vmem:[#allocation3 + $0x84] sm:$0xf] %vm1961_vm3, %v2406_v33  ;;  %2423 = vst.msk [vmem:[#allocation3 + $0x90] sm:$0xf] %vm1961_vm3, %v2407_v48  ;;  %v3212_v13 = vsel %vm5480_vm2, %v3207_v57, %v3211_v9  ;;  %v7695_v9 = vpop.permute.xlu0 %3566 }
 0x2f1   :  { %v2408_v14 = vld [vmem:[#allocation2 + $0x78] sm:$0xf]  ;;  %v8415_v60 = vld [vmem:[#allocation9_spill] sm:$0xff]  ;;  %v8416_v36 = vld [vmem:[#allocation8_spill] sm:$0xff]  ;;  %v3165_v15 = vrot.slane %v3164_v29, 4  ;;  %v3188_v4 = vrot.slane %v3186_v31, 4  ;;  %v3234_v55 = vor.u32 %v3233_v27, %v3230_v38 }
 0x2f2   :  { %v8417_v6 = vsel %vm5480_vm2, %v8415_v60, %v8416_v36  ;;  %v3523_v56 = vld [vmem:[#allocation2 + $0x18] sm:$0xf]  ;;  %v3214_v63 = vshrl.u32 %v7642_v11, 16  ;;  %2424 = vst.msk [vmem:[#allocation3 + $0x9c] sm:$0xf] %vm1961_vm3, %v2408_v14  ;;  %8418 = vst [vmem:[#allocation9_spill] sm:$0xff] %v7690_v32 }
 0x2f3   :  { %2695 = vrot.lane.b32.xlu0 %v8417_v6, %s5394_s13  ;;  %v2409_v47 = vld [vmem:[#allocation2 + $0x80] sm:$0xf]  ;;  %3322 = vst.msk [vmem:[#allocation3 + $0x70] sm:$0xf] %vm1961_vm3, %v3212_v13  ;;  %v3191_v33 = vrot.slane %v3189_v24, 5  ;;  %v3197_v48 = vrot.slane %v3195_v16, 5  ;;  %v3170_v57 = vsel %vm5480_vm2, %v3165_v15, %v3169_v8  ;;  %3556 = vrot.lane.b32.xlu1 %v3523_v56, %s5395_s16  ;;  %v8419_v8 = vsel %vm5480_vm2, %v7351_v34, %v7345_v41 }
 0x2f4   :  { %v3217_v35 = vshll.u32 %v7642_v11, 16  ;;  %2425 = vst.msk [vmem:[#allocation3 + $0xa8] sm:$0xf] %vm1961_vm3, %v2409_v47  ;;  %v2410_v60 = vld [vmem:[#allocation2 + $0x88] sm:$0xf]  ;;  %v3216_v29 = vrot.slane %v3214_v63, 4 }
 0x2f5   :  { %v3223_v31 = vshll.u32 %v3062_v54, 16  ;;  %v3256_v14 = vshrl.u32 %v7658_v61, 16  ;;  %2426 = vst.msk [vmem:[#allocation3 + $0xb4] sm:$0xf] %vm1961_vm3, %v2410_v60  ;;  %v2396_v36 = vld [vmem:[#allocation2 + $0x8] sm:$0xf]  ;;  %v3192_v38 = vor.u32 %v3191_v33, %v3188_v4  ;;  %v7712_v4 = vpop.permute.xlu1 %3572  ;;  %v7716_v60 = vpop.permute.xlu0 %2988 }
 0x2f6   :  { %3319 = vst.msk [vmem:[#allocation3 + $0x4c] sm:$0xf] %vm1961_vm3, %v3170_v57  ;;  %v3235_v11 = vrot.slane %v3234_v55, 4  ;;  %v3219_v27 = vrot.slane %v3217_v35, 5  ;;  %v3259_v24 = vshll.u32 %v7658_v61, 16  ;;  %v3265_v56 = vshll.u32 %v3068_v50, 16 }
 0x2f7   :  { %v3066_v16 = vld [vmem:[#allocation2 + $0x7c] sm:$0x1]  ;;  %2412 = vst.msk [vmem:[#allocation3 + $0xc] sm:$0xf] %vm1961_vm3, %v2396_v36  ;;  %3886 = vrot.lane.b32.xlu0 %v8419_v8, %s5398_s15  ;;  %v3225_v54 = vrot.slane %v3223_v31, 5  ;;  %v3258_v6 = vrot.slane %v3256_v14, 4 }
 0x2f8   :  { %v3242_v13 = vshrl.u32 %v7676_v30, 16  ;;  %v3071_v15 = vld [vmem:[#allocation2 + $0x90] sm:$0xf]  ;;  %v3240_v63 = vsel %vm5480_vm2, %v3235_v11, %v3239_v42  ;;  %v3193_v47 = vrot.slane %v3192_v38, 4  ;;  %v3220_v55 = vor.u32 %v3219_v27, %v3216_v29  ;;  %v3072_v35 = vld [vmem:[#allocation2 + $0x94] sm:$0x1] }
 0x2f9   :  { %v3522_v61 = vld [vmem:[#allocation2 + $0x10] sm:$0xf]  ;;  %v3261_v33 = vrot.slane %v3259_v24, 5  ;;  %8420 = vst [vmem:[#allocation8_spill] sm:$0xff] %v7716_v60  ;;  %3324 = vst.msk [vmem:[#allocation3 + $0x88] sm:$0xf] %vm1961_vm3, %v3240_v63  ;;  %v8421_v42 = vsel %vm5480_vm2, %v7365_v58, %v7353_v39 }
 0x2fa   :  { %v3267_v41 = vrot.slane %v3265_v56, 5  ;;  %v3244_v34 = vrot.slane %v3242_v13, 4  ;;  %v3245_v50 = vshll.u32 %v7676_v30, 16  ;;  %v3251_v57 = vshll.u32 %v3066_v16, 16  ;;  %v3069_v31 = vld [vmem:[#allocation2 + $0x88] sm:$0xf]  ;;  %2701 = vrot.lane.b32.xlu1 %v8421_v42, %s5394_s13  ;;  %v7730_v13 = vpop.permute.xlu1 %2994 }
 0x2fb   :  { %v3198_v29 = vsel %vm5480_vm2, %v3193_v47, %v3197_v48  ;;  %v3221_v14 = vrot.slane %v3220_v55, 4  ;;  %v3262_v36 = vor.u32 %v3261_v33, %v3258_v6  ;;  %v3284_v11 = vshrl.u32 %v3071_v15, 16  ;;  %v3070_v38 = vld [vmem:[#allocation2 + $0x8c] sm:$0x1]  ;;  %v3044_v27 = vld [vmem:[#allocation2 + $0x14] sm:$0x1]  ;;  %3554 = vrot.lane.b32.xlu0 %v3522_v61, %s5395_s16  ;;  %v7734_v47 = vpop.permute.xlu0 %3570 }
 0x2fc   :  { %3321 = vst.msk [vmem:[#allocation3 + $0x64] sm:$0xf] %vm1961_vm3, %v3198_v29  ;;  %v3247_v30 = vrot.slane %v3245_v50, 5  ;;  %v3253_v24 = vrot.slane %v3251_v57, 5  ;;  %v3287_v16 = vshll.u32 %v3071_v15, 16  ;;  %v3293_v8 = vshll.u32 %v3072_v35, 16 }
 0x2fd   :  { %v3043_v56 = vld [vmem:[#allocation2 + $0x10] sm:$0xf]  ;;  %8422 = vst [vmem:[#allocation26_spill] sm:$0xff] %v7730_v13  ;;  %v3226_v39 = vsel %vm5480_vm2, %v3221_v14, %v3225_v54  ;;  %v3263_v58 = vrot.slane %v3262_v36, 4  ;;  %v3286_v48 = vrot.slane %v3284_v11, 4  ;;  %v3270_v6 = vshrl.u32 %v3069_v31, 16 }
 0x2fe   :  { %v3042_v63 = vld [vmem:[#allocation2 + $0xc] sm:$0x1]  ;;  %3323 = vst.msk [vmem:[#allocation3 + $0x7c] sm:$0xf] %vm1961_vm3, %v3226_v39  ;;  %v3248_v61 = vor.u32 %v3247_v30, %v3244_v34  ;;  %v3289_v55 = vrot.slane %v3287_v16, 5  ;;  %v3295_v33 = vrot.slane %v3293_v8, 5  ;;  %v8423_v35 = vsel %vm5480_vm2, %v7394_v28, %v7388_v22 }
 0x2ff   :  { %v3273_v50 = vshll.u32 %v3069_v31, 16  ;;  %v3041_v15 = vld [vmem:[#allocation2 + $0x8] sm:$0xf]  ;;  %3892 = vrot.lane.b32.xlu1 %v8423_v35, %s5398_s15  ;;  %v3268_v54 = vsel %vm5480_vm2, %v3263_v58, %v3267_v41  ;;  %v3272_v57 = vrot.slane %v3270_v6, 4  ;;  %v3279_v42 = vshll.u32 %v3070_v38, 16  ;;  %v8424_v34 = vld [vmem:[#allocation10_spill] sm:$0xff]  ;;  %v7752_v41 = vpop.permute.xlu1 %3576  ;;  %v2993_v35 = vpop.permute.xlu0 %2992 }
 0x300   :  { %v3097_v29 = vshll.u32 %v3044_v27, 16  ;;  %v3938_v14 = vld [vmem:[#allocation2 + $0x10] sm:$0xe]  ;;  %v3939_v36 = vld [vmem:[#allocation2 + $0x14] sm:$0x1]  ;;  %v8425_v31 = vsel %vm5480_vm2, %v7378_v43, %v8424_v34  ;;  %v3249_v11 = vrot.slane %v3248_v61, 4  ;;  %v3290_v22 = vor.u32 %v3289_v55, %v3286_v48 }
 0x301   :  { %3890 = vrot.lane.b32.xlu0 %v8425_v31, %s5398_s15  ;;  %3326 = vst.msk [vmem:[#allocation3 + $0xa0] sm:$0xf] %vm1961_vm3, %v3268_v54  ;;  %v3275_v28 = vrot.slane %v3273_v50, 5  ;;  %v3088_v30 = vshrl.u32 %v3043_v56, 16  ;;  %v3940_v16 = vld [vmem:[#allocation2 + $0x18] sm:$0xe] }
 0x302   :  { %v3281_v38 = vrot.slane %v3279_v42, 5  ;;  %v7754_v27 = vrot.slane %v3097_v29, 5  ;;  %v3091_v8 = vshll.u32 %v3043_v56, 16  ;;  %v3083_v39 = vshll.u32 %v3042_v63, 16  ;;  %v3941_v58 = vld [vmem:[#allocation2 + $0x1c] sm:$0x1] }
 0x303   :  { %v7756_v6 = vld [vmem:[#allocation2 + $0x20] sm:$0xe]  ;;  %v3254_v43 = vsel %vm5480_vm2, %v3249_v11, %v3253_v24  ;;  %v3291_v54 = vrot.slane %v3290_v22, 4  ;;  %v3276_v61 = vor.u32 %v3275_v28, %v3272_v57  ;;  %v3090_v48 = vrot.slane %v3088_v30, 4  ;;  %v3943_v55 = vld [vmem:[#allocation2 + $0x24] sm:$0x1] }
 0x304   :  { %v3944_v50 = vld [vmem:[#allocation2 + $0x28] sm:$0xe]  ;;  %3033 = vst.msk [vmem:[#allocation3 + $0x60] sm:$0xf] %vm3024_vm11, %v2993_v35  ;;  %v8426_v56 = vsel %vm5480_vm2, %v7404_v17, %v7406_v2  ;;  %v3093_v63 = vrot.slane %v3091_v8, 5  ;;  %v7768_v42 = vrot.slane %v3083_v39, 5  ;;  %v7780_v35 = vpop.permute.xlu1 %2998 }
 0x305   :  { %2705 = vrot.lane.b32.xlu1 %v8426_v56, %s5394_s13  ;;  %3325 = vst.msk [vmem:[#allocation3 + $0x94] sm:$0xf] %vm1961_vm3, %v3254_v43  ;;  %v3074_v24 = vshrl.u32 %v3041_v15, 16  ;;  %v3077_v29 = vshll.u32 %v3041_v15, 16  ;;  %v3945_v57 = vld [vmem:[#allocation2 + $0x2c] sm:$0x1]  ;;  %v3296_v17 = vsel %vm5480_vm2, %v3291_v54, %v3295_v33 }
 0x306   :  { %v3946_v34 = vld [vmem:[#allocation2 + $0x30] sm:$0xe]  ;;  %v3947_v31 = vld [vmem:[#allocation2 + $0x34] sm:$0x1]  ;;  %v8428_v22 = vld [vmem:[#allocation12_spill] sm:$0xff]  ;;  %v3277_v2 = vrot.slane %v3276_v61, 4  ;;  %v3094_v15 = vor.u32 %v3093_v63, %v3090_v48 }
 0x307   :  { %v8427_v11 = vld [vmem:[#allocation13_spill] sm:$0xff]  ;;  %v5094_v30 = vrot.slane %v3938_v14, 9  ;;  %v4004_v8 = vrot.slane %v3939_v36, 5  ;;  %v7778_v39 = vld [vmem:[#allocation2 + $0x38] sm:$0xe]  ;;  %8430 = vst [vmem:[#allocation10_spill] sm:$0xff] %v7780_v35 }
 0x308   :  { %v8429_v28 = vsel %vm5480_vm2, %v8427_v11, %v8428_v22  ;;  %3328 = vst.msk [vmem:[#allocation3 + $0xb8] sm:$0xf] %vm1961_vm3, %v3296_v17  ;;  %v3076_v43 = vrot.slane %v3074_v24, 4  ;;  %v3079_v56 = vrot.slane %v3077_v29, 5  ;;  %v5095_v13 = vrot.slane %v3940_v16, 9  ;;  %v7783_v11 = vpop.permute.xlu0 %3574  ;;  %v8432_v16 = vld [vmem:[#allocation18_spill] sm:$0xff] }
 0x309   :  { %2703 = vrot.lane.b32.xlu0 %v8429_v28, %s5394_s13  ;;  %v3949_v60 = vld [vmem:[#allocation2 + $0x3c] sm:$0x1]  ;;  %v3950_v32 = vld [vmem:[#allocation2 + $0x40] sm:$0xe]  ;;  %v3282_v33 = vsel %vm5480_vm2, %v3277_v2, %v3281_v38  ;;  %v4005_v14 = vsel %vm6511_vm6, %v5094_v30, %v4004_v8  ;;  %v4008_v36 = vrot.slane %v3941_v58, 5  ;;  %v5096_v61 = vrot.slane %v7756_v6, 9 }
 0x30a   :  { %v3951_v22 = vld [vmem:[#allocation2 + $0x44] sm:$0x1]  ;;  %v3952_v28 = vld [vmem:[#allocation2 + $0x48] sm:$0xe]  ;;  %v3953_v17 = vld [vmem:[#allocation2 + $0x4c] sm:$0x1]  ;;  %v3080_v38 = vor.u32 %v3079_v56, %v3076_v43 }
 0x30b   :  { %v8433_v48 = vld [vmem:[#allocation17_spill] sm:$0xff]  ;;  %3327 = vst.msk [vmem:[#allocation3 + $0xac] sm:$0xf] %vm1961_vm3, %v3282_v33  ;;  %v3095_v24 = vrot.slane %v3094_v15, 4  ;;  %4082 = vst.msk [vmem:[#allocation3 + $0x8] sm:$0xf] %vm1961_vm3, %v4005_v14 }
 0x30c   :  { %v8434_v63 = vsel %vm5480_vm2, %v8432_v16, %v8433_v48  ;;  %v4012_v29 = vrot.slane %v3943_v55, 5  ;;  %v5097_v58 = vrot.slane %v3944_v50, 9  ;;  %v3954_v2 = vld [vmem:[#allocation2 + $0x60] sm:$0xe]  ;;  %v3955_v6 = vld [vmem:[#allocation2 + $0x64] sm:$0x1]  ;;  %v4009_v16 = vsel %vm6511_vm6, %v5095_v13, %v4008_v36  ;;  %v7806_v55 = vpop.permute.xlu1 %3580 }
 0x30d   :  { %3896 = vrot.lane.b32.xlu1 %v8434_v63, %s5398_s15  ;;  %v3956_v30 = vld [vmem:[#allocation2 + $0x68] sm:$0xe]  ;;  %v8435_v8 = vld [vmem:[#allocation14_spill] sm:$0xff]  ;;  %v4016_v33 = vrot.slane %v3945_v57, 5  ;;  %v5098_v15 = vrot.slane %v3946_v34, 9  ;;  %v4020_v43 = vrot.slane %v3947_v31, 5  ;;  %v3100_v50 = vsel %vm5480_vm2, %v3095_v24, %v7754_v27  ;;  %v7815_v34 = vpop.permute.xlu0 %2996 }
 0x30e   :  { %v8436_v35 = vld [vmem:[#allocation16_spill] sm:$0xff]  ;;  %v3958_v14 = vld [vmem:[#allocation2 + $0x70] sm:$0xe]  ;;  %v3081_v48 = vrot.slane %v3080_v38, 4  ;;  %4083 = vst.msk [vmem:[#allocation3 + $0x14] sm:$0xf] %vm1961_vm3, %v4009_v16 }
 0x30f   :  { %v8437_v49 = vsel %vm5480_vm2, %v8435_v8, %v8436_v35  ;;  %v3957_v56 = vld [vmem:[#allocation2 + $0x6c] sm:$0x1]  ;;  %v5099_v35 = vrot.slane %v7778_v39, 9  ;;  %v3959_v13 = vld [vmem:[#allocation2 + $0x74] sm:$0x1]  ;;  %v4017_v31 = vsel %vm6511_vm6, %v5097_v58, %v4016_v33  ;;  %v4021_v27 = vsel %vm6511_vm6, %v5098_v15, %v4020_v43  ;;  %v8438_v39 = vld [vmem:[#allocation23_spill] sm:$0xff] }
 0x310   :  { %3894 = vrot.lane.b32.xlu0 %v8437_v49, %s5398_s15  ;;  %v4013_v49 = vsel %vm6511_vm6, %v5096_v61, %v4012_v29  ;;  %v3960_v57 = vld [vmem:[#allocation2 + $0x78] sm:$0xe]  ;;  %3314 = vst.msk [vmem:[#allocation3 + $0x10] sm:$0xf] %vm1961_vm3, %v3100_v50  ;;  %v4024_v36 = vrot.slane %v3949_v60, 5  ;;  %v5100_v63 = vrot.slane %v3950_v32, 9  ;;  %v3086_v58 = vsel %vm5480_vm2, %v3081_v48, %v7768_v42 }
 0x311   :  { %4084 = vst.msk [vmem:[#allocation3 + $0x20] sm:$0xf] %vm1961_vm3, %v4013_v49  ;;  %v3961_v24 = vld [vmem:[#allocation2 + $0x7c] sm:$0x1]  ;;  %v3962_v61 = vld [vmem:[#allocation2 + $0x80] sm:$0xe] }
 0x312   :  { %v8439_v38 = vld [vmem:[#allocation21_spill] sm:$0xff]  ;;  %4085 = vst.msk [vmem:[#allocation3 + $0x2c] sm:$0xf] %vm1961_vm3, %v4017_v31  ;;  %4086 = vst.msk [vmem:[#allocation3 + $0x38] sm:$0xf] %vm1961_vm3, %v4021_v27  ;;  %v4028_v8 = vrot.slane %v3951_v22, 5  ;;  %v4025_v42 = vsel %vm6511_vm6, %v5099_v35, %v4024_v36  ;;  %v7843_v22 = vpop.permute.xlu1 %3002 }
 0x313   :  { %v8440_v29 = vsel %vm5480_vm2, %v8438_v39, %v8439_v38  ;;  %v5101_v60 = vrot.slane %v3952_v28, 9  ;;  %v4032_v32 = vrot.slane %v3953_v17, 5  ;;  %v3963_v16 = vld [vmem:[#allocation2 + $0x84] sm:$0x1]  ;;  %v8442_v15 = vld [vmem:[#allocation20_spill] sm:$0xff]  ;;  %v5102_v50 = vrot.slane %v3954_v2, 9 }
 0x314   :  { %2709 = vrot.lane.b32.xlu1 %v8440_v29, %s5394_s13  ;;  %v8441_v33 = vld [vmem:[#allocation19_spill] sm:$0xff]  ;;  %3313 = vst.msk [vmem:[#allocation3 + $0x4] sm:$0xf] %vm1961_vm3, %v3086_v58  ;;  %v4036_v48 = vrot.slane %v3955_v6, 5  ;;  %v5103_v49 = vrot.slane %v3956_v30, 9  ;;  %v4029_v28 = vsel %vm6511_vm6, %v5100_v63, %v4028_v8  ;;  %v4040_v27 = vrot.slane %v3957_v56, 5  ;;  %v7850_v58 = vpop.permute.xlu0 %3578 }
 0x315   :  { %v8443_v43 = vsel %vm5480_vm2, %v8441_v33, %v8442_v15  ;;  %v3964_v31 = vld [vmem:[#allocation2 + $0x88] sm:$0xe]  ;;  %4087 = vst.msk [vmem:[#allocation3 + $0x44] sm:$0xf] %vm1961_vm3, %v4025_v42  ;;  %v4033_v17 = vsel %vm6511_vm6, %v5101_v60, %v4032_v32  ;;  %v5104_v39 = vrot.slane %v3958_v14, 9  ;;  %v4044_v6 = vrot.slane %v3959_v13, 5 }
 0x316   :  { %2707 = vrot.lane.b32.xlu0 %v8443_v43, %s5394_s13  ;;  %v3965_v38 = vld [vmem:[#allocation2 + $0x8c] sm:$0x1]  ;;  %v3966_v29 = vld [vmem:[#allocation2 + $0x90] sm:$0xe]  ;;  %4088 = vst.msk [vmem:[#allocation3 + $0x50] sm:$0xf] %vm1961_vm3, %v4029_v28  ;;  %v4037_v2 = vsel %vm6511_vm6, %v5102_v50, %v4036_v48  ;;  %v8444_v56 = vsel %vm5480_vm2, %v7544_v52, %v7488_v25  ;;  %v4041_v36 = vsel %vm6511_vm6, %v5103_v49, %v4040_v27  ;;  %v7876_v32 = vpop.permute.xlu1 %3006 }
 0x317   :  { %4089 = vst.msk [vmem:[#allocation3 + $0x5c] sm:$0xf] %vm1961_vm3, %v4033_v17  ;;  %v5105_v30 = vrot.slane %v3960_v57, 9  ;;  %v4048_v35 = vrot.slane %v3961_v24, 5  ;;  %v2430_v14 = vld [vmem:[#allocation2 + $0xc] sm:$0x1]  ;;  %v8445_v13 = vsel %vm5480_vm2, %v7503_v3, %v7466_v0  ;;  %v4045_v25 = vsel %vm6511_vm6, %v5104_v39, %v4044_v6 }
 0x318   :  { %3900 = vrot.lane.b32.xlu1 %v8444_v56, %s5398_s15  ;;  %4090 = vst.msk [vmem:[#allocation3 + $0x68] sm:$0xf] %vm1961_vm3, %v4037_v2  ;;  %v5106_v63 = vrot.slane %v3962_v61, 9  ;;  %v4052_v8 = vrot.slane %v3963_v16, 5  ;;  %v5107_v60 = vrot.slane %v3964_v31, 9  ;;  %v4056_v57 = vrot.slane %v3965_v38, 5  ;;  %v7890_v43 = vpop.permute.xlu0 %3000 }
 0x319   :  { %4091 = vst.msk [vmem:[#allocation3 + $0x74] sm:$0xf] %vm1961_vm3, %v4041_v36  ;;  %v4049_v52 = vsel %vm6511_vm6, %v5105_v30, %v4048_v35  ;;  %v3967_v24 = vld [vmem:[#allocation2 + $0x94] sm:$0x1]  ;;  %v5108_v61 = vrot.slane %v3966_v29, 9  ;;  %v2668_v16 = vsel %vm5480_vm2, %v7546_v1, %v7515_v7  ;;  %v2682_v0 = vsel %vm5480_vm2, %v7563_v46, %v7548_v10 }
 0x31a   :  { %3898 = vrot.lane.b32.xlu0 %v8445_v13, %s5398_s15  ;;  %4092 = vst.msk [vmem:[#allocation3 + $0x80] sm:$0xf] %vm1961_vm3, %v4045_v25  ;;  %4093 = vst.msk [vmem:[#allocation3 + $0x8c] sm:$0xf] %vm1961_vm3, %v4049_v52  ;;  %v4053_v3 = vsel %vm6511_vm6, %v5106_v63, %v4052_v8  ;;  %v3968_v33 = vld [vmem:[#allocation2 + $0x98] sm:$0xe]  ;;  %v2480_v42 = vor.u32 %v7574_v62, %v7566_v53  ;;  %v4057_v46 = vsel %vm6511_vm6, %v5107_v60, %v4056_v57  ;;  %v3464_v27 = vpop.permute.xlu1 %3463 }
 0x31b   :  { %v3969_v15 = vld [vmem:[#allocation2 + $0x9c] sm:$0x1]  ;;  %v8446_v7 = vshrl.u32 %v7556_v51, 16  ;;  %v8447_v50 = vshll.u32 %v7556_v51, 16  ;;  %4094 = vst.msk [vmem:[#allocation3 + $0x98] sm:$0xf] %vm1961_vm3, %v4053_v3 }
 0x31c   :  { %2713 = vrot.lane.b32.xlu1 %v2682_v0, %s5394_s13  ;;  %v8448_v48 = vshll.u32 %v7524_v37, 16  ;;  %4095 = vst.msk [vmem:[#allocation3 + $0xa4] sm:$0xf] %vm1961_vm3, %v4057_v46  ;;  %v4060_v31 = vrot.slane %v3967_v24, 5  ;;  %v5109_v53 = vrot.slane %v3968_v33, 9  ;;  %v4064_v62 = vrot.slane %v3969_v15, 5  ;;  %v7913_v2 = vpop.permute.xlu0 %3582 }
 0x31d   :  { %v3667_v1 = vrot.slane %v8446_v7, 4  ;;  %v3670_v10 = vrot.slane %v8447_v50, 5  ;;  %v2945_v28 = vld [vmem:[#allocation2 + $0x10] sm:$0xf]  ;;  %v2483_v51 = vshll.u32 %v2430_v14, 16  ;;  %v8449_v39 = vshll.u32 %v7518_v26, 16 }
 0x31e   :  { %v3656_v49 = vrot.slane %v8448_v48, 5  ;;  %2711 = vrot.lane.b32.xlu0 %v2668_v16, %s5394_s13  ;;  %v3621_v17 = vld [vmem:[#allocation2 + $0x1c] sm:$0x1]  ;;  %v4061_v29 = vsel %vm6511_vm6, %v5108_v61, %v4060_v31  ;;  %v4065_v37 = vsel %vm6511_vm6, %v5109_v53, %v4064_v62  ;;  %3508 = vst.msk [vmem:[#allocation3 + $0x28] sm:$0xf] %vm2731_vm8, %v3464_v27  ;;  %v2481_v6 = vrot.slane %v2480_v42, 4  ;;  %v7925_v36 = vpop.permute.xlu1 %2885 }
 0x31f   :  { %v3858_v38 = vrot.slane %v8449_v39, 5  ;;  %v3619_v30 = vld [vmem:[#allocation2 + $0x14] sm:$0x1]  ;;  %v3671_v35 = vor.u32 %v3670_v10, %v3667_v1  ;;  %4096 = vst.msk [vmem:[#allocation3 + $0xb0] sm:$0xf] %vm1961_vm3, %v4061_v29  ;;  %v2485_v56 = vrot.slane %v2483_v51, 5 }
 0x320   :  { %4097 = vst.msk [vmem:[#allocation3 + $0xbc] sm:$0xf] %vm1961_vm3, %v4065_v37  ;;  %2978 = vrot.lane.b32.xlu1 %v2945_v28, %s5398_s15  ;;  %v3657_v54 = vor.u32 %v3656_v49, %v7591_v19  ;;  %v3674_v14 = vshll.u32 %v3621_v17, 16  ;;  %v3660_v63 = vshll.u32 %v3619_v30, 16  ;;  %v7927_v8 = vpop.permute.xlu0 %3004  ;;  %v2944_v13 = vld [vmem:[#allocation2 + $0x8] sm:$0xf] }
 0x321   :  { %3605 = vst.msk [vmem:[#allocation3 + $0x28] sm:$0xf] %vm2927_vm9, %v7553_v40  ;;  %v3859_v26 = vsel %vm5480_vm2, %v7584_v5, %v3858_v38  ;;  %v2486_v40 = vsel %vm5480_vm2, %v2481_v6, %v2485_v56  ;;  %v3672_v60 = vrot.slane %v3671_v35, 4  ;;  %v8450_v15 = vld [vmem:[#allocation11_spill] sm:$0xff]  ;;  %v8452_v31 = vld [vmem:[#allocation22_spill] sm:$0xff]  ;;  %v8456_v56 = vld [vmem:[#allocation8_spill] sm:$0xff] }
 0x322   :  { %3902 = vrot.lane.b32.xlu0 %v3859_v26, %s5398_s15  ;;  %v3658_v5 = vrot.slane %v3657_v54, 4  ;;  %v3676_v19 = vrot.slane %v3674_v14, 5  ;;  %v3468_v25 = vpop.permute.xlu1 %3467  ;;  %v3662_v52 = vrot.slane %v3660_v63, 5  ;;  %v5347_v30 = vld [vmem:[%s8349_s4 + $0x80] sm:$0xff]   ;;  %v8455_v54 = vld [vmem:[#allocation9_spill] sm:$0xff] }
 0x323   :  { %3510 = vst.msk [vmem:[#allocation3 + $0x40] sm:$0xf] %vm2731_vm8, %v3468_v25  ;;  %v8457_v25 = vld [vmem:[#allocation26_spill] sm:$0xff] }
 0x324   :  { %2685 = vrot.lane.b32.xlu1 %v2486_v40, %s5394_s13  ;;  %v3462_v57 = vpop.permute.xlu0 %3461  ;;  %v3677_v24 = vsel %vm5480_vm2, %v3672_v60, %v3676_v19  ;;  %3607 = vst.msk [vmem:[#allocation3 + $0x40] sm:$0xf] %vm2927_vm9, %v7626_v59  ;;  %v3663_v61 = vsel %vm5480_vm2, %v3658_v5, %v3662_v52 }
 0x325   :  { %3507 = vst.msk [vmem:[#allocation3 + $0x1c] sm:$0xf] %vm2731_vm8, %v3462_v57 }
 0x326   :  { %2976 = vrot.lane.b32.xlu0 %v2944_v13, %s5398_s15  ;;  %3604 = vst.msk [vmem:[#allocation3 + $0x1c] sm:$0xf] %vm2927_vm9, %v7561_v21  ;;  %v7945_v16 = vpop.permute.xlu1 %2889 }
 0x328   :  { %3876 = vrot.lane.b32.xlu1 %v3677_v24, %s5398_s15  ;;  %v2884_v0 = vpop.permute.xlu0 %2883 }
 0x32a   :  { %3874 = vrot.lane.b32.xlu0 %v3663_v61, %s5398_s15  ;;  %v3472_v3 = vpop.permute.xlu1 %3471 }
 0x32b   :  { %3512 = vst.msk [vmem:[#allocation3 + $0x58] sm:$0xf] %vm2731_vm8, %v3472_v3 }
 0x32c   :  { %v3466_v33 = vpop.permute.xlu0 %3465  ;;  %3609 = vst.msk [vmem:[#allocation3 + $0x58] sm:$0xf] %vm2927_vm9, %v8450_v15  ;;  %v8458_v15 = vld [vmem:[#allocation10_spill] sm:$0xff] }
 0x32d   :  { %3509 = vst.msk [vmem:[#allocation3 + $0x34] sm:$0xf] %vm2731_vm8, %v3466_v33 }
 0x32e   :  { %3929 = vst.msk [vmem:[#allocation3 + $0x58] sm:$0xf] %vm3024_vm11, %v8451_v20  ;;  %v7955_v21 = vpop.permute.xlu1 %2893 }
 0x32f   :  { %3606 = vst.msk [vmem:[#allocation3 + $0x34] sm:$0xf] %vm2927_vm9, %v7631_v23 }
 0x330   :  { %v2888_v59 = vpop.permute.xlu0 %2887 }
 0x332   :  { %v3476_v42 = vpop.permute.xlu1 %3475 }
 0x333   :  { %3514 = vst.msk [vmem:[#allocation3 + $0x70] sm:$0xf] %vm2731_vm8, %v3476_v42 }
 0x334   :  { %v3470_v7 = vpop.permute.xlu0 %3469  ;;  %3611 = vst.msk [vmem:[#allocation3 + $0x70] sm:$0xf] %vm2927_vm9, %v7712_v4 }
 0x335   :  { %3511 = vst.msk [vmem:[#allocation3 + $0x4c] sm:$0xf] %vm2731_vm8, %v3470_v7 }
 0x336   :  { %3608 = vst.msk [vmem:[#allocation3 + $0x4c] sm:$0xf] %vm2927_vm9, %v7695_v9  ;;  %v7963_v1 = vpop.permute.xlu1 %2897 }
 0x338   :  { %v7965_v50 = vpop.permute.xlu0 %2891 }
 0x33a   :  { %v3480_v23 = vpop.permute.xlu1 %3479 }
 0x33b   :  { %3516 = vst.msk [vmem:[#allocation3 + $0x88] sm:$0xf] %vm2731_vm8, %v3480_v23 }
 0x33c   :  { %v3474_v10 = vpop.permute.xlu0 %3473  ;;  %3613 = vst.msk [vmem:[#allocation3 + $0x88] sm:$0xf] %vm2927_vm9, %v7752_v41 }
 0x33d   :  { %3513 = vst.msk [vmem:[#allocation3 + $0x64] sm:$0xf] %vm2731_vm8, %v3474_v10 }
 0x33e   :  { %3610 = vst.msk [vmem:[#allocation3 + $0x64] sm:$0xf] %vm2927_vm9, %v7734_v47  ;;  %v7973_v4 = vpop.permute.xlu1 %2901 }
 0x340   :  { %v3478_v46 = vpop.permute.xlu0 %3477 }
 0x341   :  { %3515 = vst.msk [vmem:[#allocation3 + $0x7c] sm:$0xf] %vm2731_vm8, %v3478_v46 }
 0x342   :  { %3612 = vst.msk [vmem:[#allocation3 + $0x7c] sm:$0xf] %vm2927_vm9, %v7783_v11  ;;  %v3484_v9 = vpop.permute.xlu1 %3483 }
 0x343   :  { %3518 = vst.msk [vmem:[#allocation3 + $0xa0] sm:$0xf] %vm2731_vm8, %v3484_v9 }
 0x344   :  { %v7979_v48 = vpop.permute.xlu0 %2899  ;;  %3615 = vst.msk [vmem:[#allocation3 + $0xa0] sm:$0xf] %vm2927_vm9, %v7806_v55 }
 0x346   :  { %v7983_v41 = vpop.permute.xlu1 %2905 }
 0x348   :  { %v3482_v49 = vpop.permute.xlu0 %3481 }
 0x349   :  { %3517 = vst.msk [vmem:[#allocation3 + $0x94] sm:$0xf] %vm2731_vm8, %v3482_v49 }
 0x34a   :  { %3614 = vst.msk [vmem:[#allocation3 + $0x94] sm:$0xf] %vm2927_vm9, %v7850_v58  ;;  %v3488_v47 = vpop.permute.xlu1 %3487 }
 0x34b   :  { %3520 = vst.msk [vmem:[#allocation3 + $0xb8] sm:$0xf] %vm2731_vm8, %v3488_v47 }
 0x34c   :  { %v7989_v11 = vpop.permute.xlu0 %2903  ;;  %3617 = vst.msk [vmem:[#allocation3 + $0xb8] sm:$0xf] %vm2927_vm9, %v8452_v31 }
 0x34d   :  { %3937 = vst.msk [vmem:[#allocation3 + $0xb8] sm:$0xf] %vm3024_vm11, %v7509_v45 }
 0x34e   :  { %v7995_v55 = vpop.permute.xlu1 %2909 }
 0x350   :  { %v3486_v53 = vpop.permute.xlu0 %3485 }
 0x351   :  { %3519 = vst.msk [vmem:[#allocation3 + $0xac] sm:$0xf] %vm2731_vm8, %v3486_v53 }
 0x352   :  { %3616 = vst.msk [vmem:[#allocation3 + $0xac] sm:$0xf] %vm2927_vm9, %v7913_v2  ;;  %v3460_v58 = vpop.permute.xlu1 %3459 }
 0x353   :  { %3506 = vst.msk [vmem:[#allocation3 + $0x10] sm:$0xf] %vm2731_vm8, %v3460_v58 }
 0x354   :  { %v8001_v62 = vpop.permute.xlu0 %2907 }
 0x356   :  { %v8003_v28 = vpop.permute.xlu1 %2881 }
 0x358   :  { %v3458_v51 = vpop.permute.xlu0 %3457 }
 0x359   :  { %3505 = vst.msk [vmem:[#allocation3 + $0x4] sm:$0xf] %vm2731_vm8, %v3458_v51 }
 0x35a   :  { %v2690_v17 = vpop.permute.xlu1 %2689 }
 0x35b   :  { %2735 = vst.msk [vmem:[#allocation3 + $0x24] sm:$0xf] %vm2731_vm8, %v2690_v17  ;;  %v5355_v17 = vld [vmem:[#allocation3 + $0x8] ss:$12 sps:$4 sm:$0xff]  }
 0x35c   :  { %v2688_v45 = vpop.permute.xlu0 %2687  ;;  %2931 = vst.msk [vmem:[#allocation3 + $0x24] sm:$0xf] %vm2927_vm9, %v7925_v36 }
 0x35d   :  { %2734 = vst.msk [vmem:[#allocation3 + $0x18] sm:$0xf] %vm2731_vm8, %v2688_v45 }
 0x35e   :  { %2930 = vst.msk [vmem:[#allocation3 + $0x18] sm:$0xf] %vm2927_vm9, %v2884_v0  ;;  %v3881_v27 = vpop.permute.xlu1 %3880 }
 0x35f   :  { %3028 = vst.msk [vmem:[#allocation3 + $0x24] sm:$0xf] %vm3024_vm11, %v7587_v44  ;;  %3027 = vst.msk [vmem:[#allocation3 + $0x18] sm:$0xf] %vm3024_vm11, %v7594_v12  ;;  %v8453_v44 = vld [vmem:[#allocation25_spill] sm:$0xff] }
 0x360   :  { %v3879_v39 = vpop.permute.xlu0 %3878  ;;  %3925 = vst.msk [vmem:[#allocation3 + $0x28] sm:$0xf] %vm3024_vm11, %v3881_v27 }
 0x361   :  { %3924 = vst.msk [vmem:[#allocation3 + $0x1c] sm:$0xf] %vm3024_vm11, %v3879_v39  ;;  %v5359_v39 = vld [vmem:[#allocation3 + $0x20] ss:$12 sps:$4 sm:$0xff]  }
 0x362   :  { %v2694_v38 = vpop.permute.xlu1 %2693 }
 0x363   :  { %2737 = vst.msk [vmem:[#allocation3 + $0x3c] sm:$0xf] %vm2731_vm8, %v2694_v38  ;;  %v5361_v38 = vld [vmem:[#allocation3 + $0x50] ss:$12 sps:$4 sm:$0xff]  }
 0x364   :  { %v2692_v29 = vpop.permute.xlu0 %2691  ;;  %2933 = vst.msk [vmem:[#allocation3 + $0x3c] sm:$0xf] %vm2927_vm9, %v7945_v16 }
 0x365   :  { %2736 = vst.msk [vmem:[#allocation3 + $0x30] sm:$0xf] %vm2731_vm8, %v2692_v29  ;;  %v5362_v29 = vld [vmem:[#allocation3 + $0x68] ss:$12 sps:$4 sm:$0xff]  }
 0x366   :  { %2932 = vst.msk [vmem:[#allocation3 + $0x30] sm:$0xf] %vm2927_vm9, %v2888_v59  ;;  %v3885_v12 = vpop.permute.xlu1 %3884  ;;  %v5337_v2 = vld [vmem:[#allocation3 + $0x18] ss:$12 sps:$4 sm:$0xff]  }
 0x367   :  { %3030 = vst.msk [vmem:[#allocation3 + $0x3c] sm:$0xf] %vm3024_vm11, %v7654_v18  ;;  %3029 = vst.msk [vmem:[#allocation3 + $0x30] sm:$0xf] %vm3024_vm11, %v8453_v44  ;;  %v8454_v18 = vld [vmem:[#allocation24_spill] sm:$0xff] }
 0x368   :  { %v3883_v37 = vpop.permute.xlu0 %3882  ;;  %3927 = vst.msk [vmem:[#allocation3 + $0x40] sm:$0xf] %vm3024_vm11, %v3885_v12  ;;  %v5339_v6 = vld [vmem:[#allocation3 + $0x1c] ss:$12 sps:$4 sm:$0xff]   ;;  %v5363_v44 = vld [vmem:[#allocation3 + $0x80] ss:$12 sps:$4 sm:$0xff]  }
 0x369   :  { %3926 = vst.msk [vmem:[#allocation3 + $0x34] sm:$0xf] %vm3024_vm11, %v3883_v37  ;;  %4458 = vmatprep.mubr.bf16.mxu1 %v5339_v6  ;;  %v5364_v12 = vld [vmem:[#allocation3 + $0x98] ss:$12 sps:$4 sm:$0xff]   ;;  %v5365_v37 = vld [vmem:[#allocation3 + $0xb0] ss:$12 sps:$4 sm:$0xff]  }
 0x36a   :  { %4459 = vmatmul.mubr.bf16.vlgmr.msra.gmra.mxu1 %v5337_v2  ;;  %v2698_v35 = vpop.permute.xlu1 %2697 }
 0x36b   :  { %2739 = vst.msk [vmem:[#allocation3 + $0x54] sm:$0xf] %vm2731_vm8, %v2698_v35  ;;  %5253 = vmatpush3.bf16.msra.mxu1 %v8454_v18 }
 0x36c   :  { %v2696_v26 = vpop.permute.xlu0 %2695  ;;  %2935 = vst.msk [vmem:[#allocation3 + $0x54] sm:$0xf] %vm2927_vm9, %v7955_v21  ;;  %5254 = vmatprep.subr.bf16.mxu1 %v5347_v30 }
 0x36d   :  { %2738 = vst.msk [vmem:[#allocation3 + $0x48] sm:$0xf] %vm2731_vm8, %v2696_v26 }
 0x36e   :  { %2934 = vst.msk [vmem:[#allocation3 + $0x48] sm:$0xf] %vm2927_vm9, %v7965_v50  ;;  %v3557_v14 = vpop.permute.xlu1 %3556 }
 0x36f   :  { %3032 = vst.msk [vmem:[#allocation3 + $0x54] sm:$0xf] %vm3024_vm11, %v8455_v54  ;;  %3031 = vst.msk [vmem:[#allocation3 + $0x48] sm:$0xf] %vm3024_vm11, %v8456_v56  ;;  %v4108_v36 = vld [vmem:[#allocation3 + $0x3c] sm:$0xff]  ;;  %5255 = vmatpush3.bf16.msra.mxu1 %v5347_v30 }
 0x370   :  { %v3887_v63 = vpop.permute.xlu0 %3886  ;;  %3603 = vst.msk [vmem:[#allocation3 + $0x10] sm:$0xf] %vm2927_vm9, %v3557_v14  ;;  %v4106_v40 = vld [vmem:[#allocation3 + $0x30] sm:$0xff] }
 0x371   :  { %v5341_v60 = vld [vmem:[#allocation3 + $0x34] ss:$12 sps:$4 sm:$0xff]   ;;  %3928 = vst.msk [vmem:[#allocation3 + $0x4c] sm:$0xf] %vm3024_vm11, %v3887_v63  ;;  %v5116_v13 = vcombine.low %v4106_v40, %v4108_v36 }
 0x372   :  { %4466 = vmatprep.mubr.bf16.mxu1 %v5341_v60  ;;  %v2702_v5 = vpop.permute.xlu1 %2701 }
 0x373   :  { %4467 = vmatmul.mubr.bf16.gmra.mxu1 %v5116_v13  ;;  %2741 = vst.msk [vmem:[#allocation3 + $0x6c] sm:$0xf] %vm2731_vm8, %v2702_v5 }
 0x374   :  { %v3555_v19 = vpop.permute.xlu0 %3554  ;;  %2937 = vst.msk [vmem:[#allocation3 + $0x6c] sm:$0xf] %vm2927_vm9, %v7963_v1 }
 0x375   :  { %3602 = vst.msk [vmem:[#allocation3 + $0x4] sm:$0xf] %vm2927_vm9, %v3555_v19 }
 0x376   :  { %3034 = vst.msk [vmem:[#allocation3 + $0x6c] sm:$0xf] %vm3024_vm11, %v8457_v25  ;;  %v3893_v52 = vpop.permute.xlu1 %3892  ;;  %v4112_v61 = vld [vmem:[#allocation3 + $0x54] sm:$0xff] }
 0x377   :  { %3931 = vst.msk [vmem:[#allocation3 + $0x70] sm:$0xf] %vm3024_vm11, %v3893_v52 }
 0x378   :  { %v3891_v57 = vpop.permute.xlu0 %3890  ;;  %v4110_v24 = vld [vmem:[#allocation3 + $0x48] sm:$0xff] }
 0x379   :  { %v5343_v16 = vld [vmem:[#allocation3 + $0x4c] ss:$12 sps:$4 sm:$0xff]   ;;  %3930 = vst.msk [vmem:[#allocation3 + $0x64] sm:$0xf] %vm3024_vm11, %v3891_v57  ;;  %v5119_v0 = vcombine.low %v4110_v24, %v4112_v61 }
 0x37a   :  { %4474 = vmatprep.mubr.bf16.mxu1 %v5343_v16  ;;  %v2706_v3 = vpop.permute.xlu1 %2705 }
 0x37b   :  { %4475 = vmatmul.mubr.bf16.gmra.mxu1 %v5119_v0  ;;  %2743 = vst.msk [vmem:[#allocation3 + $0x84] sm:$0xf] %vm2731_vm8, %v2706_v3 }
 0x37c   :  { %v2704_v33 = vpop.permute.xlu0 %2703  ;;  %2939 = vst.msk [vmem:[#allocation3 + $0x84] sm:$0xf] %vm2927_vm9, %v7973_v4 }
 0x37d   :  { %2742 = vst.msk [vmem:[#allocation3 + $0x78] sm:$0xf] %vm2731_vm8, %v2704_v33 }
 0x37e   :  { %2938 = vst.msk [vmem:[#allocation3 + $0x78] sm:$0xf] %vm2927_vm9, %v7979_v48  ;;  %v4116_v21 = vld [vmem:[#allocation3 + $0x6c] sm:$0xff] }
 0x37f   :  { %3036 = vst.msk [vmem:[#allocation3 + $0x84] sm:$0xf] %vm3024_vm11, %v8458_v15  ;;  %3035 = vst.msk [vmem:[#allocation3 + $0x78] sm:$0xf] %vm3024_vm11, %v7815_v34  ;;  %v3897_v20 = vpop.permute.xlu1 %3896 }
 0x380   :  { %3933 = vst.msk [vmem:[#allocation3 + $0x88] sm:$0xf] %vm3024_vm11, %v3897_v20  ;;  %v4114_v42 = vld [vmem:[#allocation3 + $0x60] sm:$0xff] }
 0x381   :  { %v5345_v7 = vld [vmem:[#allocation3 + $0x64] ss:$12 sps:$4 sm:$0xff]   ;;  %v5122_v1 = vcombine.low %v4114_v42, %v4116_v21 }
 0x382   :  { %v3895_v59 = vpop.permute.xlu0 %3894  ;;  %4482 = vmatprep.mubr.bf16.mxu1 %v5345_v7 }
 0x383   :  { %3932 = vst.msk [vmem:[#allocation3 + $0x7c] sm:$0xf] %vm3024_vm11, %v3895_v59  ;;  %4483 = vmatmul.mubr.bf16.gmra.mxu1 %v5122_v1 }
 0x386   :  { %v2710_v50 = vpop.permute.xlu1 %2709 }
 0x387   :  { %2745 = vst.msk [vmem:[#allocation3 + $0x9c] sm:$0xf] %vm2731_vm8, %v2710_v50  ;;  %v4120_v10 = vld [vmem:[#allocation3 + $0x84] sm:$0xff] }
 0x388   :  { %v2708_v23 = vpop.permute.xlu0 %2707  ;;  %2941 = vst.msk [vmem:[#allocation3 + $0x9c] sm:$0xf] %vm2927_vm9, %v7983_v41 }
 0x389   :  { %2744 = vst.msk [vmem:[#allocation3 + $0x90] sm:$0xf] %vm2731_vm8, %v2708_v23 }
 0x38a   :  { %2940 = vst.msk [vmem:[#allocation3 + $0x90] sm:$0xf] %vm2927_vm9, %v7989_v11  ;;  %v3901_v34 = vpop.permute.xlu1 %3900  ;;  %v4118_v46 = vld [vmem:[#allocation3 + $0x78] sm:$0xff] }
 0x38b   :  { %3038 = vst.msk [vmem:[#allocation3 + $0x9c] sm:$0xf] %vm3024_vm11, %v7843_v22  ;;  %3037 = vst.msk [vmem:[#allocation3 + $0x90] sm:$0xf] %vm3024_vm11, %v7890_v43  ;;  %v5348_v9 = vld [vmem:[#allocation3 + $0x7c] ss:$12 sps:$4 sm:$0xff]   ;;  %v5125_v48 = vcombine.low %v4118_v46, %v4120_v10 }
 0x38c   :  { %v3899_v4 = vpop.permute.xlu0 %3898  ;;  %3935 = vst.msk [vmem:[#allocation3 + $0xa0] sm:$0xf] %vm3024_vm11, %v3901_v34  ;;  %4490 = vmatprep.mubr.bf16.mxu1 %v5348_v9 }
 0x38d   :  { %3934 = vst.msk [vmem:[#allocation3 + $0x94] sm:$0xf] %vm3024_vm11, %v3899_v4  ;;  %4491 = vmatmul.mubr.bf16.gmra.mxu1 %v5125_v48 }
 0x38e   :  { %v2714_v41 = vpop.permute.xlu1 %2713 }
 0x38f   :  { %2747 = vst.msk [vmem:[#allocation3 + $0xb4] sm:$0xf] %vm2731_vm8, %v2714_v41 }
 0x390   :  { %v2712_v49 = vpop.permute.xlu0 %2711  ;;  %2943 = vst.msk [vmem:[#allocation3 + $0xb4] sm:$0xf] %vm2927_vm9, %v7995_v55 }
 0x391   :  { %2746 = vst.msk [vmem:[#allocation3 + $0xa8] sm:$0xf] %vm2731_vm8, %v2712_v49 }
 0x392   :  { %2942 = vst.msk [vmem:[#allocation3 + $0xa8] sm:$0xf] %vm2927_vm9, %v8001_v62  ;;  %v2979_v22 = vpop.permute.xlu1 %2978 }
 0x393   :  { %3040 = vst.msk [vmem:[#allocation3 + $0xb4] sm:$0xf] %vm3024_vm11, %v7876_v32  ;;  %3039 = vst.msk [vmem:[#allocation3 + $0xa8] sm:$0xf] %vm3024_vm11, %v7927_v8  ;;  %v4124_v43 = vld [vmem:[#allocation3 + $0x9c] sm:$0xff] }
 0x394   :  { %v3903_v47 = vpop.permute.xlu0 %3902  ;;  %v4122_v11 = vld [vmem:[#allocation3 + $0x90] sm:$0xff] }
 0x395   :  { %v5350_v31 = vld [vmem:[#allocation3 + $0x94] ss:$12 sps:$4 sm:$0xff]   ;;  %3936 = vst.msk [vmem:[#allocation3 + $0xac] sm:$0xf] %vm3024_vm11, %v3903_v47  ;;  %v5128_v53 = vcombine.low %v4122_v11, %v4124_v43 }
 0x396   :  { %4498 = vmatprep.mubr.bf16.mxu1 %v5350_v31  ;;  %v2686_v55 = vpop.permute.xlu1 %2685 }
 0x397   :  { %4499 = vmatmul.mubr.bf16.gmra.mxu1 %v5128_v53  ;;  %2733 = vst.msk [vmem:[#allocation3 + $0xc] sm:$0xf] %vm2731_vm8, %v2686_v55 }
 0x398   :  { %v2977_v58 = vpop.permute.xlu0 %2976  ;;  %2929 = vst.msk [vmem:[#allocation3 + $0xc] sm:$0xf] %vm2927_vm9, %v8003_v28  ;;  %v5360_v28 = vld [vmem:[#allocation3 + $0x38] ss:$12 sps:$4 sm:$0xff]  }
 0x399   :  { %3025 = vst.msk [vmem:[#allocation3] sm:$0xf] %vm3024_vm11, %v2977_v58  ;;  %3026 = vst.msk [vmem:[#allocation3 + $0xc] sm:$0xf] %vm3024_vm11, %v2979_v22 }
 0x39a   :  { %v3877_v32 = vpop.permute.xlu1 %3876  ;;  %v5354_v51 = vld [vmem:[#allocation3 + $0xa8] ss:$12 sps:$4 sm:$0xff]  }
 0x39b   :  { %3923 = vst.msk [vmem:[#allocation3 + $0x10] sm:$0xf] %vm3024_vm11, %v3877_v32 }
 0x39c   :  { %v3875_v8 = vpop.permute.xlu0 %3874  ;;  %v5352_v62 = vld [vmem:[#allocation3 + $0xac] ss:$12 sps:$4 sm:$0xff]  }
 0x39d   :  { %3922 = vst.msk [vmem:[#allocation3 + $0x4] sm:$0xf] %vm3024_vm11, %v3875_v8  ;;  %4506 = vmatprep.mubr.bf16.mxu1 %v5352_v62 }
 0x39f   :  { %4507 = vmatmul.mubr.bf16.gmra.mxu1 %v5354_v51 }
 0x3a0   :  { %5256 = vmatprep.mubr.msk.bf16.mxu1 %vm1771_vm7, %v5355_v17  ;;  %v5356_v45 = vld [vmem:[#allocation3] ss:$12 sps:$4 sm:$0xff]  }
 0x3a4   :  { %v5358_v27 = vld [vmem:[#allocation3 + $0x4] ss:$12 sps:$4 sm:$0xff]  }
 0x3a5   :  { %4450 = vmatprep.mubr.bf16.mxu0 %v5358_v27 }
 0x3a6   :  { %4451 = vmatmul.mubr.bf16.vlgmr.msra.gmra.mxu0 %v5356_v45 }
 0x3a7   :  { %5257 = vmatmul.mubr.msk.bf16.vlgmr.msra.gmra.mxu1 %vm1771_vm7, %v5359_v39 }
 0x3a8   :  { %5260 = vmatprep.mubr.msk.bf16.mxu1 %vm1771_vm7, %v5360_v28 }
 0x3af   :  { %5261 = vmatmul.mubr.msk.bf16.gmra.mxu1 %vm1771_vm7, %v5361_v38 }
 0x3b0   :  { %5264 = vmatprep.mubr.msk.bf16.mxu1 %vm1771_vm7, %v5362_v29 }
 0x3b7   :  { %5265 = vmatmul.mubr.msk.bf16.gmra.mxu1 %vm1771_vm7, %v5363_v44 }
 0x3b8   :  { %5268 = vmatprep.mubr.msk.bf16.mxu1 %vm1771_vm7, %v5364_v12 }
 0x3bf   :  { %5269 = vmatmul.mubr.msk.bf16.gmra.mxu1 %vm1771_vm7, %v5365_v37 }
 0x42a   :  { %v5200_v2 = vpop.f32.mrf.mxu1 }
 0x42c   :  { %v5201_v6 = vpop.f32.mrf.mxu1 }
 0x42d   :  { %v5202_v10 = vadd.f32 %v5201_v6, %v5200_v2 }
 0x42e   :  { %v5203_v30 = vpop.f32.mrf.mxu1 }
 0x430   :  { %v5204_v35 = vpop.f32.mrf.mxu1 }
 0x431   :  { %v5205_v41 = vadd.f32 %v5204_v35, %v5203_v30 }
 0x433   :  { %v5206_v26 = vpop.f32.mrf.mxu1 }
 0x435   :  { %v5207_v18 = vpop.f32.mrf.mxu1 }
 0x436   :  { %v5208_v43 = vadd.f32 %v5207_v18, %v5206_v26 }
 0x437   :  { %v5209_v54 = vpop.f32.mrf.mxu1 }
 0x439   :  { %v5210_v56 = vpop.f32.mrf.mxu1 }
 0x43a   :  { %v5211_v17 = vadd.f32 %v5210_v56, %v5209_v54 }
 0x43b   :  { %v5212_v14 = vpop.f32.mrf.mxu1 }
 0x43d   :  { %v5213_v36 = vpop.f32.mrf.mxu1 }
 0x43e   :  { %v5214_v45 = vadd.f32 %v5213_v36, %v5212_v14 }
 0x43f   :  { %v5215_v63 = vpop.f32.mrf.mxu1 }
 0x441   :  { %v5216_v40 = vpop.f32.mrf.mxu1 }
 0x442   :  { %v5217_v12 = vadd.f32 %v5216_v40, %v5215_v63 }
 0x443   :  { %v5218_v60 = vpop.f32.mrf.mxu1 }
 0x445   :  { %v5219_v13 = vpop.f32.mrf.mxu1 }
 0x446   :  { %v5220_v56 = vadd.f32 %v5219_v13, %v5218_v60 }
 0x447   :  { %v8102_v5 = vpop.f32.mrf.mxu1 }
 0x449   :  { %v8104_v19 = vpop.f32.mrf.mxu1 }
 0x44d   :  { %v8106_v25 = vpop.f32.mrf.mxu1 }
 0x44f   :  { %v8108_v52 = vpop.f32.mrf.mxu1 }
 0x451   :  { %v8110_v57 = vpop.f32.mrf.mxu1 }
 0x453   :  { %v8112_v24 = vpop.f32.mrf.mxu1 }
 0x457   :  { %v8114_v61 = vpop.f32.mrf.mxu1 }
 0x459   :  { %v8116_v16 = vpop.f32.mrf.mxu1 }
 0x45b   :  { %v8118_v0 = vpop.f32.mrf.mxu1 }
 0x45d   :  { %v8120_v3 = vpop.f32.mrf.mxu1 }
 0x45f   :  { %v8122_v33 = vpop.f32.mrf.mxu1 }
 0x461   :  { %v8124_v15 = vpop.f32.mrf.mxu1 }
 0x463   :  { %v8126_v20 = vpop.f32.mrf.mxu1 }
 0x465   :  { %v8128_v21 = vpop.f32.mrf.mxu1 }
 0x466   :  { %v5194_v59 = vpop.f32.mrf.mxu0 }
 0x467   :  { %v5258_v42 = vpop.f32.mrf.mxu1 }
 0x468   :  { %v5195_v7 = vpop.f32.mrf.mxu0  ;;  %v8132_v48 = vadd.f32 %v5258_v42, %v5202_v10 }
 0x469   :  { %v4549_v1 = vpop.f32.mrf.mxu1  ;;  %v5196_v50 = vadd.f32 %v5195_v7, %v5194_v59 }
 0x46a   :  { %v5197_v23 = vpop.f32.mrf.mxu0  ;;  %v4653_v55 = vmul.f32 %v8132_v48, %v8132_v48  ;;  %v4617_v39 = vsel %vm1771_vm7, %v8132_v48, 0.0 }
 0x46b   :  { %v5259_v34 = vpop.f32.mrf.mxu1  ;;  %v8130_v4 = vadd.f32 %v5196_v50, %v4549_v1 }
 0x46c   :  { %v5198_v46 = vpop.f32.mrf.mxu0  ;;  %v8136_v11 = vadd.f32 %v5259_v34, %v5205_v41  ;;  %v4670_v30 = vsel %vm1771_vm7, %v4653_v55, 0.0  ;;  %v5229_v55 = vadd.f32 %v8112_v24, %v8110_v57 }
 0x46d   :  { %v4552_v9 = vpop.f32.mrf.mxu1  ;;  %v5199_v49 = vadd.f32 %v5198_v46, %v5197_v23  ;;  %v4651_v47 = vmul.f32 %v8130_v4, %v8130_v4  ;;  %v4614_v58 = vsel %vm1771_vm7, %v8130_v4, 0.0  ;;  %v5223_v46 = vadd.f32 %v8104_v19, %v8102_v5 }
 0x46e   :  { %v4654_v38 = vmul.f32 %v8136_v11, %v8136_v11  ;;  %v4619_v35 = vsel %vm1771_vm7, %v8136_v11, 0.0 }
 0x46f   :  { %v5262_v22 = vpop.f32.mrf.mxu1  ;;  %v8138_v31 = vadd.f32 %v5199_v49, %v4552_v9  ;;  %v4667_v28 = vsel %vm1771_vm7, %v4651_v47, 0.0  ;;  %v5226_v49 = vadd.f32 %v8108_v52, %v8106_v25 }
 0x470   :  { %v8161_v26 = vadd.f32 %v5262_v22, %v5214_v45  ;;  %v4672_v63 = vsel %vm1771_vm7, %v4654_v38, 0.0 }
 0x471   :  { %v4565_v53 = vpop.f32.mrf.mxu1  ;;  %v4615_v32 = vsel %vm1771_vm7, %v8138_v31, 0.0  ;;  %v4652_v8 = vmul.f32 %v8138_v31, %v8138_v31 }
 0x472   :  { %v8148_v62 = vadd.f32 %v5208_v43, %v4565_v53  ;;  %v4616_v27 = vadd.f32 %v4615_v32, %v4614_v58  ;;  %v4657_v23 = vmul.f32 %v8161_v26, %v8161_v26  ;;  %v4625_v22 = vsel %vm1771_vm7, %v8161_v26, 0.0 }
 0x473   :  { %v5263_v51 = vpop.f32.mrf.mxu1  ;;  %v4668_v29 = vsel %vm1771_vm7, %v4652_v8, 0.0 }
 0x474   :  { %v4618_v37 = vadd.f32 %v4617_v39, %v4616_v27  ;;  %v4669_v2 = vadd.f32 %v4668_v29, %v4667_v28  ;;  %v4655_v18 = vmul.f32 %v8148_v62, %v8148_v62  ;;  %v4621_v40 = vsel %vm1771_vm7, %v8148_v62, 0.0 }
 0x475   :  { %v4568_v44 = vpop.f32.mrf.mxu1  ;;  %v8168_v59 = vadd.f32 %v5263_v51, %v5217_v12  ;;  %v4678_v19 = vsel %vm1771_vm7, %v4657_v23, 0.0 }
 0x476   :  { %v8156_v6 = vadd.f32 %v5211_v17, %v4568_v44  ;;  %v4671_v14 = vadd.f32 %v4670_v30, %v4669_v2  ;;  %v4620_v36 = vadd.f32 %v4619_v35, %v4618_v37  ;;  %v4674_v60 = vsel %vm1771_vm7, %v4655_v18, 0.0 }
 0x477   :  { %v5266_v54 = vpop.f32.mrf.mxu1  ;;  %v4658_v43 = vmul.f32 %v8168_v59, %v8168_v59  ;;  %v4627_v25 = vsel %vm1771_vm7, %v8168_v59, 0.0  ;;  %v5232_v17 = vadd.f32 %v8116_v16, %v8114_v61  ;;  %v5235_v30 = vadd.f32 %v8120_v3, %v8118_v0 }
 0x478   :  { %v4656_v42 = vmul.f32 %v8156_v6, %v8156_v6  ;;  %v4622_v1 = vadd.f32 %v4621_v40, %v4620_v36  ;;  %v4673_v50 = vadd.f32 %v4672_v63, %v4671_v14  ;;  %v4623_v13 = vsel %vm1771_vm7, %v8156_v6, 0.0 }
 0x479   :  { %v4581_v7 = vpop.f32.mrf.mxu1  ;;  %v8195_v52 = vadd.f32 %v5266_v54, %v5226_v49  ;;  %v4680_v24 = vsel %vm1771_vm7, %v4658_v43, 0.0  ;;  %v5238_v54 = vadd.f32 %v8124_v15, %v8122_v33  ;;  %v5241_v40 = vadd.f32 %v8128_v21, %v8126_v20 }
 0x47a   :  { %v8177_v34 = vadd.f32 %v5220_v56, %v4581_v7  ;;  %v4675_v9 = vadd.f32 %v4674_v60, %v4673_v50  ;;  %v4624_v41 = vadd.f32 %v4623_v13, %v4622_v1  ;;  %v4676_v47 = vsel %vm1771_vm7, %v4656_v42, 0.0 }
 0x47b   :  { %v5267_v10 = vpop.f32.mrf.mxu1  ;;  %v4661_v12 = vmul.f32 %v8195_v52, %v8195_v52  ;;  %v4633_v56 = vsel %vm1771_vm7, %v8195_v52, 0.0 }
 0x47c   :  { %v4626_v58 = vadd.f32 %v4625_v22, %v4624_v41  ;;  %v4677_v32 = vadd.f32 %v4676_v47, %v4675_v9  ;;  %v4659_v8 = vmul.f32 %v8177_v34, %v8177_v34  ;;  %v4629_v27 = vsel %vm1771_vm7, %v8177_v34, 0.0 }
 0x47d   :  { %v4584_v53 = vpop.f32.mrf.mxu1  ;;  %v8204_v39 = vadd.f32 %v5267_v10, %v5229_v55  ;;  %v4686_v3 = vsel %vm1771_vm7, %v4661_v12, 0.0 }
 0x47e   :  { %v8190_v5 = vadd.f32 %v5223_v46, %v4584_v53  ;;  %v4679_v45 = vadd.f32 %v4678_v19, %v4677_v32  ;;  %v4628_v57 = vadd.f32 %v4627_v25, %v4626_v58  ;;  %v4682_v61 = vsel %vm1771_vm7, %v4659_v8, 0.0 }
 0x47f   :  { %v5270_v51 = vpop.f32.mrf.mxu1  ;;  %v4662_v14 = vmul.f32 %v8204_v39, %v8204_v39  ;;  %v4635_v33 = vsel %vm1771_vm7, %v8204_v39, 0.0 }
 0x480   :  { %v4660_v28 = vmul.f32 %v8190_v5, %v8190_v5  ;;  %v4630_v29 = vadd.f32 %v4629_v27, %v4628_v57  ;;  %v4681_v44 = vadd.f32 %v4680_v24, %v4679_v45  ;;  %v4631_v16 = vsel %vm1771_vm7, %v8190_v5, 0.0 }
 0x481   :  { %v4597_v38 = vpop.f32.mrf.mxu1  ;;  %v8231_v15 = vadd.f32 %v5270_v51, %v5238_v54  ;;  %v4688_v60 = vsel %vm1771_vm7, %v4662_v14, 0.0 }
 0x482   :  { %v8213_v37 = vadd.f32 %v5232_v17, %v4597_v38  ;;  %v4683_v35 = vadd.f32 %v4682_v61, %v4681_v44  ;;  %v4632_v18 = vadd.f32 %v4631_v16, %v4630_v29  ;;  %v4684_v36 = vsel %vm1771_vm7, %v4660_v28, 0.0 }
 0x483   :  { %v5271_v2 = vpop.f32.mrf.mxu1  ;;  %v4665_v9 = vmul.f32 %v8231_v15, %v8231_v15  ;;  %v4641_v47 = vsel %vm1771_vm7, %v8231_v15, 0.0 }
 0x484   :  { %v4634_v42 = vadd.f32 %v4633_v56, %v4632_v18  ;;  %v4685_v7 = vadd.f32 %v4684_v36, %v4683_v35  ;;  %v4663_v1 = vmul.f32 %v8213_v37, %v8213_v37  ;;  %v4637_v20 = vsel %vm1771_vm7, %v8213_v37, 0.0 }
 0x485   :  { %v4600_v63 = vpop.f32.mrf.mxu1  ;;  %v8238_v21 = vadd.f32 %v5271_v2, %v5241_v40  ;;  %v4694_v19 = vsel %vm1771_vm7, %v4665_v9, 0.0 }
 0x486   :  { %v8226_v0 = vadd.f32 %v5235_v30, %v4600_v63  ;;  %v4687_v50 = vadd.f32 %v4686_v3, %v4685_v7  ;;  %v4636_v23 = vadd.f32 %v4635_v33, %v4634_v42  ;;  %v4690_v41 = vsel %vm1771_vm7, %v4663_v1, 0.0 }
 0x487   :  { %v4666_v53 = vmul.f32 %v8238_v21, %v8238_v21  ;;  %v4643_v25 = vsel %vm1771_vm7, %v8238_v21, 0.0 }
 0x488   :  { %v4664_v13 = vmul.f32 %v8226_v0, %v8226_v0  ;;  %v4638_v10 = vadd.f32 %v4637_v20, %v4636_v23  ;;  %v4689_v46 = vadd.f32 %v4688_v60, %v4687_v50  ;;  %v4639_v49 = vsel %vm1771_vm7, %v8226_v0, 0.0 }
 0x489   :  { %v4696_v17 = vsel %vm1771_vm7, %v4666_v53, 0.0 }
 0x48a   :  { %v4691_v22 = vadd.f32 %v4690_v41, %v4689_v46  ;;  %v4640_v43 = vadd.f32 %v4639_v49, %v4638_v10  ;;  %v4692_v55 = vsel %vm1771_vm7, %v4664_v13, 0.0 }
 0x48c   :  { %v4642_v58 = vadd.f32 %v4641_v47, %v4640_v43  ;;  %v4693_v32 = vadd.f32 %v4692_v55, %v4691_v22 }
 0x48e   :  { %v4644_v8 = vadd.f32 %v4643_v25, %v4642_v58  ;;  %v4695_v51 = vadd.f32 %v4694_v19, %v4693_v32 }
 0x490   :  { %v4645_v45 = vrot.slane %v4644_v8, 4  ;;  %v4697_v57 = vadd.f32 %v4696_v17, %v4695_v51 }
 0x492   :  { %v4646_v24 = vadd.f32 %v4645_v45, %v4644_v8  ;;  %v4698_v27 = vrot.slane %v4697_v57, 4 }
 0x494   :  { %v4647_v28 = vrot.slane %v4646_v24, 2  ;;  %v4699_v38 = vadd.f32 %v4698_v27, %v4697_v57 }
 0x496   :  { %v4648_v29 = vadd.f32 %v4647_v28, %v4646_v24  ;;  %v4700_v44 = vrot.slane %v4699_v38, 2 }
 0x498   :  { %v4649_v12 = vrot.slane %v4648_v29, 1  ;;  %v4701_v61 = vadd.f32 %v4700_v44, %v4699_v38 }
 0x49a   :  { %v4650_v16 = vadd.f32 %v4649_v12, %v4648_v29  ;;  %v4702_v2 = vrot.slane %v4701_v61, 1 }
 0x49c   :  { %v4703_v30 = vadd.f32 %v4702_v2, %v4701_v61  ;;  %v4704_v35 = vmul.f32 0.0078125, %v4650_v16  ;;  %v4787_v2 = vld [vmem:[%s8352_s7] sm:$0xff] }
 0x49e   :  { %v4705_v18 = vmul.f32 0.0078125, %v4703_v30  ;;  %v4706_v54 = vmul.f32 %v4704_v35, %v4704_v35  ;;  %v4722_v63 = vsub.f32 %v8226_v0, %v4704_v35  ;;  %v4709_v40 = vsub.f32 %v8130_v4, %v4704_v35  ;;  %v4788_v30 = vld [vmem:[%s8352_s7 + $0x8] sm:$0xff] }
 0x49f   :  { %v4710_v42 = vsub.f32 %v8138_v31, %v4704_v35  ;;  %v4711_v7 = vsub.f32 %v8132_v48, %v4704_v35  ;;  %v4712_v3 = vsub.f32 %v8136_v11, %v4704_v35  ;;  %v4713_v33 = vsub.f32 %v8148_v62, %v4704_v35  ;;  %v5160_v48 = vld [vmem:[%s8350_s5] ss:$0 sm:$0xff] }
 0x4a0   :  { %v4707_v56 = vsub.f32 %v4705_v18, %v4706_v54  ;;  %v4714_v1 = vsub.f32 %v8156_v6, %v4704_v35  ;;  %v4715_v50 = vsub.f32 %v8161_v26, %v4704_v35  ;;  %v4716_v23 = vsub.f32 %v8168_v59, %v4704_v35 }
 0x4a1   :  { %v4717_v60 = vsub.f32 %v8177_v34, %v4704_v35  ;;  %v4718_v0 = vsub.f32 %v8190_v5, %v4704_v35  ;;  %v4719_v4 = vsub.f32 %v8195_v52, %v4704_v35  ;;  %v4720_v11 = vsub.f32 %v8204_v39, %v4704_v35  ;;  %v5161_v5 = vld [vmem:[%s8351_s6] ss:$0 sm:$0xff] }
 0x4a2   :  { %v4708_v14 = vmax.f32 %v4707_v56, 0.0  ;;  %v4721_v31 = vsub.f32 %v8213_v37, %v4704_v35  ;;  %v4723_v62 = vsub.f32 %v8231_v15, %v4704_v35  ;;  %v4724_v6 = vsub.f32 %v8238_v21, %v4704_v35  ;;  %v4800_v15 = vld [vmem:[%s8352_s7 + $0x68] sm:$0xff] }
 0x4a4   :  { %v4725_v36 = vadd.f32 1e-05, %v4708_v14  ;;  %v4789_v14 = vld [vmem:[%s8352_s7 + $0x10] sm:$0xff] }
 0x4a6   :  { %5368 = vrsqrt.f32 %v4725_v36  ;;  %v4790_v36 = vld [vmem:[%s8352_s7 + $0x18] sm:$0xff] }
 0x4b3   :  { %v5369_v20 = vpop.eup %5368 }
 0x4b4   :  { %v4740_v26 = vmul.f32 %v5369_v20, %v4722_v63  ;;  %v4727_v59 = vmul.f32 %v5369_v20, %v4709_v40  ;;  %v4728_v34 = vmul.f32 %v5369_v20, %v4710_v42  ;;  %v4729_v13 = vmul.f32 %v5369_v20, %v4711_v7  ;;  %v4791_v63 = vld [vmem:[%s8352_s7 + $0x20] sm:$0xff] }
 0x4b5   :  { %v4730_v52 = vmul.f32 %v5369_v20, %v4712_v3  ;;  %v4731_v10 = vmul.f32 %v5369_v20, %v4713_v33  ;;  %v4732_v46 = vmul.f32 %v5369_v20, %v4714_v1  ;;  %v4733_v9 = vmul.f32 %v5369_v20, %v4715_v50  ;;  %v4792_v33 = vld [vmem:[%s8352_s7 + $0x28] sm:$0xff]  ;;  %v4793_v1 = vld [vmem:[%s8352_s7 + $0x30] sm:$0xff]  ;;  %v4794_v50 = vld [vmem:[%s8352_s7 + $0x38] sm:$0xff] }
 0x4b6   :  { %v4762_v41 = vmul.f32 %v5160_v48, %v4740_v26  ;;  %v4734_v39 = vmul.f32 %v5369_v20, %v4716_v23  ;;  %v4735_v49 = vmul.f32 %v5369_v20, %v4717_v60  ;;  %v4736_v37 = vmul.f32 %v5369_v20, %v4718_v0  ;;  %v4799_v26 = vld [vmem:[%s8352_s7 + $0x60] sm:$0xff] }
 0x4b7   :  { %v4737_v21 = vmul.f32 %v5369_v20, %v4719_v4  ;;  %v4738_v22 = vmul.f32 %v5369_v20, %v4720_v11  ;;  %v4739_v43 = vmul.f32 %v5369_v20, %v4721_v31  ;;  %v4741_v47 = vmul.f32 %v5369_v20, %v4723_v62  ;;  %v4797_v11 = vld [vmem:[%s8352_s7 + $0x50] sm:$0xff] }
 0x4b8   :  { %v4784_v53 = vadd.f32 %v5161_v5, %v4762_v41  ;;  %v4742_v55 = vmul.f32 %v5369_v20, %v4724_v6  ;;  %v4749_v58 = vmul.f32 %v5160_v48, %v4727_v59  ;;  %v4750_v32 = vmul.f32 %v5160_v48, %v4728_v34  ;;  %v4795_v20 = vld [vmem:[%s8352_s7 + $0x40] sm:$0xff]  ;;  %v4798_v6 = vld [vmem:[%s8352_s7 + $0x58] sm:$0xff]  ;;  %v4801_v59 = vld [vmem:[%s8352_s7 + $0x70] sm:$0xff] }
 0x4b9   :  { %v4751_v19 = vmul.f32 %v5160_v48, %v4729_v13  ;;  %v4752_v25 = vmul.f32 %v5160_v48, %v4730_v52  ;;  %v4753_v8 = vmul.f32 %v5160_v48, %v4731_v10  ;;  %v4754_v51 = vmul.f32 %v5160_v48, %v4732_v46  ;;  %v4802_v52 = vld [vmem:[%s8352_s7 + $0x78] sm:$0xff] }
 0x4ba   :  { %v4816_v17 = vadd.f32 %v4800_v15, %v4784_v53  ;;  %v4755_v45 = vmul.f32 %v5160_v48, %v4733_v9  ;;  %v4756_v57 = vmul.f32 %v5160_v48, %v4734_v39  ;;  %v4757_v24 = vmul.f32 %v5160_v48, %v4735_v49 }
 0x4bb   :  { %v4758_v27 = vmul.f32 %v5160_v48, %v4736_v37  ;;  %v4759_v28 = vmul.f32 %v5160_v48, %v4737_v21  ;;  %v4760_v38 = vmul.f32 %v5160_v48, %v4738_v22  ;;  %v4761_v29 = vmul.f32 %v5160_v48, %v4739_v43 }
 0x4bc   :  { %v4832_v44 = vmax.f32 %v4816_v17, 0.0  ;;  %v4763_v12 = vmul.f32 %v5160_v48, %v4741_v47  ;;  %v4764_v61 = vmul.f32 %v5160_v48, %v4742_v55  ;;  %v4771_v16 = vadd.f32 %v5161_v5, %v4749_v58  ;;  %v4796_v48 = vld [vmem:[%s8352_s7 + $0x48] sm:$0xff]  ;;  %s5370_s7 = scalar_lea.vmem %s4857_s19, 2048 }
 0x4bd   :  { %v4772_v35 = vadd.f32 %v5161_v5, %v4750_v32  ;;  %v4773_v18 = vadd.f32 %v5161_v5, %v4751_v19  ;;  %v4774_v54 = vadd.f32 %v5161_v5, %v4752_v25  ;;  %v4775_v56 = vadd.f32 %v5161_v5, %v4753_v8  ;;  %p5371_p0 = scmp.ne.s32.totalorder %s4857_s19, %s5370_s7  ;;  %p5376_p2 = scmp.lt.s32.totalorder %s5370_s7, %s5370_s7 }
 0x4be   :  { %4848 = vst.msk [vmem:[#allocation4 + $0x68] sm:$0xff] %vm1771_vm7, %v4832_v44  ;;  %v4776_v40 = vadd.f32 %v5161_v5, %v4754_v51  ;;  %v4777_v42 = vadd.f32 %v5161_v5, %v4755_v45  ;;  %v4778_v7 = vadd.f32 %v5161_v5, %v4756_v57  ;;  %v4779_v3 = vadd.f32 %v5161_v5, %v4757_v24 }
 0x4bf   :  { %v4780_v23 = vadd.f32 %v5161_v5, %v4758_v27  ;;  %v4781_v60 = vadd.f32 %v5161_v5, %v4759_v28  ;;  %v4782_v0 = vadd.f32 %v5161_v5, %v4760_v38  ;;  %v4783_v4 = vadd.f32 %v5161_v5, %v4761_v29  ;;  %p5377_p3 = por %p5376_p2, %p5375_p1 }
 0x4c0   :  { %v4785_v31 = vadd.f32 %v5161_v5, %v4763_v12  ;;  %v4786_v62 = vadd.f32 %v5161_v5, %v4764_v61  ;;  %v4803_v34 = vadd.f32 %v4787_v2, %v4771_v16  ;;  %v4804_v13 = vadd.f32 %v4788_v30, %v4772_v35 }
 0x4c1   :  { %v4805_v10 = vadd.f32 %v4789_v14, %v4773_v18  ;;  %v4806_v5 = vadd.f32 %v4790_v36, %v4774_v54  ;;  %v4807_v46 = vadd.f32 %v4791_v63, %v4775_v56  ;;  %v4808_v9 = vadd.f32 %v4792_v33, %v4776_v40  ;;  %p5378_p4 = pnand %p5377_p3, %p5371_p0 }
 0x4c2   :  { %v4809_v41 = vadd.f32 %v4793_v1, %v4777_v42  ;;  %v4810_v39 = vadd.f32 %v4794_v50, %v4778_v7  ;;  %v4811_v49 = vadd.f32 %v4795_v20, %v4779_v3  ;;  %v4812_v37 = vadd.f32 %v4796_v48, %v4780_v23 }
 0x4c3   :  { %v4813_v15 = vadd.f32 %v4797_v11, %v4781_v60  ;;  %v4814_v21 = vadd.f32 %v4798_v6, %v4782_v0  ;;  %v4815_v22 = vadd.f32 %v4799_v26, %v4783_v4  ;;  %v4817_v43 = vadd.f32 %v4801_v59, %v4785_v31 }
 0x4c4   :  { %v4818_v47 = vadd.f32 %v4802_v52, %v4786_v62  ;;  %v4819_v53 = vmax.f32 %v4803_v34, 0.0  ;;  %v4820_v55 = vmax.f32 %v4804_v13, 0.0  ;;  %v4821_v58 = vmax.f32 %v4805_v10, 0.0 }
 0x4c5   :  { %v4822_v32 = vmax.f32 %v4806_v5, 0.0  ;;  %v4823_v19 = vmax.f32 %v4807_v46, 0.0  ;;  %v4824_v25 = vmax.f32 %v4808_v9, 0.0  ;;  %v4825_v8 = vmax.f32 %v4809_v41, 0.0 }
 0x4c6   :  { %v4826_v51 = vmax.f32 %v4810_v39, 0.0  ;;  %v4827_v17 = vmax.f32 %v4811_v49, 0.0  ;;  %v4828_v45 = vmax.f32 %v4812_v37, 0.0  ;;  %v4829_v57 = vmax.f32 %v4813_v15, 0.0  ;;  %4835 = vst.msk [vmem:[#allocation4] sm:$0xff] %vm1771_vm7, %v4819_v53  ;;  %4836 = vst.msk [vmem:[#allocation4 + $0x8] sm:$0xff] %vm1771_vm7, %v4820_v55 }
 0x4c7   :  { %4837 = vst.msk [vmem:[#allocation4 + $0x10] sm:$0xff] %vm1771_vm7, %v4821_v58  ;;  %v4830_v24 = vmax.f32 %v4814_v21, 0.0  ;;  %v4831_v27 = vmax.f32 %v4815_v22, 0.0  ;;  %v4833_v28 = vmax.f32 %v4817_v43, 0.0  ;;  %v4834_v38 = vmax.f32 %v4818_v47, 0.0  ;;  %4838 = vst.msk [vmem:[#allocation4 + $0x18] sm:$0xff] %vm1771_vm7, %v4822_v32 }
 0x4c8   :  { %4839 = vst.msk [vmem:[#allocation4 + $0x20] sm:$0xff] %vm1771_vm7, %v4823_v19  ;;  %4840 = vst.msk [vmem:[#allocation4 + $0x28] sm:$0xff] %vm1771_vm7, %v4824_v25 }
 0x4c9   :  { %4841 = vst.msk [vmem:[#allocation4 + $0x30] sm:$0xff] %vm1771_vm7, %v4825_v8  ;;  %4842 = vst.msk [vmem:[#allocation4 + $0x38] sm:$0xff] %vm1771_vm7, %v4826_v51 }
 0x4ca   :  { %4843 = vst.msk [vmem:[#allocation4 + $0x40] sm:$0xff] %vm1771_vm7, %v4827_v17  ;;  %4844 = vst.msk [vmem:[#allocation4 + $0x48] sm:$0xff] %vm1771_vm7, %v4828_v45 }
 0x4cb   :  { %4845 = vst.msk [vmem:[#allocation4 + $0x50] sm:$0xff] %vm1771_vm7, %v4829_v57  ;;  %4846 = vst.msk [vmem:[#allocation4 + $0x58] sm:$0xff] %vm1771_vm7, %v4830_v24 }
 0x4cc   :  { %4847 = vst.msk [vmem:[#allocation4 + $0x60] sm:$0xff] %vm1771_vm7, %v4831_v27  ;;  %4849 = vst.msk [vmem:[#allocation4 + $0x70] sm:$0xff] %vm1771_vm7, %v4833_v28 }
 0x4cd   :  { %4850 = vst.msk [vmem:[#allocation4 + $0x78] sm:$0xff] %vm1771_vm7, %v4834_v38 }
 0x4ce   :  { %5381 = shalt.err (!%p5378_p4)
}
 0x4cf   :  { %s5401_s20 = smov 128   ;;  %s5402_s10 = smov 8  }
 0x4d0   :  { %4862 = dma.vmem_to_hbm [thread:$0]  %s4857_s19, 2048, %s8353_s8, [#allocation5], %s5401_s20, %s5401_s20, %s5402_s10  }
 0x4d1   :  { %5390 = dma.done.wait [#allocation5], 2048  }
 0x4d2   :  { %5391 = vsyncadd [#allocation5], 4294965248 }
 0x4d3   :  { %4866 = vsyncpa [#allocation5], 1 }

</bundles_post_ra>
